<compile_context>
chip_gen: v6e
topology: v6e:2x2x1
jax: 0.10.0
libtpu: 0.0.40
codegen_flags: <defaults>
</compile_context>

<pallas_src>
import functools
import math

import jax
import jax.numpy as jnp
from jax.experimental import pallas as pl
from jax.experimental.pallas import tpu as pltpu


_VMEM_LIMIT = 32 * 1024 * 1024   # safe on v5e/v6e/v7x (>= v5e default, == v6e/v7x default)


# ----------------------------- helpers -------------------------------------

def _gelu_tanh(x):
    c = math.sqrt(2.0 / math.pi)
    return 0.5 * x * (1.0 + jnp.tanh(c * (x + 0.044715 * x * x * x)))


# ----------------------- fused tiled matmul kernel --------------------------

def _fused_matmul_kernel(*refs, in_ln, has_bias, has_res, out_ln, act,
                         eps_in, eps_out):
    it = iter(refs)
    x_ref = next(it)
    w_ref = next(it)
    g_ref = next(it) if in_ln else None
    bln_ref = next(it) if in_ln else None
    bias_ref = next(it) if has_bias else None
    res_ref = next(it) if has_res else None
    og_ref = next(it) if out_ln else None
    ob_ref = next(it) if out_ln else None
    o_ref = next(it)
    acc_ref = next(it)

    k = pl.program_id(2)

    @pl.when(k == 0)
    def _init():
        acc_ref[...] = jnp.zeros_like(acc_ref)

    if in_ln:
        # input LayerNorm fused into the matmul (wrapper guarantees tk == K).
        x = x_ref[...].astype(jnp.float32)
        mu = jnp.mean(x, axis=-1, keepdims=True)
        var = jnp.mean((x - mu) ** 2, axis=-1, keepdims=True)
        x = (x - mu) * jax.lax.rsqrt(var + eps_in)
        x = (x * g_ref[...] + bln_ref[...]).astype(jnp.bfloat16)
    else:
        # no f32 round-trip: inputs are usually already bf16 (no-op cast).
        x = x_ref[...].astype(jnp.bfloat16)

    acc_ref[...] += jnp.dot(x, w_ref[...].astype(jnp.bfloat16),
                            preferred_element_type=jnp.float32)

    @pl.when(k == pl.num_programs(2) - 1)
    def _finish():
        acc = acc_ref[...]
        if has_bias:
            acc = acc + bias_ref[...]
        if act == "gelu":
            acc = _gelu_tanh(acc)
        if out_ln:
            # LayerNorm2d over channels fused into the epilogue (tn == N).
            mu = jnp.mean(acc, axis=-1, keepdims=True)
            var = jnp.mean((acc - mu) ** 2, axis=-1, keepdims=True)
            acc = (acc - mu) * jax.lax.rsqrt(var + eps_out)
            acc = acc * og_ref[...] + ob_ref[...]
        if has_res:
            acc = acc + res_ref[...].astype(jnp.float32)
        o_ref[...] = acc.astype(o_ref.dtype)


def fused_matmul(x, w, bias=None, *, in_ln=None, out_ln=None, act="none",
                 residual=None, out_dtype=jnp.float32):
    """y = epilogue(LN?(x) @ w (+ bias) (+ gelu) (+outLN) (+ residual)).

    x:(M,K), w:(K,N) (bf16), bias:(N,), residual:(M,N) f32; LN tuples are
    (gamma, beta, eps).  Tiled over a (M/tm, N/tn, K/tk) grid with a f32 VMEM
    accumulator; MXU inputs are bf16, accumulation stays f32.
    """
    M, K = x.shape
    K2, N = w.shape
    assert K == K2

    TM, TN, TK = 512, 512, 512

    tk = K if (in_ln is not None or K <= TK) else TK
    tn = N if (out_ln is not None or N <= TN) else TN
    tm = M if M <= TM else TM

    Mp = pl.cdiv(M, tm) * tm
    Kp = pl.cdiv(K, tk) * tk
    Np = pl.cdiv(N, tn) * tn
    if in_ln is not None:
        assert Kp == K, "input-LN fusion requires an untiled K axis"
    if out_ln is not None:
        assert Np == N, "output-LN fusion requires an untiled N axis"

    xp = x if (Mp, Kp) == (M, K) else jnp.pad(x, ((0, Mp - M), (0, Kp - K)))
    wp = w if (Kp, Np) == (K, N) else jnp.pad(w, ((0, Kp - K), (0, Np - N)))

    inputs = [xp, wp]
    in_specs = [pl.BlockSpec((tm, tk), lambda i, j, k: (i, k)),
                pl.BlockSpec((tk, tn), lambda i, j, k: (k, j))]

    eps_in = 0.0
    if in_ln is not None:
        g, b_, e = in_ln
        inputs += [g.reshape(1, K).astype(jnp.float32),
                   b_.reshape(1, K).astype(jnp.float32)]
        in_specs += [pl.BlockSpec((1, tk), lambda i, j, k: (0, k)),
                     pl.BlockSpec((1, tk), lambda i, j, k: (0, k))]
        eps_in = float(e)

    if bias is not None:
        bp = bias.reshape(1, N).astype(jnp.float32)
        if Np != N:
            bp = jnp.pad(bp, ((0, 0), (0, Np - N)))
        inputs.append(bp)
        in_specs.append(pl.BlockSpec((1, tn), lambda i, j, k: (0, j)))

    if residual is not None:
        rp = residual
        if (Mp, Np) != (M, N):
            rp = jnp.pad(rp, ((0, Mp - M), (0, Np - N)))
        inputs.append(rp)
        in_specs.append(pl.BlockSpec((tm, tn), lambda i, j, k: (i, j)))

    eps_out = 0.0
    if out_ln is not None:
        og, ob, e = out_ln
        inputs += [og.reshape(1, N).astype(jnp.float32),
                   ob.reshape(1, N).astype(jnp.float32)]
        in_specs += [pl.BlockSpec((1, tn), lambda i, j, k: (0, j)),
                     pl.BlockSpec((1, tn), lambda i, j, k: (0, j))]
        eps_out = float(e)

    grid = (Mp // tm, Np // tn, Kp // tk)
    kernel = functools.partial(
        _fused_matmul_kernel,
        in_ln=in_ln is not None, has_bias=bias is not None,
        has_res=residual is not None, out_ln=out_ln is not None,
        act=act, eps_in=eps_in, eps_out=eps_out)

    out = pl.pallas_call(
        kernel,
        out_shape=jax.ShapeDtypeStruct((Mp, Np), out_dtype),
        grid=grid,
        in_specs=in_specs,
        out_specs=pl.BlockSpec((tm, tn), lambda i, j, k: (i, j)),
        scratch_shapes=[pltpu.VMEM((tm, tn), jnp.float32)],
        compiler_params=pltpu.CompilerParams(
            dimension_semantics=("parallel", "parallel", "arbitrary"),
            vmem_limit_bytes=_VMEM_LIMIT),
        cost_estimate=pl.CostEstimate(
            flops=2 * Mp * Np * Kp,
            transcendentals=Mp * Np if act == "gelu" else 0,
            bytes_accessed=2 * (Mp * Kp + Kp * Np) + 4 * Mp * Np),
    )(*inputs)

    if (Mp, Np) != (M, N):
        out = out[:M, :N]
    return out


# ------------------------- flash attention kernel ---------------------------

def _flash_attn_kernel(q_ref, k_ref, v_ref, o_ref, m_sc, l_sc, acc_sc,
                       *, nh, hd, scale, sub_kv):
    kv = pl.program_id(2)

    @pl.when(kv == 0)
    def _init():
        m_sc[...] = jnp.full_like(m_sc, -jnp.inf)
        l_sc[...] = jnp.zeros_like(l_sc)
        acc_sc[...] = jnp.zeros_like(acc_sc)

    tkv = k_ref.shape[1]
    n_sub = tkv // sub_kv

    # Online softmax over kv sub-tiles, looping heads with static lane slices
    # of the full-C blocks (no head-split transpose in HBM).
    for j in range(n_sub):
        lo = j * sub_kv
        for h in range(nh):
            c0 = h * hd
            qh = q_ref[0, :, c0:c0 + hd]                      # (tq, hd)  bf16
            kh = k_ref[0, lo:lo + sub_kv, c0:c0 + hd]         # (sub, hd) bf16
            vh = v_ref[0, lo:lo + sub_kv, c0:c0 + hd]         # (sub, hd) bf16
            s = jax.lax.dot_general(
                qh, kh, (((1,), (1,)), ((), ())),
                preferred_element_type=jnp.float32) * scale   # (tq, sub)

            m_prev = m_sc[h]                                   # (tq, 1)
            m_new = jnp.maximum(m_prev, jnp.max(s, axis=-1, keepdims=True))
            alpha = jnp.exp(m_prev - m_new)
            p = jnp.exp(s - m_new)
            l_sc[h] = alpha * l_sc[h] + jnp.sum(p, axis=-1, keepdims=True)
            pv = jnp.dot(p.astype(jnp.bfloat16), vh,
                         preferred_element_type=jnp.float32)   # (tq, hd)
            acc_sc[:, c0:c0 + hd] = alpha * acc_sc[:, c0:c0 + hd] + pv
            m_sc[h] = m_new

    @pl.when(kv == pl.num_programs(2) - 1)
    def _finish():
        # Assemble the full-C row once -> one lane-dense store.
        parts = []
        for h in range(nh):
            inv = pl.reciprocal(l_sc[h], approx=True)          # (tq, 1)
            parts.append(acc_sc[:, h * hd:(h + 1) * hd] * inv)
        o_ref[0] = jnp.concatenate(parts, axis=-1).astype(o_ref.dtype)


def flash_attention(q, k, v, *, num_heads, scale, out_dtype=jnp.bfloat16):
    """q,k,v: (B, T, C) bf16, heads packed along C.  Returns (B, T, C)."""
    B, T, C = q.shape
    assert C % num_heads == 0
    hd = C // num_heads

    if T <= 256:
        tq = tkv = T
    elif T % 128 == 0:
        tq = 128
        tkv = 512 if T % 512 == 0 else 128
    else:
        tq = tkv = T
    sub_kv = 128 if tkv % 128 == 0 else tkv
    assert T % tq == 0 and T % tkv == 0 and tkv % sub_kv == 0

    grid = (B, T // tq, T // tkv)
    kernel = functools.partial(_flash_attn_kernel, nh=num_heads, hd=hd,
                               scale=float(scale), sub_kv=sub_kv)
    return pl.pallas_call(
        kernel,
        out_shape=jax.ShapeDtypeStruct((B, T, C), out_dtype),
        grid=grid,
        in_specs=[pl.BlockSpec((1, tq, C), lambda b, qi, ki: (b, qi, 0)),
                  pl.BlockSpec((1, tkv, C), lambda b, qi, ki: (b, ki, 0)),
                  pl.BlockSpec((1, tkv, C), lambda b, qi, ki: (b, ki, 0))],
        out_specs=pl.BlockSpec((1, tq, C), lambda b, qi, ki: (b, qi, 0)),
        scratch_shapes=[pltpu.VMEM((num_heads, tq, 1), jnp.float32),
                        pltpu.VMEM((num_heads, tq, 1), jnp.float32),
                        pltpu.VMEM((tq, C), jnp.float32)],
        compiler_params=pltpu.CompilerParams(
            dimension_semantics=("parallel", "parallel", "arbitrary"),
            vmem_limit_bytes=_VMEM_LIMIT),
        cost_estimate=pl.CostEstimate(
            flops=4 * B * T * T * C,
            transcendentals=B * T * T * num_heads,
            bytes_accessed=2 * 4 * B * T * C),
    )(q, k, v)


# ---------------------- neck 3x3 conv + LayerNorm2d --------------------------

def _neck_conv3_kernel(x_ref, w_ref, g_ref, b_ref, o_ref, acc_ref, *, eps):
    H, W, C = o_ref.shape[1], o_ref.shape[2], o_ref.shape[3]
    acc_ref[...] = jnp.zeros_like(acc_ref)
    for t in range(9):                  # accumulate 9 taps from the haloed block
        kh, kw = t // 3, t % 3
        patch = x_ref[0, kh:kh + H, kw:kw + W, :]            # bf16
        acc_ref[...] += jnp.dot(patch.reshape(H * W, C), w_ref[t],
                                preferred_element_type=jnp.float32)
    acc = acc_ref[...]
    mu = jnp.mean(acc, axis=-1, keepdims=True)
    var = jnp.mean((acc - mu) ** 2, axis=-1, keepdims=True)
    acc = (acc - mu) * jax.lax.rsqrt(var + eps)
    acc = acc * g_ref[...] + b_ref[...]
    o_ref[0] = acc.reshape(H, W, C).astype(o_ref.dtype)


def neck_conv3x3_ln(y, w9, gamma, beta, eps):
    """3x3 conv (pad=1, no bias) + LayerNorm2d.  y:(B,H,W,C) bf16, w9:(9,C,C) bf16."""
    B, H, W, C = y.shape
    yp = jnp.pad(y, ((0, 0), (1, 1), (1, 1), (0, 0)))
    return pl.pallas_call(
        functools.partial(_neck_conv3_kernel, eps=float(eps)),
        out_shape=jax.ShapeDtypeStruct((B, H, W, C), jnp.float32),
        grid=(B,),
        in_specs=[pl.BlockSpec((1, H + 2, W + 2, C), lambda b: (b, 0, 0, 0)),
                  pl.BlockSpec((9, C, C), lambda b: (0, 0, 0)),
                  pl.BlockSpec((1, C), lambda b: (0, 0)),
                  pl.BlockSpec((1, C), lambda b: (0, 0))],
        out_specs=pl.BlockSpec((1, H, W, C), lambda b: (b, 0, 0, 0)),
        scratch_shapes=[pltpu.VMEM((H * W, C), jnp.float32)],
        compiler_params=pltpu.CompilerParams(
            dimension_semantics=("parallel",),
            vmem_limit_bytes=_VMEM_LIMIT),
        cost_estimate=pl.CostEstimate(
            flops=2 * B * H * W * C * C * 9,
            transcendentals=0,
            bytes_accessed=2 * B * (H + 2) * (W + 2) * C + 2 * 9 * C * C
                           + 4 * B * H * W * C),
    )(yp, w9, gamma.reshape(1, C).astype(jnp.float32),
      beta.reshape(1, C).astype(jnp.float32))


# --------------------------- model forward (glue) ---------------------------

def block_forward(blk, x_res, B, HW, cfg):
    """One ViT Block (window_size=0, use_rel_pos=False, ffn_adapt=False).

    x_res: (B*HW, C) f32 residual stream (image tokens only).

    The VPT prompt token is not carried: in the reference it is sliced off
    before norm1/attention, the MLP is per-token, and the encoder strips it
    after every block, so it never influences the image tokens or the output.
    """
    C = x_res.shape[1]
    nh = cfg["num_heads"]
    hd = C // nh
    scale = hd ** -0.5
    ln1 = (blk["n1_g"], blk["n1_b"], 1e-5)

    # norm1 fused into each projection; q/k/v stay lane-dense (B, T, C) bf16.
    q = fused_matmul(x_res, blk["wq"], blk["bq"], in_ln=ln1,
                     out_dtype=jnp.bfloat16).reshape(B, HW, C)
    k = fused_matmul(x_res, blk["wk"], blk["bk"], in_ln=ln1,
                     out_dtype=jnp.bfloat16).reshape(B, HW, C)
    v = fused_matmul(x_res, blk["wv"], blk["bv"], in_ln=ln1,
                     out_dtype=jnp.bfloat16).reshape(B, HW, C)

    o = flash_attention(q, k, v, num_heads=nh, scale=scale)      # (B, HW, C) bf16

    # proj matmul with the attention residual fused into its epilogue (f32 out).
    x1 = fused_matmul(o.reshape(B * HW, C), blk["proj_w"], blk["proj_b"],
                      residual=x_res)

    # MLP: norm2 fused into mlp_w1 (+GELU, bf16 hidden); residual fused into mlp_w2.
    h = fused_matmul(x1, blk["mlp_w1"], blk["mlp_b1"],
                     in_ln=(blk["n2_g"], blk["n2_b"], 1e-5), act="gelu",
                     out_dtype=jnp.bfloat16)
    x2 = fused_matmul(h, blk["mlp_w2"], blk["mlp_b2"], residual=x1)
    return x2


def image_encoder_forward(params, x, cfg):
    """x: (B, in_chans, img, img) NCHW.  Returns [y] with y NCHW."""
    B, Cin, Himg, Wimg = x.shape
    p = cfg["patch_size"]
    E = cfg["embed_dim"]
    Oc = cfg["out_chans"]
    Hn, Wn = Himg // p, Wimg // p
    HW = Hn * Wn

    # ---- PatchEmbed: Conv2d(k=stride=p) as im2col + matmul ----
    xr = x.reshape(B, Cin, Hn, p, Wn, p).transpose(0, 2, 4, 1, 3, 5)
    xr = xr.reshape(B * HW, Cin * p * p)
    tok = fused_matmul(xr, params["patch_w"], params["patch_b"])      # f32

    # ---- absolute position embedding (grids match here) ----
    # TODO(synk): the F.interpolate(bilinear) pos_embed resize path is not
    # implemented (only needed when pos_embed grid != token grid).
    xt = tok.reshape(B, Hn, Wn, E) + params["pos_embed"]

    # ---- transformer blocks (f32 residual stream, image tokens only) ----
    x_res = xt.reshape(B * HW, E)
    for blk in params["blocks"]:
        x_res = block_forward(blk, x_res, B, HW, cfg)

    # ---- neck ----
    # 1x1 conv (no bias) + LayerNorm2d (eps=1e-6) fused into the matmul epilogue.
    y = fused_matmul(x_res, params["neck_w1"],
                     out_ln=(params["neck_ln1_g"], params["neck_ln1_b"], 1e-6),
                     out_dtype=jnp.bfloat16)
    y = y.reshape(B, Hn, Wn, Oc)
    # 3x3 conv (pad=1, no bias) + LayerNorm2d in a single accumulating kernel.
    y = neck_conv3x3_ln(y, params["neck_w2"],
                        params["neck_ln2_g"], params["neck_ln2_b"], eps=1e-6)
    return [y.transpose(0, 3, 1, 2)]     # back to NCHW


# ------------------------------ parameter init ------------------------------

def init_params(key, cfg):
    E = cfg["embed_dim"]
    Cin = cfg["in_chans"]
    p = cfg["patch_size"]
    Hn = Wn = cfg["img_size"] // p
    Mm = int(E * cfg["mlp_ratio"])
    Oc = cfg["out_chans"]

    keys = iter(jax.random.split(key, 256))

    def w32(shape, scale=0.02):
        return scale * jax.random.normal(next(keys), shape, jnp.float32)

    def wb(shape, scale=0.02):               # matmul weights stored bf16
        return w32(shape, scale).astype(jnp.bfloat16)

    params = {
        "patch_w": wb((Cin * p * p, E)),     # conv k=stride=p, rows in (cin,kh,kw) order
        "patch_b": jnp.zeros((E,), jnp.float32),
        "pos_embed": w32((1, Hn, Wn, E)),
        "blocks": [],
        "neck_w1": wb((E, Oc)),              # 1x1 conv, no bias
        "neck_ln1_g": jnp.ones((Oc,), jnp.float32),
        "neck_ln1_b": jnp.zeros((Oc,), jnp.float32),
        "neck_w2": wb((9, Oc, Oc)),          # 3x3 conv as (kh*3+kw, cin, cout)
        "neck_ln2_g": jnp.ones((Oc,), jnp.float32),
        "neck_ln2_b": jnp.zeros((Oc,), jnp.float32),
    }
    for _ in range(cfg["depth"]):
        params["blocks"].append({
            # Adapter_embeddings[i]; unused by the forward output (the prompt
            # token never mixes with image tokens and is stripped per block).
            "vpt": w32((1, 1, E)),
            "n1_g": jnp.ones((E,), jnp.float32),
            "n1_b": jnp.zeros((E,), jnp.float32),
            # qkv Linear split into three (E,E) weights at parameter-prep time
            # (equivalent to columns [0:E], [E:2E], [2E:3E] of W_qkv^T).
            "wq": wb((E, E)), "bq": jnp.zeros((E,), jnp.float32),
            "wk": wb((E, E)), "bk": jnp.zeros((E,), jnp.float32),
            "wv": wb((E, E)), "bv": jnp.zeros((E,), jnp.float32),
            "proj_w": wb((E, E)),
            "proj_b": jnp.zeros((E,), jnp.float32),
            "n2_g": jnp.ones((E,), jnp.float32),
            "n2_b": jnp.zeros((E,), jnp.float32),
            "mlp_w1": wb((E, Mm)),
            "mlp_b1": jnp.zeros((Mm,), jnp.float32),
            "mlp_w2": wb((Mm, E)),
            "mlp_b2": jnp.zeros((E,), jnp.float32),
        })
    return params


# ----------------------------------- main -----------------------------------

if __name__ == "__main__":
    # Small but structurally faithful configuration.
    cfg = dict(img_size=16, patch_size=4, in_chans=4, embed_dim=32,
               depth=2, num_heads=4, mlp_ratio=4.0, out_chans=16)

    key = jax.random.PRNGKey(0)
    kparams, kx = jax.random.split(key)
    params = init_params(kparams, cfg)

    x = jax.random.normal(
        kx, (2, cfg["in_chans"], cfg["img_size"], cfg["img_size"]), jnp.float32)

    fwd = jax.jit(lambda p, xx: image_encoder_forward(p, xx, cfg))
    out = fwd(params, x)
    y = jax.block_until_ready(out[0])

    assert y.shape == (2, cfg["out_chans"],
                       cfg["img_size"] // cfg["patch_size"],
                       cfg["img_size"] // cfg["patch_size"]), y.shape
    assert jnp.all(jnp.isfinite(y))
    print("KERNEL_OK")
</pallas_src>

<mosaic_0001>
module attributes {stable_mosaic.version = 11 : i64} {
  func.func @_fused_matmul_kernel(%arg0: i32, %arg1: i32, %arg2: i32, %arg3: memref<32x64xf32, #tpu.memory_space<vmem>>, %arg4: memref<64x32xbf16, #tpu.memory_space<vmem>>, %arg5: memref<1x32xf32, #tpu.memory_space<vmem>>, %arg6: memref<32x32xf32, #tpu.memory_space<vmem>>, %arg7: memref<32x32xf32, #tpu.memory_space<vmem>>) attributes {dimension_semantics = [#tpu.dimension_semantics<parallel>, #tpu.dimension_semantics<parallel>, #tpu.dimension_semantics<arbitrary>], iteration_bounds = array<i64: 1, 1, 1>, scalar_prefetch = 0 : i64, scratch_operands = 1 : i64, tpu.core_type = #tpu.core_type<tc>, window_params = [{transform_indices = @transform_0, window_bounds = array<i64: 32, 64>}, {transform_indices = @transform_1, window_bounds = array<i64: 64, 32>}, {transform_indices = @transform_2, window_bounds = array<i64: 1, 32>}, {transform_indices = @transform_3, window_bounds = array<i64: 32, 32>}]} {
    %c0_i32 = arith.constant 0 : i32
    %0 = arith.cmpi eq, %arg2, %c0_i32 : i32
    %1 = arith.extui %0 : i1 to i32
    %c0_i32_0 = arith.constant 0 : i32
    %2 = arith.cmpi ne, %1, %c0_i32_0 : i32
    scf.if %2 {
      %cst_10 = arith.constant 0.000000e+00 : f32
      %13 = vector.broadcast %cst_10 : f32 to vector<32x32xf32>
      %c0_11 = arith.constant 0 : index
      %c0_12 = arith.constant 0 : index
      %14 = vector.load %arg7[%c0_11, %c0_12] : memref<32x32xf32, #tpu.memory_space<vmem>>, vector<32x32xf32>
      tpu.vector_store %arg7[%c0_11, %c0_12], %13 {strides = array<i32>} : memref<32x32xf32, #tpu.memory_space<vmem>>, vector<32x32xf32>,
    } else {
    }
    %c0 = arith.constant 0 : index
    %c0_1 = arith.constant 0 : index
    %3 = vector.load %arg3[%c0, %c0_1] : memref<32x64xf32, #tpu.memory_space<vmem>>, vector<32x64xf32>
    %4 = arith.truncf %3 : vector<32x64xf32> to vector<32x64xbf16>
    %c0_2 = arith.constant 0 : index
    %c0_3 = arith.constant 0 : index
    %5 = vector.load %arg7[%c0_2, %c0_3] : memref<32x32xf32, #tpu.memory_space<vmem>>, vector<32x32xf32>
    %c0_4 = arith.constant 0 : index
    %c0_5 = arith.constant 0 : index
    %6 = vector.load %arg4[%c0_4, %c0_5] : memref<64x32xbf16, #tpu.memory_space<vmem>>, vector<64x32xbf16>
    %cst = arith.constant dense<0.000000e+00> : vector<32x32xf32>
    %7 = tpu.matmul %4, %6, %cst {dimension_numbers = #tpu.dot_dimension_numbers<[1], [0], [0], [1], [0, 0, 1, 1], [], []>} : vector<32x64xbf16>, vector<64x32xbf16>, vector<32x32xf32> -> vector<32x32xf32>
    %8 = arith.addf %5, %7 : vector<32x32xf32>
    %c0_6 = arith.constant 0 : index
    %c0_7 = arith.constant 0 : index
    %9 = vector.load %arg7[%c0_6, %c0_7] : memref<32x32xf32, #tpu.memory_space<vmem>>, vector<32x32xf32>
    tpu.vector_store %arg7[%c0_6, %c0_7], %8 {strides = array<i32>} : memref<32x32xf32, #tpu.memory_space<vmem>>, vector<32x32xf32>,
    %c0_i32_8 = arith.constant 0 : i32
    %10 = arith.cmpi eq, %arg2, %c0_i32_8 : i32
    %11 = arith.extui %10 : i1 to i32
    %c0_i32_9 = arith.constant 0 : i32
    %12 = arith.cmpi ne, %11, %c0_i32_9 : i32
    scf.if %12 {
      %c0_10 = arith.constant 0 : index
      %c0_11 = arith.constant 0 : index
      %13 = vector.load %arg7[%c0_10, %c0_11] : memref<32x32xf32, #tpu.memory_space<vmem>>, vector<32x32xf32>
      %c0_12 = arith.constant 0 : index
      %c0_13 = arith.constant 0 : index
      %14 = vector.load %arg5[%c0_12, %c0_13] : memref<1x32xf32, #tpu.memory_space<vmem>>, vector<1x32xf32>
      %15 = vector.broadcast %14 : vector<1x32xf32> to vector<32x32xf32>
      %16 = arith.addf %13, %15 : vector<32x32xf32>
      %c0_14 = arith.constant 0 : index
      %c0_15 = arith.constant 0 : index
      %17 = vector.load %arg6[%c0_14, %c0_15] : memref<32x32xf32, #tpu.memory_space<vmem>>, vector<32x32xf32>
      tpu.vector_store %arg6[%c0_14, %c0_15], %16 {strides = array<i32>} : memref<32x32xf32, #tpu.memory_space<vmem>>, vector<32x32xf32>,
    } else {
    }
    return
  }
  func.func @transform_0(%arg0: i32, %arg1: i32, %arg2: i32) -> (i32, i32) {
    %c0_i32 = arith.constant 0 : i32
    return %arg0, %arg2 : i32, i32
  }
  func.func @transform_1(%arg0: i32, %arg1: i32, %arg2: i32) -> (i32, i32) {
    %c0_i32 = arith.constant 0 : i32
    return %arg2, %arg1 : i32, i32
  }
  func.func @transform_2(%arg0: i32, %arg1: i32, %arg2: i32) -> (i32, i32) {
    %c0_i32 = arith.constant 0 : i32
    %c0_i32_0 = arith.constant 0 : i32
    return %c0_i32, %arg1 : i32, i32
  }
  func.func @transform_3(%arg0: i32, %arg1: i32, %arg2: i32) -> (i32, i32) {
    %c0_i32 = arith.constant 0 : i32
    return %arg0, %arg1 : i32, i32
  }
}

module attributes {stable_mosaic.version = 11 : i64} {
  func.func @_fused_matmul_kernel(%arg0: i32, %arg1: i32, %arg2: i32, %arg3: memref<32x32xf32, #tpu.memory_space<vmem>>, %arg4: memref<32x32xbf16, #tpu.memory_space<vmem>>, %arg5: memref<1x32xf32, #tpu.memory_space<vmem>>, %arg6: memref<1x32xf32, #tpu.memory_space<vmem>>, %arg7: memref<1x32xf32, #tpu.memory_space<vmem>>, %arg8: memref<32x32xbf16, #tpu.memory_space<vmem>>, %arg9: memref<32x32xf32, #tpu.memory_space<vmem>>) attributes {dimension_semantics = [#tpu.dimension_semantics<parallel>, #tpu.dimension_semantics<parallel>, #tpu.dimension_semantics<arbitrary>], iteration_bounds = array<i64: 1, 1, 1>, scalar_prefetch = 0 : i64, scratch_operands = 1 : i64, tpu.core_type = #tpu.core_type<tc>, window_params = [{transform_indices = @transform_0, window_bounds = array<i64: 32, 32>}, {transform_indices = @transform_1, window_bounds = array<i64: 32, 32>}, {transform_indices = @transform_2, window_bounds = array<i64: 1, 32>}, {transform_indices = @transform_3, window_bounds = array<i64: 1, 32>}, {transform_indices = @transform_4, window_bounds = array<i64: 1, 32>}, {transform_indices = @transform_5, window_bounds = array<i64: 32, 32>}]} {
    %c0_i32 = arith.constant 0 : i32
    %0 = arith.cmpi eq, %arg2, %c0_i32 : i32
    %1 = arith.extui %0 : i1 to i32
    %c0_i32_0 = arith.constant 0 : i32
    %2 = arith.cmpi ne, %1, %c0_i32_0 : i32
    scf.if %2 {
      %cst_19 = arith.constant 0.000000e+00 : f32
      %37 = vector.broadcast %cst_19 : f32 to vector<32x32xf32>
      %c0_20 = arith.constant 0 : index
      %c0_21 = arith.constant 0 : index
      %38 = vector.load %arg9[%c0_20, %c0_21] : memref<32x32xf32, #tpu.memory_space<vmem>>, vector<32x32xf32>
      tpu.vector_store %arg9[%c0_20, %c0_21], %37 {strides = array<i32>} : memref<32x32xf32, #tpu.memory_space<vmem>>, vector<32x32xf32>,
    } else {
    }
    %c0 = arith.constant 0 : index
    %c0_1 = arith.constant 0 : index
    %3 = vector.load %arg3[%c0, %c0_1] : memref<32x32xf32, #tpu.memory_space<vmem>>, vector<32x32xf32>
    %cst = arith.constant dense<0.000000e+00> : vector<32xf32>
    %4 = vector.multi_reduction <add>, %3, %cst [1] : vector<32x32xf32> to vector<32xf32>
    %5 = vector.shape_cast %4 : vector<32xf32> to vector<32x1xf32>
    %cst_2 = arith.constant 3.200000e+01 : f32
    %6 = vector.broadcast %cst_2 : f32 to vector<32x1xf32>
    %7 = arith.divf %5, %6 : vector<32x1xf32>
    %8 = vector.broadcast %7 : vector<32x1xf32> to vector<32x32xf32>
    %9 = arith.subf %3, %8 : vector<32x32xf32>
    %10 = arith.mulf %9, %9 : vector<32x32xf32>
    %cst_3 = arith.constant dense<0.000000e+00> : vector<32xf32>
    %11 = vector.multi_reduction <add>, %10, %cst_3 [1] : vector<32x32xf32> to vector<32xf32>
    %12 = vector.shape_cast %11 : vector<32xf32> to vector<32x1xf32>
    %cst_4 = arith.constant 3.200000e+01 : f32
    %13 = vector.broadcast %cst_4 : f32 to vector<32x1xf32>
    %14 = arith.divf %12, %13 : vector<32x1xf32>
    %15 = vector.broadcast %7 : vector<32x1xf32> to vector<32x32xf32>
    %16 = arith.subf %3, %15 : vector<32x32xf32>
    %cst_5 = arith.constant 9.99999974E-6 : f32
    %17 = vector.broadcast %cst_5 : f32 to vector<32x1xf32>
    %18 = arith.addf %14, %17 : vector<32x1xf32>
    %19 = math.rsqrt %18 : vector<32x1xf32>
    %20 = vector.broadcast %19 : vector<32x1xf32> to vector<32x32xf32>
    %21 = arith.mulf %16, %20 : vector<32x32xf32>
    %c0_6 = arith.constant 0 : index
    %c0_7 = arith.constant 0 : index
    %22 = vector.load %arg5[%c0_6, %c0_7] : memref<1x32xf32, #tpu.memory_space<vmem>>, vector<1x32xf32>
    %23 = vector.broadcast %22 : vector<1x32xf32> to vector<32x32xf32>
    %24 = arith.mulf %21, %23 : vector<32x32xf32>
    %c0_8 = arith.constant 0 : index
    %c0_9 = arith.constant 0 : index
    %25 = vector.load %arg6[%c0_8, %c0_9] : memref<1x32xf32, #tpu.memory_space<vmem>>, vector<1x32xf32>
    %26 = vector.broadcast %25 : vector<1x32xf32> to vector<32x32xf32>
    %27 = arith.addf %24, %26 : vector<32x32xf32>
    %28 = arith.truncf %27 : vector<32x32xf32> to vector<32x32xbf16>
    %c0_10 = arith.constant 0 : index
    %c0_11 = arith.constant 0 : index
    %29 = vector.load %arg9[%c0_10, %c0_11] : memref<32x32xf32, #tpu.memory_space<vmem>>, vector<32x32xf32>
    %c0_12 = arith.constant 0 : index
    %c0_13 = arith.constant 0 : index
    %30 = vector.load %arg4[%c0_12, %c0_13] : memref<32x32xbf16, #tpu.memory_space<vmem>>, vector<32x32xbf16>
    %cst_14 = arith.constant dense<0.000000e+00> : vector<32x32xf32>
    %31 = tpu.matmul %28, %30, %cst_14 {dimension_numbers = #tpu.dot_dimension_numbers<[1], [0], [0], [1], [0, 0, 1, 1], [], []>} : vector<32x32xbf16>, vector<32x32xbf16>, vector<32x32xf32> -> vector<32x32xf32>
    %32 = arith.addf %29, %31 : vector<32x32xf32>
    %c0_15 = arith.constant 0 : index
    %c0_16 = arith.constant 0 : index
    %33 = vector.load %arg9[%c0_15, %c0_16] : memref<32x32xf32, #tpu.memory_space<vmem>>, vector<32x32xf32>
    tpu.vector_store %arg9[%c0_15, %c0_16], %32 {strides = array<i32>} : memref<32x32xf32, #tpu.memory_space<vmem>>, vector<32x32xf32>,
    %c0_i32_17 = arith.constant 0 : i32
    %34 = arith.cmpi eq, %arg2, %c0_i32_17 : i32
    %35 = arith.extui %34 : i1 to i32
    %c0_i32_18 = arith.constant 0 : i32
    %36 = arith.cmpi ne, %35, %c0_i32_18 : i32
    scf.if %36 {
      %c0_19 = arith.constant 0 : index
      %c0_20 = arith.constant 0 : index
      %37 = vector.load %arg9[%c0_19, %c0_20] : memref<32x32xf32, #tpu.memory_space<vmem>>, vector<32x32xf32>
      %c0_21 = arith.constant 0 : index
      %c0_22 = arith.constant 0 : index
      %38 = vector.load %arg7[%c0_21, %c0_22] : memref<1x32xf32, #tpu.memory_space<vmem>>, vector<1x32xf32>
      %39 = vector.broadcast %38 : vector<1x32xf32> to vector<32x32xf32>
      %40 = arith.addf %37, %39 : vector<32x32xf32>
      %41 = arith.truncf %40 : vector<32x32xf32> to vector<32x32xbf16>
      %c0_23 = arith.constant 0 : index
      %c0_24 = arith.constant 0 : index
      %42 = vector.load %arg8[%c0_23, %c0_24] : memref<32x32xbf16, #tpu.memory_space<vmem>>, vector<32x32xbf16>
      tpu.vector_store %arg8[%c0_23, %c0_24], %41 {strides = array<i32>} : memref<32x32xbf16, #tpu.memory_space<vmem>>, vector<32x32xbf16>,
    } else {
    }
    return
  }
  func.func @transform_0(%arg0: i32, %arg1: i32, %arg2: i32) -> (i32, i32) {
    %c0_i32 = arith.constant 0 : i32
    return %arg0, %arg2 : i32, i32
  }
  func.func @transform_1(%arg0: i32, %arg1: i32, %arg2: i32) -> (i32, i32) {
    %c0_i32 = arith.constant 0 : i32
    return %arg2, %arg1 : i32, i32
  }
  func.func @transform_2(%arg0: i32, %arg1: i32, %arg2: i32) -> (i32, i32) {
    %c0_i32 = arith.constant 0 : i32
    %c0_i32_0 = arith.constant 0 : i32
    return %c0_i32, %arg2 : i32, i32
  }
  func.func @transform_3(%arg0: i32, %arg1: i32, %arg2: i32) -> (i32, i32) {
    %c0_i32 = arith.constant 0 : i32
    %c0_i32_0 = arith.constant 0 : i32
    return %c0_i32, %arg2 : i32, i32
  }
  func.func @transform_4(%arg0: i32, %arg1: i32, %arg2: i32) -> (i32, i32) {
    %c0_i32 = arith.constant 0 : i32
    %c0_i32_0 = arith.constant 0 : i32
    return %c0_i32, %arg1 : i32, i32
  }
  func.func @transform_5(%arg0: i32, %arg1: i32, %arg2: i32) -> (i32, i32) {
    %c0_i32 = arith.constant 0 : i32
    return %arg0, %arg1 : i32, i32
  }
}

module attributes {stable_mosaic.version = 11 : i64} {
  func.func @_flash_attn_kernel(%arg0: i32, %arg1: i32, %arg2: i32, %arg3: memref<1x16x32xbf16, #tpu.memory_space<vmem>>, %arg4: memref<1x16x32xbf16, #tpu.memory_space<vmem>>, %arg5: memref<1x16x32xbf16, #tpu.memory_space<vmem>>, %arg6: memref<1x16x32xbf16, #tpu.memory_space<vmem>>, %arg7: memref<4x16x1xf32, #tpu.memory_space<vmem>>, %arg8: memref<4x16x1xf32, #tpu.memory_space<vmem>>, %arg9: memref<16x32xf32, #tpu.memory_space<vmem>>) attributes {dimension_semantics = [#tpu.dimension_semantics<parallel>, #tpu.dimension_semantics<parallel>, #tpu.dimension_semantics<arbitrary>], iteration_bounds = array<i64: 2, 1, 1>, scalar_prefetch = 0 : i64, scratch_operands = 3 : i64, tpu.core_type = #tpu.core_type<tc>, window_params = [{transform_indices = @transform_0, window_bounds = array<i64: 1, 16, 32>}, {transform_indices = @transform_1, window_bounds = array<i64: 1, 16, 32>}, {transform_indices = @transform_2, window_bounds = array<i64: 1, 16, 32>}, {transform_indices = @transform_3, window_bounds = array<i64: 1, 16, 32>}]} {
    %c0_i32 = arith.constant 0 : i32
    %0 = arith.cmpi eq, %arg2, %c0_i32 : i32
    %1 = arith.extui %0 : i1 to i32
    %c0_i32_0 = arith.constant 0 : i32
    %2 = arith.cmpi ne, %1, %c0_i32_0 : i32
    scf.if %2 {
      %cst_115 = arith.constant 0xFF800000 : f32
      %158 = vector.broadcast %cst_115 : f32 to vector<4x16x1xf32>
      %c0_116 = arith.constant 0 : index
      %c0_117 = arith.constant 0 : index
      %c0_118 = arith.constant 0 : index
      %159 = vector.load %arg7[%c0_116, %c0_117, %c0_118] : memref<4x16x1xf32, #tpu.memory_space<vmem>>, vector<4x16x1xf32>
      tpu.vector_store %arg7[%c0_116, %c0_117, %c0_118], %158 {strides = array<i32>} : memref<4x16x1xf32, #tpu.memory_space<vmem>>, vector<4x16x1xf32>,
      %cst_119 = arith.constant 0.000000e+00 : f32
      %160 = vector.broadcast %cst_119 : f32 to vector<4x16x1xf32>
      %c0_120 = arith.constant 0 : index
      %c0_121 = arith.constant 0 : index
      %c0_122 = arith.constant 0 : index
      %161 = vector.load %arg8[%c0_120, %c0_121, %c0_122] : memref<4x16x1xf32, #tpu.memory_space<vmem>>, vector<4x16x1xf32>
      tpu.vector_store %arg8[%c0_120, %c0_121, %c0_122], %160 {strides = array<i32>} : memref<4x16x1xf32, #tpu.memory_space<vmem>>, vector<4x16x1xf32>,
      %cst_123 = arith.constant 0.000000e+00 : f32
      %162 = vector.broadcast %cst_123 : f32 to vector<16x32xf32>
      %c0_124 = arith.constant 0 : index
      %c0_125 = arith.constant 0 : index
      %163 = vector.load %arg9[%c0_124, %c0_125] : memref<16x32xf32, #tpu.memory_space<vmem>>, vector<16x32xf32>
      tpu.vector_store %arg9[%c0_124, %c0_125], %162 {strides = array<i32>} : memref<16x32xf32, #tpu.memory_space<vmem>>, vector<16x32xf32>,
    } else {
    }
    %c0 = arith.constant 0 : index
    %c0_1 = arith.constant 0 : index
    %c0_2 = arith.constant 0 : index
    %3 = vector.load %arg3[%c0, %c0_1, %c0_2] : memref<1x16x32xbf16, #tpu.memory_space<vmem>>, vector<1x16x8xbf16>
    %4 = vector.shape_cast %3 : vector<1x16x8xbf16> to vector<16x8xbf16>
    %c0_3 = arith.constant 0 : index
    %c0_4 = arith.constant 0 : index
    %c0_5 = arith.constant 0 : index
    %5 = vector.load %arg4[%c0_3, %c0_4, %c0_5] : memref<1x16x32xbf16, #tpu.memory_space<vmem>>, vector<1x16x8xbf16>
    %6 = vector.shape_cast %5 : vector<1x16x8xbf16> to vector<16x8xbf16>
    %c0_6 = arith.constant 0 : index
    %c0_7 = arith.constant 0 : index
    %c0_8 = arith.constant 0 : index
    %7 = vector.load %arg5[%c0_6, %c0_7, %c0_8] : memref<1x16x32xbf16, #tpu.memory_space<vmem>>, vector<1x16x8xbf16>
    %8 = vector.shape_cast %7 : vector<1x16x8xbf16> to vector<16x8xbf16>
    %cst = arith.constant dense<0.000000e+00> : vector<16x16xf32>
    %9 = tpu.matmul %4, %6, %cst {dimension_numbers = #tpu.dot_dimension_numbers<[1], [1], [0], [0], [0, 0, 1, 0], [], []>} : vector<16x8xbf16>, vector<16x8xbf16>, vector<16x16xf32> -> vector<16x16xf32>
    %cst_9 = arith.constant 0.353553385 : f32
    %10 = vector.broadcast %cst_9 : f32 to vector<16x16xf32>
    %11 = arith.mulf %9, %10 : vector<16x16xf32>
    %c0_10 = arith.constant 0 : index
    %c0_11 = arith.constant 0 : index
    %c0_12 = arith.constant 0 : index
    %12 = vector.load %arg7[%c0_10, %c0_11, %c0_12] : memref<4x16x1xf32, #tpu.memory_space<vmem>>, vector<1x16x1xf32>
    %13 = vector.shape_cast %12 : vector<1x16x1xf32> to vector<16x1xf32>
    %cst_13 = arith.constant dense<0xFF800000> : vector<16xf32>
    %14 = vector.multi_reduction <maximumf>, %11, %cst_13 [1] : vector<16x16xf32> to vector<16xf32>
    %15 = vector.shape_cast %14 : vector<16xf32> to vector<16x1xf32>
    %16 = arith.maximumf %13, %15 : vector<16x1xf32>
    %17 = arith.subf %13, %16 : vector<16x1xf32>
    %18 = math.exp %17 : vector<16x1xf32>
    %19 = vector.broadcast %16 : vector<16x1xf32> to vector<16x16xf32>
    %20 = arith.subf %11, %19 : vector<16x16xf32>
    %21 = math.exp %20 : vector<16x16xf32>
    %c0_14 = arith.constant 0 : index
    %c0_15 = arith.constant 0 : index
    %c0_16 = arith.constant 0 : index
    %22 = vector.load %arg8[%c0_14, %c0_15, %c0_16] : memref<4x16x1xf32, #tpu.memory_space<vmem>>, vector<1x16x1xf32>
    %23 = vector.shape_cast %22 : vector<1x16x1xf32> to vector<16x1xf32>
    %24 = arith.mulf %18, %23 : vector<16x1xf32>
    %cst_17 = arith.constant dense<0.000000e+00> : vector<16xf32>
    %25 = vector.multi_reduction <add>, %21, %cst_17 [1] : vector<16x16xf32> to vector<16xf32>
    %26 = vector.shape_cast %25 : vector<16xf32> to vector<16x1xf32>
    %27 = arith.addf %24, %26 : vector<16x1xf32>
    %c0_18 = arith.constant 0 : index
    %c0_19 = arith.constant 0 : index
    %c0_20 = arith.constant 0 : index
    %28 = vector.load %arg8[%c0_18, %c0_19, %c0_20] : memref<4x16x1xf32, #tpu.memory_space<vmem>>, vector<1x16x1xf32>
    %29 = vector.shape_cast %28 : vector<1x16x1xf32> to vector<16x1xf32>
    %30 = vector.shape_cast %27 : vector<16x1xf32> to vector<1x16x1xf32>
    tpu.vector_store %arg8[%c0_18, %c0_19, %c0_20], %30 {strides = array<i32>} : memref<4x16x1xf32, #tpu.memory_space<vmem>>, vector<1x16x1xf32>,
    %31 = arith.truncf %21 : vector<16x16xf32> to vector<16x16xbf16>
    %cst_21 = arith.constant dense<0.000000e+00> : vector<16x8xf32>
    %32 = tpu.matmul %31, %8, %cst_21 {dimension_numbers = #tpu.dot_dimension_numbers<[1], [0], [0], [1], [0, 0, 1, 1], [], []>} : vector<16x16xbf16>, vector<16x8xbf16>, vector<16x8xf32> -> vector<16x8xf32>
    %c0_22 = arith.constant 0 : index
    %c0_23 = arith.constant 0 : index
    %33 = vector.load %arg9[%c0_22, %c0_23] : memref<16x32xf32, #tpu.memory_space<vmem>>, vector<16x8xf32>
    %34 = vector.broadcast %18 : vector<16x1xf32> to vector<16x8xf32>
    %35 = arith.mulf %34, %33 : vector<16x8xf32>
    %36 = arith.addf %35, %32 : vector<16x8xf32>
    %c0_24 = arith.constant 0 : index
    %c0_25 = arith.constant 0 : index
    %37 = vector.load %arg9[%c0_24, %c0_25] : memref<16x32xf32, #tpu.memory_space<vmem>>, vector<16x8xf32>
    tpu.vector_store %arg9[%c0_24, %c0_25], %36 {strides = array<i32>} : memref<16x32xf32, #tpu.memory_space<vmem>>, vector<16x8xf32>,
    %c0_26 = arith.constant 0 : index
    %c0_27 = arith.constant 0 : index
    %c0_28 = arith.constant 0 : index
    %38 = vector.load %arg7[%c0_26, %c0_27, %c0_28] : memref<4x16x1xf32, #tpu.memory_space<vmem>>, vector<1x16x1xf32>
    %39 = vector.shape_cast %38 : vector<1x16x1xf32> to vector<16x1xf32>
    %40 = vector.shape_cast %16 : vector<16x1xf32> to vector<1x16x1xf32>
    tpu.vector_store %arg7[%c0_26, %c0_27, %c0_28], %40 {strides = array<i32>} : memref<4x16x1xf32, #tpu.memory_space<vmem>>, vector<1x16x1xf32>,
    %c0_29 = arith.constant 0 : index
    %c0_30 = arith.constant 0 : index
    %c8 = arith.constant 8 : index
    %41 = vector.load %arg3[%c0_29, %c0_30, %c8] : memref<1x16x32xbf16, #tpu.memory_space<vmem>>, vector<1x16x8xbf16>
    %42 = vector.shape_cast %41 : vector<1x16x8xbf16> to vector<16x8xbf16>
    %c0_31 = arith.constant 0 : index
    %c0_32 = arith.constant 0 : index
    %c8_33 = arith.constant 8 : index
    %43 = vector.load %arg4[%c0_31, %c0_32, %c8_33] : memref<1x16x32xbf16, #tpu.memory_space<vmem>>, vector<1x16x8xbf16>
    %44 = vector.shape_cast %43 : vector<1x16x8xbf16> to vector<16x8xbf16>
    %c0_34 = arith.constant 0 : index
    %c0_35 = arith.constant 0 : index
    %c8_36 = arith.constant 8 : index
    %45 = vector.load %arg5[%c0_34, %c0_35, %c8_36] : memref<1x16x32xbf16, #tpu.memory_space<vmem>>, vector<1x16x8xbf16>
    %46 = vector.shape_cast %45 : vector<1x16x8xbf16> to vector<16x8xbf16>
    %cst_37 = arith.constant dense<0.000000e+00> : vector<16x16xf32>
    %47 = tpu.matmul %42, %44, %cst_37 {dimension_numbers = #tpu.dot_dimension_numbers<[1], [1], [0], [0], [0, 0, 1, 0], [], []>} : vector<16x8xbf16>, vector<16x8xbf16>, vector<16x16xf32> -> vector<16x16xf32>
    %cst_38 = arith.constant 0.353553385 : f32
    %48 = vector.broadcast %cst_38 : f32 to vector<16x16xf32>
    %49 = arith.mulf %47, %48 : vector<16x16xf32>
    %c1 = arith.constant 1 : index
    %c0_39 = arith.constant 0 : index
    %c0_40 = arith.constant 0 : index
    %50 = vector.load %arg7[%c1, %c0_39, %c0_40] : memref<4x16x1xf32, #tpu.memory_space<vmem>>, vector<1x16x1xf32>
    %51 = vector.shape_cast %50 : vector<1x16x1xf32> to vector<16x1xf32>
    %cst_41 = arith.constant dense<0xFF800000> : vector<16xf32>
    %52 = vector.multi_reduction <maximumf>, %49, %cst_41 [1] : vector<16x16xf32> to vector<16xf32>
    %53 = vector.shape_cast %52 : vector<16xf32> to vector<16x1xf32>
    %54 = arith.maximumf %51, %53 : vector<16x1xf32>
    %55 = arith.subf %51, %54 : vector<16x1xf32>
    %56 = math.exp %55 : vector<16x1xf32>
    %57 = vector.broadcast %54 : vector<16x1xf32> to vector<16x16xf32>
    %58 = arith.subf %49, %57 : vector<16x16xf32>
    %59 = math.exp %58 : vector<16x16xf32>
    %c1_42 = arith.constant 1 : index
    %c0_43 = arith.constant 0 : index
    %c0_44 = arith.constant 0 : index
    %60 = vector.load %arg8[%c1_42, %c0_43, %c0_44] : memref<4x16x1xf32, #tpu.memory_space<vmem>>, vector<1x16x1xf32>
    %61 = vector.shape_cast %60 : vector<1x16x1xf32> to vector<16x1xf32>
    %62 = arith.mulf %56, %61 : vector<16x1xf32>
    %cst_45 = arith.constant dense<0.000000e+00> : vector<16xf32>
    %63 = vector.multi_reduction <add>, %59, %cst_45 [1] : vector<16x16xf32> to vector<16xf32>
    %64 = vector.shape_cast %63 : vector<16xf32> to vector<16x1xf32>
    %65 = arith.addf %62, %64 : vector<16x1xf32>
    %c1_46 = arith.constant 1 : index
    %c0_47 = arith.constant 0 : index
    %c0_48 = arith.constant 0 : index
    %66 = vector.load %arg8[%c1_46, %c0_47, %c0_48] : memref<4x16x1xf32, #tpu.memory_space<vmem>>, vector<1x16x1xf32>
    %67 = vector.shape_cast %66 : vector<1x16x1xf32> to vector<16x1xf32>
    %68 = vector.shape_cast %65 : vector<16x1xf32> to vector<1x16x1xf32>
    tpu.vector_store %arg8[%c1_46, %c0_47, %c0_48], %68 {strides = array<i32>} : memref<4x16x1xf32, #tpu.memory_space<vmem>>, vector<1x16x1xf32>,
    %69 = arith.truncf %59 : vector<16x16xf32> to vector<16x16xbf16>
    %cst_49 = arith.constant dense<0.000000e+00> : vector<16x8xf32>
    %70 = tpu.matmul %69, %46, %cst_49 {dimension_numbers = #tpu.dot_dimension_numbers<[1], [0], [0], [1], [0, 0, 1, 1], [], []>} : vector<16x16xbf16>, vector<16x8xbf16>, vector<16x8xf32> -> vector<16x8xf32>
    %c0_50 = arith.constant 0 : index
    %c8_51 = arith.constant 8 : index
    %71 = vector.load %arg9[%c0_50, %c8_51] : memref<16x32xf32, #tpu.memory_space<vmem>>, vector<16x8xf32>
    %72 = vector.broadcast %56 : vector<16x1xf32> to vector<16x8xf32>
    %73 = arith.mulf %72, %71 : vector<16x8xf32>
    %74 = arith.addf %73, %70 : vector<16x8xf32>
    %c0_52 = arith.constant 0 : index
    %c8_53 = arith.constant 8 : index
    %75 = vector.load %arg9[%c0_52, %c8_53] : memref<16x32xf32, #tpu.memory_space<vmem>>, vector<16x8xf32>
    tpu.vector_store %arg9[%c0_52, %c8_53], %74 {strides = array<i32>} : memref<16x32xf32, #tpu.memory_space<vmem>>, vector<16x8xf32>,
    %c1_54 = arith.constant 1 : index
    %c0_55 = arith.constant 0 : index
    %c0_56 = arith.constant 0 : index
    %76 = vector.load %arg7[%c1_54, %c0_55, %c0_56] : memref<4x16x1xf32, #tpu.memory_space<vmem>>, vector<1x16x1xf32>
    %77 = vector.shape_cast %76 : vector<1x16x1xf32> to vector<16x1xf32>
    %78 = vector.shape_cast %54 : vector<16x1xf32> to vector<1x16x1xf32>
    tpu.vector_store %arg7[%c1_54, %c0_55, %c0_56], %78 {strides = array<i32>} : memref<4x16x1xf32, #tpu.memory_space<vmem>>, vector<1x16x1xf32>,
    %c0_57 = arith.constant 0 : index
    %c0_58 = arith.constant 0 : index
    %c16 = arith.constant 16 : index
    %79 = vector.load %arg3[%c0_57, %c0_58, %c16] : memref<1x16x32xbf16, #tpu.memory_space<vmem>>, vector<1x16x8xbf16>
    %80 = vector.shape_cast %79 : vector<1x16x8xbf16> to vector<16x8xbf16>
    %c0_59 = arith.constant 0 : index
    %c0_60 = arith.constant 0 : index
    %c16_61 = arith.constant 16 : index
    %81 = vector.load %arg4[%c0_59, %c0_60, %c16_61] : memref<1x16x32xbf16, #tpu.memory_space<vmem>>, vector<1x16x8xbf16>
    %82 = vector.shape_cast %81 : vector<1x16x8xbf16> to vector<16x8xbf16>
    %c0_62 = arith.constant 0 : index
    %c0_63 = arith.constant 0 : index
    %c16_64 = arith.constant 16 : index
    %83 = vector.load %arg5[%c0_62, %c0_63, %c16_64] : memref<1x16x32xbf16, #tpu.memory_space<vmem>>, vector<1x16x8xbf16>
    %84 = vector.shape_cast %83 : vector<1x16x8xbf16> to vector<16x8xbf16>
    %cst_65 = arith.constant dense<0.000000e+00> : vector<16x16xf32>
    %85 = tpu.matmul %80, %82, %cst_65 {dimension_numbers = #tpu.dot_dimension_numbers<[1], [1], [0], [0], [0, 0, 1, 0], [], []>} : vector<16x8xbf16>, vector<16x8xbf16>, vector<16x16xf32> -> vector<16x16xf32>
    %cst_66 = arith.constant 0.353553385 : f32
    %86 = vector.broadcast %cst_66 : f32 to vector<16x16xf32>
    %87 = arith.mulf %85, %86 : vector<16x16xf32>
    %c2 = arith.constant 2 : index
    %c0_67 = arith.constant 0 : index
    %c0_68 = arith.constant 0 : index
    %88 = vector.load %arg7[%c2, %c0_67, %c0_68] : memref<4x16x1xf32, #tpu.memory_space<vmem>>, vector<1x16x1xf32>
    %89 = vector.shape_cast %88 : vector<1x16x1xf32> to vector<16x1xf32>
    %cst_69 = arith.constant dense<0xFF800000> : vector<16xf32>
    %90 = vector.multi_reduction <maximumf>, %87, %cst_69 [1] : vector<16x16xf32> to vector<16xf32>
    %91 = vector.shape_cast %90 : vector<16xf32> to vector<16x1xf32>
    %92 = arith.maximumf %89, %91 : vector<16x1xf32>
    %93 = arith.subf %89, %92 : vector<16x1xf32>
    %94 = math.exp %93 : vector<16x1xf32>
    %95 = vector.broadcast %92 : vector<16x1xf32> to vector<16x16xf32>
    %96 = arith.subf %87, %95 : vector<16x16xf32>
    %97 = math.exp %96 : vector<16x16xf32>
    %c2_70 = arith.constant 2 : index
    %c0_71 = arith.constant 0 : index
    %c0_72 = arith.constant 0 : index
    %98 = vector.load %arg8[%c2_70, %c0_71, %c0_72] : memref<4x16x1xf32, #tpu.memory_space<vmem>>, vector<1x16x1xf32>
    %99 = vector.shape_cast %98 : vector<1x16x1xf32> to vector<16x1xf32>
    %100 = arith.mulf %94, %99 : vector<16x1xf32>
    %cst_73 = arith.constant dense<0.000000e+00> : vector<16xf32>
    %101 = vector.multi_reduction <add>, %97, %cst_73 [1] : vector<16x16xf32> to vector<16xf32>
    %102 = vector.shape_cast %101 : vector<16xf32> to vector<16x1xf32>
    %103 = arith.addf %100, %102 : vector<16x1xf32>
    %c2_74 = arith.constant 2 : index
    %c0_75 = arith.constant 0 : index
    %c0_76 = arith.constant 0 : index
    %104 = vector.load %arg8[%c2_74, %c0_75, %c0_76] : memref<4x16x1xf32, #tpu.memory_space<vmem>>, vector<1x16x1xf32>
    %105 = vector.shape_cast %104 : vector<1x16x1xf32> to vector<16x1xf32>
    %106 = vector.shape_cast %103 : vector<16x1xf32> to vector<1x16x1xf32>
    tpu.vector_store %arg8[%c2_74, %c0_75, %c0_76], %106 {strides = array<i32>} : memref<4x16x1xf32, #tpu.memory_space<vmem>>, vector<1x16x1xf32>,
    %107 = arith.truncf %97 : vector<16x16xf32> to vector<16x16xbf16>
    %cst_77 = arith.constant dense<0.000000e+00> : vector<16x8xf32>
    %108 = tpu.matmul %107, %84, %cst_77 {dimension_numbers = #tpu.dot_dimension_numbers<[1], [0], [0], [1], [0, 0, 1, 1], [], []>} : vector<16x16xbf16>, vector<16x8xbf16>, vector<16x8xf32> -> vector<16x8xf32>
    %c0_78 = arith.constant 0 : index
    %c16_79 = arith.constant 16 : index
    %109 = vector.load %arg9[%c0_78, %c16_79] : memref<16x32xf32, #tpu.memory_space<vmem>>, vector<16x8xf32>
    %110 = vector.broadcast %94 : vector<16x1xf32> to vector<16x8xf32>
    %111 = arith.mulf %110, %109 : vector<16x8xf32>
    %112 = arith.addf %111, %108 : vector<16x8xf32>
    %c0_80 = arith.constant 0 : index
    %c16_81 = arith.constant 16 : index
    %113 = vector.load %arg9[%c0_80, %c16_81] : memref<16x32xf32, #tpu.memory_space<vmem>>, vector<16x8xf32>
    tpu.vector_store %arg9[%c0_80, %c16_81], %112 {strides = array<i32>} : memref<16x32xf32, #tpu.memory_space<vmem>>, vector<16x8xf32>,
    %c2_82 = arith.constant 2 : index
    %c0_83 = arith.constant 0 : index
    %c0_84 = arith.constant 0 : index
    %114 = vector.load %arg7[%c2_82, %c0_83, %c0_84] : memref<4x16x1xf32, #tpu.memory_space<vmem>>, vector<1x16x1xf32>
    %115 = vector.shape_cast %114 : vector<1x16x1xf32> to vector<16x1xf32>
    %116 = vector.shape_cast %92 : vector<16x1xf32> to vector<1x16x1xf32>
    tpu.vector_store %arg7[%c2_82, %c0_83, %c0_84], %116 {strides = array<i32>} : memref<4x16x1xf32, #tpu.memory_space<vmem>>, vector<1x16x1xf32>,
    %c0_85 = arith.constant 0 : index
    %c0_86 = arith.constant 0 : index
    %c24 = arith.constant 24 : index
    %117 = vector.load %arg3[%c0_85, %c0_86, %c24] : memref<1x16x32xbf16, #tpu.memory_space<vmem>>, vector<1x16x8xbf16>
    %118 = vector.shape_cast %117 : vector<1x16x8xbf16> to vector<16x8xbf16>
    %c0_87 = arith.constant 0 : index
    %c0_88 = arith.constant 0 : index
    %c24_89 = arith.constant 24 : index
    %119 = vector.load %arg4[%c0_87, %c0_88, %c24_89] : memref<1x16x32xbf16, #tpu.memory_space<vmem>>, vector<1x16x8xbf16>
    %120 = vector.shape_cast %119 : vector<1x16x8xbf16> to vector<16x8xbf16>
    %c0_90 = arith.constant 0 : index
    %c0_91 = arith.constant 0 : index
    %c24_92 = arith.constant 24 : index
    %121 = vector.load %arg5[%c0_90, %c0_91, %c24_92] : memref<1x16x32xbf16, #tpu.memory_space<vmem>>, vector<1x16x8xbf16>
    %122 = vector.shape_cast %121 : vector<1x16x8xbf16> to vector<16x8xbf16>
    %cst_93 = arith.constant dense<0.000000e+00> : vector<16x16xf32>
    %123 = tpu.matmul %118, %120, %cst_93 {dimension_numbers = #tpu.dot_dimension_numbers<[1], [1], [0], [0], [0, 0, 1, 0], [], []>} : vector<16x8xbf16>, vector<16x8xbf16>, vector<16x16xf32> -> vector<16x16xf32>
    %cst_94 = arith.constant 0.353553385 : f32
    %124 = vector.broadcast %cst_94 : f32 to vector<16x16xf32>
    %125 = arith.mulf %123, %124 : vector<16x16xf32>
    %c3 = arith.constant 3 : index
    %c0_95 = arith.constant 0 : index
    %c0_96 = arith.constant 0 : index
    %126 = vector.load %arg7[%c3, %c0_95, %c0_96] : memref<4x16x1xf32, #tpu.memory_space<vmem>>, vector<1x16x1xf32>
    %127 = vector.shape_cast %126 : vector<1x16x1xf32> to vector<16x1xf32>
    %cst_97 = arith.constant dense<0xFF800000> : vector<16xf32>
    %128 = vector.multi_reduction <maximumf>, %125, %cst_97 [1] : vector<16x16xf32> to vector<16xf32>
    %129 = vector.shape_cast %128 : vector<16xf32> to vector<16x1xf32>
    %130 = arith.maximumf %127, %129 : vector<16x1xf32>
    %131 = arith.subf %127, %130 : vector<16x1xf32>
    %132 = math.exp %131 : vector<16x1xf32>
    %133 = vector.broadcast %130 : vector<16x1xf32> to vector<16x16xf32>
    %134 = arith.subf %125, %133 : vector<16x16xf32>
    %135 = math.exp %134 : vector<16x16xf32>
    %c3_98 = arith.constant 3 : index
    %c0_99 = arith.constant 0 : index
    %c0_100 = arith.constant 0 : index
    %136 = vector.load %arg8[%c3_98, %c0_99, %c0_100] : memref<4x16x1xf32, #tpu.memory_space<vmem>>, vector<1x16x1xf32>
    %137 = vector.shape_cast %136 : vector<1x16x1xf32> to vector<16x1xf32>
    %138 = arith.mulf %132, %137 : vector<16x1xf32>
    %cst_101 = arith.constant dense<0.000000e+00> : vector<16xf32>
    %139 = vector.multi_reduction <add>, %135, %cst_101 [1] : vector<16x16xf32> to vector<16xf32>
    %140 = vector.shape_cast %139 : vector<16xf32> to vector<16x1xf32>
    %141 = arith.addf %138, %140 : vector<16x1xf32>
    %c3_102 = arith.constant 3 : index
    %c0_103 = arith.constant 0 : index
    %c0_104 = arith.constant 0 : index
    %142 = vector.load %arg8[%c3_102, %c0_103, %c0_104] : memref<4x16x1xf32, #tpu.memory_space<vmem>>, vector<1x16x1xf32>
    %143 = vector.shape_cast %142 : vector<1x16x1xf32> to vector<16x1xf32>
    %144 = vector.shape_cast %141 : vector<16x1xf32> to vector<1x16x1xf32>
    tpu.vector_store %arg8[%c3_102, %c0_103, %c0_104], %144 {strides = array<i32>} : memref<4x16x1xf32, #tpu.memory_space<vmem>>, vector<1x16x1xf32>,
    %145 = arith.truncf %135 : vector<16x16xf32> to vector<16x16xbf16>
    %cst_105 = arith.constant dense<0.000000e+00> : vector<16x8xf32>
    %146 = tpu.matmul %145, %122, %cst_105 {dimension_numbers = #tpu.dot_dimension_numbers<[1], [0], [0], [1], [0, 0, 1, 1], [], []>} : vector<16x16xbf16>, vector<16x8xbf16>, vector<16x8xf32> -> vector<16x8xf32>
    %c0_106 = arith.constant 0 : index
    %c24_107 = arith.constant 24 : index
    %147 = vector.load %arg9[%c0_106, %c24_107] : memref<16x32xf32, #tpu.memory_space<vmem>>, vector<16x8xf32>
    %148 = vector.broadcast %132 : vector<16x1xf32> to vector<16x8xf32>
    %149 = arith.mulf %148, %147 : vector<16x8xf32>
    %150 = arith.addf %149, %146 : vector<16x8xf32>
    %c0_108 = arith.constant 0 : index
    %c24_109 = arith.constant 24 : index
    %151 = vector.load %arg9[%c0_108, %c24_109] : memref<16x32xf32, #tpu.memory_space<vmem>>, vector<16x8xf32>
    tpu.vector_store %arg9[%c0_108, %c24_109], %150 {strides = array<i32>} : memref<16x32xf32, #tpu.memory_space<vmem>>, vector<16x8xf32>,
    %c3_110 = arith.constant 3 : index
    %c0_111 = arith.constant 0 : index
    %c0_112 = arith.constant 0 : index
    %152 = vector.load %arg7[%c3_110, %c0_111, %c0_112] : memref<4x16x1xf32, #tpu.memory_space<vmem>>, vector<1x16x1xf32>
    %153 = vector.shape_cast %152 : vector<1x16x1xf32> to vector<16x1xf32>
    %154 = vector.shape_cast %130 : vector<16x1xf32> to vector<1x16x1xf32>
    tpu.vector_store %arg7[%c3_110, %c0_111, %c0_112], %154 {strides = array<i32>} : memref<4x16x1xf32, #tpu.memory_space<vmem>>, vector<1x16x1xf32>,
    %c0_i32_113 = arith.constant 0 : i32
    %155 = arith.cmpi eq, %arg2, %c0_i32_113 : i32
    %156 = arith.extui %155 : i1 to i32
    %c0_i32_114 = arith.constant 0 : i32
    %157 = arith.cmpi ne, %156, %c0_i32_114 : i32
    scf.if %157 {
      %c0_115 = arith.constant 0 : index
      %c0_116 = arith.constant 0 : index
      %c0_117 = arith.constant 0 : index
      %158 = vector.load %arg8[%c0_115, %c0_116, %c0_117] : memref<4x16x1xf32, #tpu.memory_space<vmem>>, vector<1x16x1xf32>
      %159 = vector.shape_cast %158 : vector<1x16x1xf32> to vector<16x1xf32>
      %160 = tpu.reciprocal %159 {approx = true} : vector<16x1xf32> -> vector<16x1xf32>
      %c0_118 = arith.constant 0 : index
      %c0_119 = arith.constant 0 : index
      %161 = vector.load %arg9[%c0_118, %c0_119] : memref<16x32xf32, #tpu.memory_space<vmem>>, vector<16x8xf32>
      %162 = vector.broadcast %160 : vector<16x1xf32> to vector<16x8xf32>
      %163 = arith.mulf %161, %162 : vector<16x8xf32>
      %c1_120 = arith.constant 1 : index
      %c0_121 = arith.constant 0 : index
      %c0_122 = arith.constant 0 : index
      %164 = vector.load %arg8[%c1_120, %c0_121, %c0_122] : memref<4x16x1xf32, #tpu.memory_space<vmem>>, vector<1x16x1xf32>
      %165 = vector.shape_cast %164 : vector<1x16x1xf32> to vector<16x1xf32>
      %166 = tpu.reciprocal %165 {approx = true} : vector<16x1xf32> -> vector<16x1xf32>
      %c0_123 = arith.constant 0 : index
      %c8_124 = arith.constant 8 : index
      %167 = vector.load %arg9[%c0_123, %c8_124] : memref<16x32xf32, #tpu.memory_space<vmem>>, vector<16x8xf32>
      %168 = vector.broadcast %166 : vector<16x1xf32> to vector<16x8xf32>
      %169 = arith.mulf %167, %168 : vector<16x8xf32>
      %c2_125 = arith.constant 2 : index
      %c0_126 = arith.constant 0 : index
      %c0_127 = arith.constant 0 : index
      %170 = vector.load %arg8[%c2_125, %c0_126, %c0_127] : memref<4x16x1xf32, #tpu.memory_space<vmem>>, vector<1x16x1xf32>
      %171 = vector.shape_cast %170 : vector<1x16x1xf32> to vector<16x1xf32>
      %172 = tpu.reciprocal %171 {approx = true} : vector<16x1xf32> -> vector<16x1xf32>
      %c0_128 = arith.constant 0 : index
      %c16_129 = arith.constant 16 : index
      %173 = vector.load %arg9[%c0_128, %c16_129] : memref<16x32xf32, #tpu.memory_space<vmem>>, vector<16x8xf32>
      %174 = vector.broadcast %172 : vector<16x1xf32> to vector<16x8xf32>
      %175 = arith.mulf %173, %174 : vector<16x8xf32>
      %c3_130 = arith.constant 3 : index
      %c0_131 = arith.constant 0 : index
      %c0_132 = arith.constant 0 : index
      %176 = vector.load %arg8[%c3_130, %c0_131, %c0_132] : memref<4x16x1xf32, #tpu.memory_space<vmem>>, vector<1x16x1xf32>
      %177 = vector.shape_cast %176 : vector<1x16x1xf32> to vector<16x1xf32>
      %178 = tpu.reciprocal %177 {approx = true} : vector<16x1xf32> -> vector<16x1xf32>
      %c0_133 = arith.constant 0 : index
      %c24_134 = arith.constant 24 : index
      %179 = vector.load %arg9[%c0_133, %c24_134] : memref<16x32xf32, #tpu.memory_space<vmem>>, vector<16x8xf32>
      %180 = vector.broadcast %178 : vector<16x1xf32> to vector<16x8xf32>
      %181 = arith.mulf %179, %180 : vector<16x8xf32>
      %182 = tpu.concatenate %163, %169, %175, %181 in 1 : vector<16x8xf32>, vector<16x8xf32>, vector<16x8xf32>, vector<16x8xf32> -> vector<16x32xf32>
      %183 = arith.truncf %182 : vector<16x32xf32> to vector<16x32xbf16>
      %c0_135 = arith.constant 0 : index
      %c0_136 = arith.constant 0 : index
      %c0_137 = arith.constant 0 : index
      %184 = vector.load %arg6[%c0_135, %c0_136, %c0_137] : memref<1x16x32xbf16, #tpu.memory_space<vmem>>, vector<1x16x32xbf16>
      %185 = vector.shape_cast %184 : vector<1x16x32xbf16> to vector<16x32xbf16>
      %186 = vector.shape_cast %183 : vector<16x32xbf16> to vector<1x16x32xbf16>
      tpu.vector_store %arg6[%c0_135, %c0_136, %c0_137], %186 {strides = array<i32>} : memref<1x16x32xbf16, #tpu.memory_space<vmem>>, vector<1x16x32xbf16>,
    } else {
    }
    return
  }
  func.func @transform_0(%arg0: i32, %arg1: i32, %arg2: i32) -> (i32, i32, i32) {
    %c0_i32 = arith.constant 0 : i32
    %c0_i32_0 = arith.constant 0 : i32
    return %arg0, %arg1, %c0_i32 : i32, i32, i32
  }
  func.func @transform_1(%arg0: i32, %arg1: i32, %arg2: i32) -> (i32, i32, i32) {
    %c0_i32 = arith.constant 0 : i32
    %c0_i32_0 = arith.constant 0 : i32
    return %arg0, %arg2, %c0_i32 : i32, i32, i32
  }
  func.func @transform_2(%arg0: i32, %arg1: i32, %arg2: i32) -> (i32, i32, i32) {
    %c0_i32 = arith.constant 0 : i32
    %c0_i32_0 = arith.constant 0 : i32
    return %arg0, %arg2, %c0_i32 : i32, i32, i32
  }
  func.func @transform_3(%arg0: i32, %arg1: i32, %arg2: i32) -> (i32, i32, i32) {
    %c0_i32 = arith.constant 0 : i32
    %c0_i32_0 = arith.constant 0 : i32
    return %arg0, %arg1, %c0_i32 : i32, i32, i32
  }
}

module attributes {stable_mosaic.version = 11 : i64} {
  func.func @_fused_matmul_kernel(%arg0: i32, %arg1: i32, %arg2: i32, %arg3: memref<32x32xbf16, #tpu.memory_space<vmem>>, %arg4: memref<32x32xbf16, #tpu.memory_space<vmem>>, %arg5: memref<1x32xf32, #tpu.memory_space<vmem>>, %arg6: memref<32x32xf32, #tpu.memory_space<vmem>>, %arg7: memref<32x32xf32, #tpu.memory_space<vmem>>, %arg8: memref<32x32xf32, #tpu.memory_space<vmem>>) attributes {dimension_semantics = [#tpu.dimension_semantics<parallel>, #tpu.dimension_semantics<parallel>, #tpu.dimension_semantics<arbitrary>], iteration_bounds = array<i64: 1, 1, 1>, scalar_prefetch = 0 : i64, scratch_operands = 1 : i64, tpu.core_type = #tpu.core_type<tc>, window_params = [{transform_indices = @transform_0, window_bounds = array<i64: 32, 32>}, {transform_indices = @transform_1, window_bounds = array<i64: 32, 32>}, {transform_indices = @transform_2, window_bounds = array<i64: 1, 32>}, {transform_indices = @transform_3, window_bounds = array<i64: 32, 32>}, {transform_indices = @transform_4, window_bounds = array<i64: 32, 32>}]} {
    %c0_i32 = arith.constant 0 : i32
    %0 = arith.cmpi eq, %arg2, %c0_i32 : i32
    %1 = arith.extui %0 : i1 to i32
    %c0_i32_0 = arith.constant 0 : i32
    %2 = arith.cmpi ne, %1, %c0_i32_0 : i32
    scf.if %2 {
      %cst_10 = arith.constant 0.000000e+00 : f32
      %12 = vector.broadcast %cst_10 : f32 to vector<32x32xf32>
      %c0_11 = arith.constant 0 : index
      %c0_12 = arith.constant 0 : index
      %13 = vector.load %arg8[%c0_11, %c0_12] : memref<32x32xf32, #tpu.memory_space<vmem>>, vector<32x32xf32>
      tpu.vector_store %arg8[%c0_11, %c0_12], %12 {strides = array<i32>} : memref<32x32xf32, #tpu.memory_space<vmem>>, vector<32x32xf32>,
    } else {
    }
    %c0 = arith.constant 0 : index
    %c0_1 = arith.constant 0 : index
    %3 = vector.load %arg3[%c0, %c0_1] : memref<32x32xbf16, #tpu.memory_space<vmem>>, vector<32x32xbf16>
    %c0_2 = arith.constant 0 : index
    %c0_3 = arith.constant 0 : index
    %4 = vector.load %arg8[%c0_2, %c0_3] : memref<32x32xf32, #tpu.memory_space<vmem>>, vector<32x32xf32>
    %c0_4 = arith.constant 0 : index
    %c0_5 = arith.constant 0 : index
    %5 = vector.load %arg4[%c0_4, %c0_5] : memref<32x32xbf16, #tpu.memory_space<vmem>>, vector<32x32xbf16>
    %cst = arith.constant dense<0.000000e+00> : vector<32x32xf32>
    %6 = tpu.matmul %3, %5, %cst {dimension_numbers = #tpu.dot_dimension_numbers<[1], [0], [0], [1], [0, 0, 1, 1], [], []>} : vector<32x32xbf16>, vector<32x32xbf16>, vector<32x32xf32> -> vector<32x32xf32>
    %7 = arith.addf %4, %6 : vector<32x32xf32>
    %c0_6 = arith.constant 0 : index
    %c0_7 = arith.constant 0 : index
    %8 = vector.load %arg8[%c0_6, %c0_7] : memref<32x32xf32, #tpu.memory_space<vmem>>, vector<32x32xf32>
    tpu.vector_store %arg8[%c0_6, %c0_7], %7 {strides = array<i32>} : memref<32x32xf32, #tpu.memory_space<vmem>>, vector<32x32xf32>,
    %c0_i32_8 = arith.constant 0 : i32
    %9 = arith.cmpi eq, %arg2, %c0_i32_8 : i32
    %10 = arith.extui %9 : i1 to i32
    %c0_i32_9 = arith.constant 0 : i32
    %11 = arith.cmpi ne, %10, %c0_i32_9 : i32
    scf.if %11 {
      %c0_10 = arith.constant 0 : index
      %c0_11 = arith.constant 0 : index
      %12 = vector.load %arg8[%c0_10, %c0_11] : memref<32x32xf32, #tpu.memory_space<vmem>>, vector<32x32xf32>
      %c0_12 = arith.constant 0 : index
      %c0_13 = arith.constant 0 : index
      %13 = vector.load %arg5[%c0_12, %c0_13] : memref<1x32xf32, #tpu.memory_space<vmem>>, vector<1x32xf32>
      %14 = vector.broadcast %13 : vector<1x32xf32> to vector<32x32xf32>
      %15 = arith.addf %12, %14 : vector<32x32xf32>
      %c0_14 = arith.constant 0 : index
      %c0_15 = arith.constant 0 : index
      %16 = vector.load %arg6[%c0_14, %c0_15] : memref<32x32xf32, #tpu.memory_space<vmem>>, vector<32x32xf32>
      %17 = arith.addf %15, %16 : vector<32x32xf32>
      %c0_16 = arith.constant 0 : index
      %c0_17 = arith.constant 0 : index
      %18 = vector.load %arg7[%c0_16, %c0_17] : memref<32x32xf32, #tpu.memory_space<vmem>>, vector<32x32xf32>
      tpu.vector_store %arg7[%c0_16, %c0_17], %17 {strides = array<i32>} : memref<32x32xf32, #tpu.memory_space<vmem>>, vector<32x32xf32>,
    } else {
    }
    return
  }
  func.func @transform_0(%arg0: i32, %arg1: i32, %arg2: i32) -> (i32, i32) {
    %c0_i32 = arith.constant 0 : i32
    return %arg0, %arg2 : i32, i32
  }
  func.func @transform_1(%arg0: i32, %arg1: i32, %arg2: i32) -> (i32, i32) {
    %c0_i32 = arith.constant 0 : i32
    return %arg2, %arg1 : i32, i32
  }
  func.func @transform_2(%arg0: i32, %arg1: i32, %arg2: i32) -> (i32, i32) {
    %c0_i32 = arith.constant 0 : i32
    %c0_i32_0 = arith.constant 0 : i32
    return %c0_i32, %arg1 : i32, i32
  }
  func.func @transform_3(%arg0: i32, %arg1: i32, %arg2: i32) -> (i32, i32) {
    %c0_i32 = arith.constant 0 : i32
    return %arg0, %arg1 : i32, i32
  }
  func.func @transform_4(%arg0: i32, %arg1: i32, %arg2: i32) -> (i32, i32) {
    %c0_i32 = arith.constant 0 : i32
    return %arg0, %arg1 : i32, i32
  }
}

module attributes {stable_mosaic.version = 11 : i64} {
  func.func @_fused_matmul_kernel(%arg0: i32, %arg1: i32, %arg2: i32, %arg3: memref<32x32xf32, #tpu.memory_space<vmem>>, %arg4: memref<32x16xbf16, #tpu.memory_space<vmem>>, %arg5: memref<1x16xf32, #tpu.memory_space<vmem>>, %arg6: memref<1x16xf32, #tpu.memory_space<vmem>>, %arg7: memref<32x16xbf16, #tpu.memory_space<vmem>>, %arg8: memref<32x16xf32, #tpu.memory_space<vmem>>) attributes {dimension_semantics = [#tpu.dimension_semantics<parallel>, #tpu.dimension_semantics<parallel>, #tpu.dimension_semantics<arbitrary>], iteration_bounds = array<i64: 1, 1, 1>, scalar_prefetch = 0 : i64, scratch_operands = 1 : i64, tpu.core_type = #tpu.core_type<tc>, window_params = [{transform_indices = @transform_0, window_bounds = array<i64: 32, 32>}, {transform_indices = @transform_1, window_bounds = array<i64: 32, 16>}, {transform_indices = @transform_2, window_bounds = array<i64: 1, 16>}, {transform_indices = @transform_3, window_bounds = array<i64: 1, 16>}, {transform_indices = @transform_4, window_bounds = array<i64: 32, 16>}]} {
    %c0_i32 = arith.constant 0 : i32
    %0 = arith.cmpi eq, %arg2, %c0_i32 : i32
    %1 = arith.extui %0 : i1 to i32
    %c0_i32_0 = arith.constant 0 : i32
    %2 = arith.cmpi ne, %1, %c0_i32_0 : i32
    scf.if %2 {
      %cst_10 = arith.constant 0.000000e+00 : f32
      %13 = vector.broadcast %cst_10 : f32 to vector<32x16xf32>
      %c0_11 = arith.constant 0 : index
      %c0_12 = arith.constant 0 : index
      %14 = vector.load %arg8[%c0_11, %c0_12] : memref<32x16xf32, #tpu.memory_space<vmem>>, vector<32x16xf32>
      tpu.vector_store %arg8[%c0_11, %c0_12], %13 {strides = array<i32>} : memref<32x16xf32, #tpu.memory_space<vmem>>, vector<32x16xf32>,
    } else {
    }
    %c0 = arith.constant 0 : index
    %c0_1 = arith.constant 0 : index
    %3 = vector.load %arg3[%c0, %c0_1] : memref<32x32xf32, #tpu.memory_space<vmem>>, vector<32x32xf32>
    %4 = arith.truncf %3 : vector<32x32xf32> to vector<32x32xbf16>
    %c0_2 = arith.constant 0 : index
    %c0_3 = arith.constant 0 : index
    %5 = vector.load %arg8[%c0_2, %c0_3] : memref<32x16xf32, #tpu.memory_space<vmem>>, vector<32x16xf32>
    %c0_4 = arith.constant 0 : index
    %c0_5 = arith.constant 0 : index
    %6 = vector.load %arg4[%c0_4, %c0_5] : memref<32x16xbf16, #tpu.memory_space<vmem>>, vector<32x16xbf16>
    %cst = arith.constant dense<0.000000e+00> : vector<32x16xf32>
    %7 = tpu.matmul %4, %6, %cst {dimension_numbers = #tpu.dot_dimension_numbers<[1], [0], [0], [1], [0, 0, 1, 1], [], []>} : vector<32x32xbf16>, vector<32x16xbf16>, vector<32x16xf32> -> vector<32x16xf32>
    %8 = arith.addf %5, %7 : vector<32x16xf32>
    %c0_6 = arith.constant 0 : index
    %c0_7 = arith.constant 0 : index
    %9 = vector.load %arg8[%c0_6, %c0_7] : memref<32x16xf32, #tpu.memory_space<vmem>>, vector<32x16xf32>
    tpu.vector_store %arg8[%c0_6, %c0_7], %8 {strides = array<i32>} : memref<32x16xf32, #tpu.memory_space<vmem>>, vector<32x16xf32>,
    %c0_i32_8 = arith.constant 0 : i32
    %10 = arith.cmpi eq, %arg2, %c0_i32_8 : i32
    %11 = arith.extui %10 : i1 to i32
    %c0_i32_9 = arith.constant 0 : i32
    %12 = arith.cmpi ne, %11, %c0_i32_9 : i32
    scf.if %12 {
      %c0_10 = arith.constant 0 : index
      %c0_11 = arith.constant 0 : index
      %13 = vector.load %arg8[%c0_10, %c0_11] : memref<32x16xf32, #tpu.memory_space<vmem>>, vector<32x16xf32>
      %cst_12 = arith.constant dense<0.000000e+00> : vector<32xf32>
      %14 = vector.multi_reduction <add>, %13, %cst_12 [1] : vector<32x16xf32> to vector<32xf32>
      %15 = vector.shape_cast %14 : vector<32xf32> to vector<32x1xf32>
      %cst_13 = arith.constant 1.600000e+01 : f32
      %16 = vector.broadcast %cst_13 : f32 to vector<32x1xf32>
      %17 = arith.divf %15, %16 : vector<32x1xf32>
      %18 = vector.broadcast %17 : vector<32x1xf32> to vector<32x16xf32>
      %19 = arith.subf %13, %18 : vector<32x16xf32>
      %20 = arith.mulf %19, %19 : vector<32x16xf32>
      %cst_14 = arith.constant dense<0.000000e+00> : vector<32xf32>
      %21 = vector.multi_reduction <add>, %20, %cst_14 [1] : vector<32x16xf32> to vector<32xf32>
      %22 = vector.shape_cast %21 : vector<32xf32> to vector<32x1xf32>
      %cst_15 = arith.constant 1.600000e+01 : f32
      %23 = vector.broadcast %cst_15 : f32 to vector<32x1xf32>
      %24 = arith.divf %22, %23 : vector<32x1xf32>
      %25 = vector.broadcast %17 : vector<32x1xf32> to vector<32x16xf32>
      %26 = arith.subf %13, %25 : vector<32x16xf32>
      %cst_16 = arith.constant 9.99999997E-7 : f32
      %27 = vector.broadcast %cst_16 : f32 to vector<32x1xf32>
      %28 = arith.addf %24, %27 : vector<32x1xf32>
      %29 = math.rsqrt %28 : vector<32x1xf32>
      %30 = vector.broadcast %29 : vector<32x1xf32> to vector<32x16xf32>
      %31 = arith.mulf %26, %30 : vector<32x16xf32>
      %c0_17 = arith.constant 0 : index
      %c0_18 = arith.constant 0 : index
      %32 = vector.load %arg5[%c0_17, %c0_18] : memref<1x16xf32, #tpu.memory_space<vmem>>, vector<1x16xf32>
      %33 = vector.broadcast %32 : vector<1x16xf32> to vector<32x16xf32>
      %34 = arith.mulf %31, %33 : vector<32x16xf32>
      %c0_19 = arith.constant 0 : index
      %c0_20 = arith.constant 0 : index
      %35 = vector.load %arg6[%c0_19, %c0_20] : memref<1x16xf32, #tpu.memory_space<vmem>>, vector<1x16xf32>
      %36 = vector.broadcast %35 : vector<1x16xf32> to vector<32x16xf32>
      %37 = arith.addf %34, %36 : vector<32x16xf32>
      %38 = arith.truncf %37 : vector<32x16xf32> to vector<32x16xbf16>
      %c0_21 = arith.constant 0 : index
      %c0_22 = arith.constant 0 : index
      %39 = vector.load %arg7[%c0_21, %c0_22] : memref<32x16xbf16, #tpu.memory_space<vmem>>, vector<32x16xbf16>
      tpu.vector_store %arg7[%c0_21, %c0_22], %38 {strides = array<i32>} : memref<32x16xbf16, #tpu.memory_space<vmem>>, vector<32x16xbf16>,
    } else {
    }
    return
  }
  func.func @transform_0(%arg0: i32, %arg1: i32, %arg2: i32) -> (i32, i32) {
    %c0_i32 = arith.constant 0 : i32
    return %arg0, %arg2 : i32, i32
  }
  func.func @transform_1(%arg0: i32, %arg1: i32, %arg2: i32) -> (i32, i32) {
    %c0_i32 = arith.constant 0 : i32
    return %arg2, %arg1 : i32, i32
  }
  func.func @transform_2(%arg0: i32, %arg1: i32, %arg2: i32) -> (i32, i32) {
    %c0_i32 = arith.constant 0 : i32
    %c0_i32_0 = arith.constant 0 : i32
    return %c0_i32, %arg1 : i32, i32
  }
  func.func @transform_3(%arg0: i32, %arg1: i32, %arg2: i32) -> (i32, i32) {
    %c0_i32 = arith.constant 0 : i32
    %c0_i32_0 = arith.constant 0 : i32
    return %c0_i32, %arg1 : i32, i32
  }
  func.func @transform_4(%arg0: i32, %arg1: i32, %arg2: i32) -> (i32, i32) {
    %c0_i32 = arith.constant 0 : i32
    return %arg0, %arg1 : i32, i32
  }
}

module attributes {stable_mosaic.version = 11 : i64} {
  func.func @_fused_matmul_kernel(%arg0: i32, %arg1: i32, %arg2: i32, %arg3: memref<32x128xbf16, #tpu.memory_space<vmem>>, %arg4: memref<128x32xbf16, #tpu.memory_space<vmem>>, %arg5: memref<1x32xf32, #tpu.memory_space<vmem>>, %arg6: memref<32x32xf32, #tpu.memory_space<vmem>>, %arg7: memref<32x32xf32, #tpu.memory_space<vmem>>, %arg8: memref<32x32xf32, #tpu.memory_space<vmem>>) attributes {dimension_semantics = [#tpu.dimension_semantics<parallel>, #tpu.dimension_semantics<parallel>, #tpu.dimension_semantics<arbitrary>], iteration_bounds = array<i64: 1, 1, 1>, scalar_prefetch = 0 : i64, scratch_operands = 1 : i64, tpu.core_type = #tpu.core_type<tc>, window_params = [{transform_indices = @transform_0, window_bounds = array<i64: 32, 128>}, {transform_indices = @transform_1, window_bounds = array<i64: 128, 32>}, {transform_indices = @transform_2, window_bounds = array<i64: 1, 32>}, {transform_indices = @transform_3, window_bounds = array<i64: 32, 32>}, {transform_indices = @transform_4, window_bounds = array<i64: 32, 32>}]} {
    %c0_i32 = arith.constant 0 : i32
    %0 = arith.cmpi eq, %arg2, %c0_i32 : i32
    %1 = arith.extui %0 : i1 to i32
    %c0_i32_0 = arith.constant 0 : i32
    %2 = arith.cmpi ne, %1, %c0_i32_0 : i32
    scf.if %2 {
      %cst_10 = arith.constant 0.000000e+00 : f32
      %12 = vector.broadcast %cst_10 : f32 to vector<32x32xf32>
      %c0_11 = arith.constant 0 : index
      %c0_12 = arith.constant 0 : index
      %13 = vector.load %arg8[%c0_11, %c0_12] : memref<32x32xf32, #tpu.memory_space<vmem>>, vector<32x32xf32>
      tpu.vector_store %arg8[%c0_11, %c0_12], %12 {strides = array<i32>} : memref<32x32xf32, #tpu.memory_space<vmem>>, vector<32x32xf32>,
    } else {
    }
    %c0 = arith.constant 0 : index
    %c0_1 = arith.constant 0 : index
    %3 = vector.load %arg3[%c0, %c0_1] : memref<32x128xbf16, #tpu.memory_space<vmem>>, vector<32x128xbf16>
    %c0_2 = arith.constant 0 : index
    %c0_3 = arith.constant 0 : index
    %4 = vector.load %arg8[%c0_2, %c0_3] : memref<32x32xf32, #tpu.memory_space<vmem>>, vector<32x32xf32>
    %c0_4 = arith.constant 0 : index
    %c0_5 = arith.constant 0 : index
    %5 = vector.load %arg4[%c0_4, %c0_5] : memref<128x32xbf16, #tpu.memory_space<vmem>>, vector<128x32xbf16>
    %cst = arith.constant dense<0.000000e+00> : vector<32x32xf32>
    %6 = tpu.matmul %3, %5, %cst {dimension_numbers = #tpu.dot_dimension_numbers<[1], [0], [0], [1], [0, 0, 1, 1], [], []>} : vector<32x128xbf16>, vector<128x32xbf16>, vector<32x32xf32> -> vector<32x32xf32>
    %7 = arith.addf %4, %6 : vector<32x32xf32>
    %c0_6 = arith.constant 0 : index
    %c0_7 = arith.constant 0 : index
    %8 = vector.load %arg8[%c0_6, %c0_7] : memref<32x32xf32, #tpu.memory_space<vmem>>, vector<32x32xf32>
    tpu.vector_store %arg8[%c0_6, %c0_7], %7 {strides = array<i32>} : memref<32x32xf32, #tpu.memory_space<vmem>>, vector<32x32xf32>,
    %c0_i32_8 = arith.constant 0 : i32
    %9 = arith.cmpi eq, %arg2, %c0_i32_8 : i32
    %10 = arith.extui %9 : i1 to i32
    %c0_i32_9 = arith.constant 0 : i32
    %11 = arith.cmpi ne, %10, %c0_i32_9 : i32
    scf.if %11 {
      %c0_10 = arith.constant 0 : index
      %c0_11 = arith.constant 0 : index
      %12 = vector.load %arg8[%c0_10, %c0_11] : memref<32x32xf32, #tpu.memory_space<vmem>>, vector<32x32xf32>
      %c0_12 = arith.constant 0 : index
      %c0_13 = arith.constant 0 : index
      %13 = vector.load %arg5[%c0_12, %c0_13] : memref<1x32xf32, #tpu.memory_space<vmem>>, vector<1x32xf32>
      %14 = vector.broadcast %13 : vector<1x32xf32> to vector<32x32xf32>
      %15 = arith.addf %12, %14 : vector<32x32xf32>
      %c0_14 = arith.constant 0 : index
      %c0_15 = arith.constant 0 : index
      %16 = vector.load %arg6[%c0_14, %c0_15] : memref<32x32xf32, #tpu.memory_space<vmem>>, vector<32x32xf32>
      %17 = arith.addf %15, %16 : vector<32x32xf32>
      %c0_16 = arith.constant 0 : index
      %c0_17 = arith.constant 0 : index
      %18 = vector.load %arg7[%c0_16, %c0_17] : memref<32x32xf32, #tpu.memory_space<vmem>>, vector<32x32xf32>
      tpu.vector_store %arg7[%c0_16, %c0_17], %17 {strides = array<i32>} : memref<32x32xf32, #tpu.memory_space<vmem>>, vector<32x32xf32>,
    } else {
    }
    return
  }
  func.func @transform_0(%arg0: i32, %arg1: i32, %arg2: i32) -> (i32, i32) {
    %c0_i32 = arith.constant 0 : i32
    return %arg0, %arg2 : i32, i32
  }
  func.func @transform_1(%arg0: i32, %arg1: i32, %arg2: i32) -> (i32, i32) {
    %c0_i32 = arith.constant 0 : i32
    return %arg2, %arg1 : i32, i32
  }
  func.func @transform_2(%arg0: i32, %arg1: i32, %arg2: i32) -> (i32, i32) {
    %c0_i32 = arith.constant 0 : i32
    %c0_i32_0 = arith.constant 0 : i32
    return %c0_i32, %arg1 : i32, i32
  }
  func.func @transform_3(%arg0: i32, %arg1: i32, %arg2: i32) -> (i32, i32) {
    %c0_i32 = arith.constant 0 : i32
    return %arg0, %arg1 : i32, i32
  }
  func.func @transform_4(%arg0: i32, %arg1: i32, %arg2: i32) -> (i32, i32) {
    %c0_i32 = arith.constant 0 : i32
    return %arg0, %arg1 : i32, i32
  }
}

module attributes {stable_mosaic.version = 11 : i64} {
  func.func @_neck_conv3_kernel(%arg0: i32, %arg1: memref<1x6x6x16xbf16, #tpu.memory_space<vmem>>, %arg2: memref<9x16x16xbf16, #tpu.memory_space<vmem>>, %arg3: memref<1x16xf32, #tpu.memory_space<vmem>>, %arg4: memref<1x16xf32, #tpu.memory_space<vmem>>, %arg5: memref<1x4x4x16xf32, #tpu.memory_space<vmem>>, %arg6: memref<16x16xf32, #tpu.memory_space<vmem>>) attributes {dimension_semantics = [#tpu.dimension_semantics<parallel>], iteration_bounds = array<i64: 2>, scalar_prefetch = 0 : i64, scratch_operands = 1 : i64, tpu.core_type = #tpu.core_type<tc>, window_params = [{transform_indices = @transform_0, window_bounds = array<i64: 1, 6, 6, 16>}, {pipeline_mode = #tpu.pipeline_mode<synchronous>, transform_indices = @transform_1, window_bounds = array<i64: 9, 16, 16>}, {pipeline_mode = #tpu.pipeline_mode<synchronous>, transform_indices = @transform_2, window_bounds = array<i64: 1, 16>}, {pipeline_mode = #tpu.pipeline_mode<synchronous>, transform_indices = @transform_3, window_bounds = array<i64: 1, 16>}, {transform_indices = @transform_4, window_bounds = array<i64: 1, 4, 4, 16>}]} {
    %cst = arith.constant 0.000000e+00 : f32
    %0 = vector.broadcast %cst : f32 to vector<16x16xf32>
    %c0 = arith.constant 0 : index
    %c0_0 = arith.constant 0 : index
    %1 = vector.load %arg6[%c0, %c0_0] : memref<16x16xf32, #tpu.memory_space<vmem>>, vector<16x16xf32>
    tpu.vector_store %arg6[%c0, %c0_0], %0 {strides = array<i32>} : memref<16x16xf32, #tpu.memory_space<vmem>>, vector<16x16xf32>,
    %c0_1 = arith.constant 0 : index
    %c0_2 = arith.constant 0 : index
    %c0_3 = arith.constant 0 : index
    %c0_4 = arith.constant 0 : index
    %2 = vector.load %arg1[%c0_1, %c0_2, %c0_3, %c0_4] : memref<1x6x6x16xbf16, #tpu.memory_space<vmem>>, vector<1x4x4x16xbf16>
    %3 = vector.shape_cast %2 : vector<1x4x4x16xbf16> to vector<4x4x16xbf16>
    %c0_5 = arith.constant 0 : index
    %c0_6 = arith.constant 0 : index
    %4 = vector.load %arg6[%c0_5, %c0_6] : memref<16x16xf32, #tpu.memory_space<vmem>>, vector<16x16xf32>
    %5 = vector.shape_cast %3 : vector<4x4x16xbf16> to vector<16x16xbf16>
    %c0_7 = arith.constant 0 : index
    %c0_8 = arith.constant 0 : index
    %c0_9 = arith.constant 0 : index
    %6 = vector.load %arg2[%c0_7, %c0_8, %c0_9] : memref<9x16x16xbf16, #tpu.memory_space<vmem>>, vector<1x16x16xbf16>
    %7 = vector.shape_cast %6 : vector<1x16x16xbf16> to vector<16x16xbf16>
    %cst_10 = arith.constant dense<0.000000e+00> : vector<16x16xf32>
    %8 = tpu.matmul %5, %7, %cst_10 {dimension_numbers = #tpu.dot_dimension_numbers<[1], [0], [0], [1], [0, 0, 1, 1], [], []>} : vector<16x16xbf16>, vector<16x16xbf16>, vector<16x16xf32> -> vector<16x16xf32>
    %9 = arith.addf %4, %8 : vector<16x16xf32>
    %c0_11 = arith.constant 0 : index
    %c0_12 = arith.constant 0 : index
    %10 = vector.load %arg6[%c0_11, %c0_12] : memref<16x16xf32, #tpu.memory_space<vmem>>, vector<16x16xf32>
    tpu.vector_store %arg6[%c0_11, %c0_12], %9 {strides = array<i32>} : memref<16x16xf32, #tpu.memory_space<vmem>>, vector<16x16xf32>,
    %c0_13 = arith.constant 0 : index
    %c0_14 = arith.constant 0 : index
    %c1 = arith.constant 1 : index
    %c0_15 = arith.constant 0 : index
    %11 = vector.load %arg1[%c0_13, %c0_14, %c1, %c0_15] : memref<1x6x6x16xbf16, #tpu.memory_space<vmem>>, vector<1x4x4x16xbf16>
    %12 = vector.shape_cast %11 : vector<1x4x4x16xbf16> to vector<4x4x16xbf16>
    %c0_16 = arith.constant 0 : index
    %c0_17 = arith.constant 0 : index
    %13 = vector.load %arg6[%c0_16, %c0_17] : memref<16x16xf32, #tpu.memory_space<vmem>>, vector<16x16xf32>
    %14 = vector.shape_cast %12 : vector<4x4x16xbf16> to vector<16x16xbf16>
    %c1_18 = arith.constant 1 : index
    %c0_19 = arith.constant 0 : index
    %c0_20 = arith.constant 0 : index
    %15 = vector.load %arg2[%c1_18, %c0_19, %c0_20] : memref<9x16x16xbf16, #tpu.memory_space<vmem>>, vector<1x16x16xbf16>
    %16 = vector.shape_cast %15 : vector<1x16x16xbf16> to vector<16x16xbf16>
    %cst_21 = arith.constant dense<0.000000e+00> : vector<16x16xf32>
    %17 = tpu.matmul %14, %16, %cst_21 {dimension_numbers = #tpu.dot_dimension_numbers<[1], [0], [0], [1], [0, 0, 1, 1], [], []>} : vector<16x16xbf16>, vector<16x16xbf16>, vector<16x16xf32> -> vector<16x16xf32>
    %18 = arith.addf %13, %17 : vector<16x16xf32>
    %c0_22 = arith.constant 0 : index
    %c0_23 = arith.constant 0 : index
    %19 = vector.load %arg6[%c0_22, %c0_23] : memref<16x16xf32, #tpu.memory_space<vmem>>, vector<16x16xf32>
    tpu.vector_store %arg6[%c0_22, %c0_23], %18 {strides = array<i32>} : memref<16x16xf32, #tpu.memory_space<vmem>>, vector<16x16xf32>,
    %c0_24 = arith.constant 0 : index
    %c0_25 = arith.constant 0 : index
    %c2 = arith.constant 2 : index
    %c0_26 = arith.constant 0 : index
    %20 = vector.load %arg1[%c0_24, %c0_25, %c2, %c0_26] : memref<1x6x6x16xbf16, #tpu.memory_space<vmem>>, vector<1x4x4x16xbf16>
    %21 = vector.shape_cast %20 : vector<1x4x4x16xbf16> to vector<4x4x16xbf16>
    %c0_27 = arith.constant 0 : index
    %c0_28 = arith.constant 0 : index
    %22 = vector.load %arg6[%c0_27, %c0_28] : memref<16x16xf32, #tpu.memory_space<vmem>>, vector<16x16xf32>
    %23 = vector.shape_cast %21 : vector<4x4x16xbf16> to vector<16x16xbf16>
    %c2_29 = arith.constant 2 : index
    %c0_30 = arith.constant 0 : index
    %c0_31 = arith.constant 0 : index
    %24 = vector.load %arg2[%c2_29, %c0_30, %c0_31] : memref<9x16x16xbf16, #tpu.memory_space<vmem>>, vector<1x16x16xbf16>
    %25 = vector.shape_cast %24 : vector<1x16x16xbf16> to vector<16x16xbf16>
    %cst_32 = arith.constant dense<0.000000e+00> : vector<16x16xf32>
    %26 = tpu.matmul %23, %25, %cst_32 {dimension_numbers = #tpu.dot_dimension_numbers<[1], [0], [0], [1], [0, 0, 1, 1], [], []>} : vector<16x16xbf16>, vector<16x16xbf16>, vector<16x16xf32> -> vector<16x16xf32>
    %27 = arith.addf %22, %26 : vector<16x16xf32>
    %c0_33 = arith.constant 0 : index
    %c0_34 = arith.constant 0 : index
    %28 = vector.load %arg6[%c0_33, %c0_34] : memref<16x16xf32, #tpu.memory_space<vmem>>, vector<16x16xf32>
    tpu.vector_store %arg6[%c0_33, %c0_34], %27 {strides = array<i32>} : memref<16x16xf32, #tpu.memory_space<vmem>>, vector<16x16xf32>,
    %c0_35 = arith.constant 0 : index
    %c1_36 = arith.constant 1 : index
    %c0_37 = arith.constant 0 : index
    %c0_38 = arith.constant 0 : index
    %29 = vector.load %arg1[%c0_35, %c1_36, %c0_37, %c0_38] : memref<1x6x6x16xbf16, #tpu.memory_space<vmem>>, vector<1x4x4x16xbf16>
    %30 = vector.shape_cast %29 : vector<1x4x4x16xbf16> to vector<4x4x16xbf16>
    %c0_39 = arith.constant 0 : index
    %c0_40 = arith.constant 0 : index
    %31 = vector.load %arg6[%c0_39, %c0_40] : memref<16x16xf32, #tpu.memory_space<vmem>>, vector<16x16xf32>
    %32 = vector.shape_cast %30 : vector<4x4x16xbf16> to vector<16x16xbf16>
    %c3 = arith.constant 3 : index
    %c0_41 = arith.constant 0 : index
    %c0_42 = arith.constant 0 : index
    %33 = vector.load %arg2[%c3, %c0_41, %c0_42] : memref<9x16x16xbf16, #tpu.memory_space<vmem>>, vector<1x16x16xbf16>
    %34 = vector.shape_cast %33 : vector<1x16x16xbf16> to vector<16x16xbf16>
    %cst_43 = arith.constant dense<0.000000e+00> : vector<16x16xf32>
    %35 = tpu.matmul %32, %34, %cst_43 {dimension_numbers = #tpu.dot_dimension_numbers<[1], [0], [0], [1], [0, 0, 1, 1], [], []>} : vector<16x16xbf16>, vector<16x16xbf16>, vector<16x16xf32> -> vector<16x16xf32>
    %36 = arith.addf %31, %35 : vector<16x16xf32>
    %c0_44 = arith.constant 0 : index
    %c0_45 = arith.constant 0 : index
    %37 = vector.load %arg6[%c0_44, %c0_45] : memref<16x16xf32, #tpu.memory_space<vmem>>, vector<16x16xf32>
    tpu.vector_store %arg6[%c0_44, %c0_45], %36 {strides = array<i32>} : memref<16x16xf32, #tpu.memory_space<vmem>>, vector<16x16xf32>,
    %c0_46 = arith.constant 0 : index
    %c1_47 = arith.constant 1 : index
    %c1_48 = arith.constant 1 : index
    %c0_49 = arith.constant 0 : index
    %38 = vector.load %arg1[%c0_46, %c1_47, %c1_48, %c0_49] : memref<1x6x6x16xbf16, #tpu.memory_space<vmem>>, vector<1x4x4x16xbf16>
    %39 = vector.shape_cast %38 : vector<1x4x4x16xbf16> to vector<4x4x16xbf16>
    %c0_50 = arith.constant 0 : index
    %c0_51 = arith.constant 0 : index
    %40 = vector.load %arg6[%c0_50, %c0_51] : memref<16x16xf32, #tpu.memory_space<vmem>>, vector<16x16xf32>
    %41 = vector.shape_cast %39 : vector<4x4x16xbf16> to vector<16x16xbf16>
    %c4 = arith.constant 4 : index
    %c0_52 = arith.constant 0 : index
    %c0_53 = arith.constant 0 : index
    %42 = vector.load %arg2[%c4, %c0_52, %c0_53] : memref<9x16x16xbf16, #tpu.memory_space<vmem>>, vector<1x16x16xbf16>
    %43 = vector.shape_cast %42 : vector<1x16x16xbf16> to vector<16x16xbf16>
    %cst_54 = arith.constant dense<0.000000e+00> : vector<16x16xf32>
    %44 = tpu.matmul %41, %43, %cst_54 {dimension_numbers = #tpu.dot_dimension_numbers<[1], [0], [0], [1], [0, 0, 1, 1], [], []>} : vector<16x16xbf16>, vector<16x16xbf16>, vector<16x16xf32> -> vector<16x16xf32>
    %45 = arith.addf %40, %44 : vector<16x16xf32>
    %c0_55 = arith.constant 0 : index
    %c0_56 = arith.constant 0 : index
    %46 = vector.load %arg6[%c0_55, %c0_56] : memref<16x16xf32, #tpu.memory_space<vmem>>, vector<16x16xf32>
    tpu.vector_store %arg6[%c0_55, %c0_56], %45 {strides = array<i32>} : memref<16x16xf32, #tpu.memory_space<vmem>>, vector<16x16xf32>,
    %c0_57 = arith.constant 0 : index
    %c1_58 = arith.constant 1 : index
    %c2_59 = arith.constant 2 : index
    %c0_60 = arith.constant 0 : index
    %47 = vector.load %arg1[%c0_57, %c1_58, %c2_59, %c0_60] : memref<1x6x6x16xbf16, #tpu.memory_space<vmem>>, vector<1x4x4x16xbf16>
    %48 = vector.shape_cast %47 : vector<1x4x4x16xbf16> to vector<4x4x16xbf16>
    %c0_61 = arith.constant 0 : index
    %c0_62 = arith.constant 0 : index
    %49 = vector.load %arg6[%c0_61, %c0_62] : memref<16x16xf32, #tpu.memory_space<vmem>>, vector<16x16xf32>
    %50 = vector.shape_cast %48 : vector<4x4x16xbf16> to vector<16x16xbf16>
    %c5 = arith.constant 5 : index
    %c0_63 = arith.constant 0 : index
    %c0_64 = arith.constant 0 : index
    %51 = vector.load %arg2[%c5, %c0_63, %c0_64] : memref<9x16x16xbf16, #tpu.memory_space<vmem>>, vector<1x16x16xbf16>
    %52 = vector.shape_cast %51 : vector<1x16x16xbf16> to vector<16x16xbf16>
    %cst_65 = arith.constant dense<0.000000e+00> : vector<16x16xf32>
    %53 = tpu.matmul %50, %52, %cst_65 {dimension_numbers = #tpu.dot_dimension_numbers<[1], [0], [0], [1], [0, 0, 1, 1], [], []>} : vector<16x16xbf16>, vector<16x16xbf16>, vector<16x16xf32> -> vector<16x16xf32>
    %54 = arith.addf %49, %53 : vector<16x16xf32>
    %c0_66 = arith.constant 0 : index
    %c0_67 = arith.constant 0 : index
    %55 = vector.load %arg6[%c0_66, %c0_67] : memref<16x16xf32, #tpu.memory_space<vmem>>, vector<16x16xf32>
    tpu.vector_store %arg6[%c0_66, %c0_67], %54 {strides = array<i32>} : memref<16x16xf32, #tpu.memory_space<vmem>>, vector<16x16xf32>,
    %c0_68 = arith.constant 0 : index
    %c2_69 = arith.constant 2 : index
    %c0_70 = arith.constant 0 : index
    %c0_71 = arith.constant 0 : index
    %56 = vector.load %arg1[%c0_68, %c2_69, %c0_70, %c0_71] : memref<1x6x6x16xbf16, #tpu.memory_space<vmem>>, vector<1x4x4x16xbf16>
    %57 = vector.shape_cast %56 : vector<1x4x4x16xbf16> to vector<4x4x16xbf16>
    %c0_72 = arith.constant 0 : index
    %c0_73 = arith.constant 0 : index
    %58 = vector.load %arg6[%c0_72, %c0_73] : memref<16x16xf32, #tpu.memory_space<vmem>>, vector<16x16xf32>
    %59 = vector.shape_cast %57 : vector<4x4x16xbf16> to vector<16x16xbf16>
    %c6 = arith.constant 6 : index
    %c0_74 = arith.constant 0 : index
    %c0_75 = arith.constant 0 : index
    %60 = vector.load %arg2[%c6, %c0_74, %c0_75] : memref<9x16x16xbf16, #tpu.memory_space<vmem>>, vector<1x16x16xbf16>
    %61 = vector.shape_cast %60 : vector<1x16x16xbf16> to vector<16x16xbf16>
    %cst_76 = arith.constant dense<0.000000e+00> : vector<16x16xf32>
    %62 = tpu.matmul %59, %61, %cst_76 {dimension_numbers = #tpu.dot_dimension_numbers<[1], [0], [0], [1], [0, 0, 1, 1], [], []>} : vector<16x16xbf16>, vector<16x16xbf16>, vector<16x16xf32> -> vector<16x16xf32>
    %63 = arith.addf %58, %62 : vector<16x16xf32>
    %c0_77 = arith.constant 0 : index
    %c0_78 = arith.constant 0 : index
    %64 = vector.load %arg6[%c0_77, %c0_78] : memref<16x16xf32, #tpu.memory_space<vmem>>, vector<16x16xf32>
    tpu.vector_store %arg6[%c0_77, %c0_78], %63 {strides = array<i32>} : memref<16x16xf32, #tpu.memory_space<vmem>>, vector<16x16xf32>,
    %c0_79 = arith.constant 0 : index
    %c2_80 = arith.constant 2 : index
    %c1_81 = arith.constant 1 : index
    %c0_82 = arith.constant 0 : index
    %65 = vector.load %arg1[%c0_79, %c2_80, %c1_81, %c0_82] : memref<1x6x6x16xbf16, #tpu.memory_space<vmem>>, vector<1x4x4x16xbf16>
    %66 = vector.shape_cast %65 : vector<1x4x4x16xbf16> to vector<4x4x16xbf16>
    %c0_83 = arith.constant 0 : index
    %c0_84 = arith.constant 0 : index
    %67 = vector.load %arg6[%c0_83, %c0_84] : memref<16x16xf32, #tpu.memory_space<vmem>>, vector<16x16xf32>
    %68 = vector.shape_cast %66 : vector<4x4x16xbf16> to vector<16x16xbf16>
    %c7 = arith.constant 7 : index
    %c0_85 = arith.constant 0 : index
    %c0_86 = arith.constant 0 : index
    %69 = vector.load %arg2[%c7, %c0_85, %c0_86] : memref<9x16x16xbf16, #tpu.memory_space<vmem>>, vector<1x16x16xbf16>
    %70 = vector.shape_cast %69 : vector<1x16x16xbf16> to vector<16x16xbf16>
    %cst_87 = arith.constant dense<0.000000e+00> : vector<16x16xf32>
    %71 = tpu.matmul %68, %70, %cst_87 {dimension_numbers = #tpu.dot_dimension_numbers<[1], [0], [0], [1], [0, 0, 1, 1], [], []>} : vector<16x16xbf16>, vector<16x16xbf16>, vector<16x16xf32> -> vector<16x16xf32>
    %72 = arith.addf %67, %71 : vector<16x16xf32>
    %c0_88 = arith.constant 0 : index
    %c0_89 = arith.constant 0 : index
    %73 = vector.load %arg6[%c0_88, %c0_89] : memref<16x16xf32, #tpu.memory_space<vmem>>, vector<16x16xf32>
    tpu.vector_store %arg6[%c0_88, %c0_89], %72 {strides = array<i32>} : memref<16x16xf32, #tpu.memory_space<vmem>>, vector<16x16xf32>,
    %c0_90 = arith.constant 0 : index
    %c2_91 = arith.constant 2 : index
    %c2_92 = arith.constant 2 : index
    %c0_93 = arith.constant 0 : index
    %74 = vector.load %arg1[%c0_90, %c2_91, %c2_92, %c0_93] : memref<1x6x6x16xbf16, #tpu.memory_space<vmem>>, vector<1x4x4x16xbf16>
    %75 = vector.shape_cast %74 : vector<1x4x4x16xbf16> to vector<4x4x16xbf16>
    %c0_94 = arith.constant 0 : index
    %c0_95 = arith.constant 0 : index
    %76 = vector.load %arg6[%c0_94, %c0_95] : memref<16x16xf32, #tpu.memory_space<vmem>>, vector<16x16xf32>
    %77 = vector.shape_cast %75 : vector<4x4x16xbf16> to vector<16x16xbf16>
    %c8 = arith.constant 8 : index
    %c0_96 = arith.constant 0 : index
    %c0_97 = arith.constant 0 : index
    %78 = vector.load %arg2[%c8, %c0_96, %c0_97] : memref<9x16x16xbf16, #tpu.memory_space<vmem>>, vector<1x16x16xbf16>
    %79 = vector.shape_cast %78 : vector<1x16x16xbf16> to vector<16x16xbf16>
    %cst_98 = arith.constant dense<0.000000e+00> : vector<16x16xf32>
    %80 = tpu.matmul %77, %79, %cst_98 {dimension_numbers = #tpu.dot_dimension_numbers<[1], [0], [0], [1], [0, 0, 1, 1], [], []>} : vector<16x16xbf16>, vector<16x16xbf16>, vector<16x16xf32> -> vector<16x16xf32>
    %81 = arith.addf %76, %80 : vector<16x16xf32>
    %c0_99 = arith.constant 0 : index
    %c0_100 = arith.constant 0 : index
    %82 = vector.load %arg6[%c0_99, %c0_100] : memref<16x16xf32, #tpu.memory_space<vmem>>, vector<16x16xf32>
    tpu.vector_store %arg6[%c0_99, %c0_100], %81 {strides = array<i32>} : memref<16x16xf32, #tpu.memory_space<vmem>>, vector<16x16xf32>,
    %c0_101 = arith.constant 0 : index
    %c0_102 = arith.constant 0 : index
    %83 = vector.load %arg6[%c0_101, %c0_102] : memref<16x16xf32, #tpu.memory_space<vmem>>, vector<16x16xf32>
    %cst_103 = arith.constant dense<0.000000e+00> : vector<16xf32>
    %84 = vector.multi_reduction <add>, %83, %cst_103 [1] : vector<16x16xf32> to vector<16xf32>
    %85 = vector.shape_cast %84 : vector<16xf32> to vector<16x1xf32>
    %cst_104 = arith.constant 1.600000e+01 : f32
    %86 = vector.broadcast %cst_104 : f32 to vector<16x1xf32>
    %87 = arith.divf %85, %86 : vector<16x1xf32>
    %88 = vector.broadcast %87 : vector<16x1xf32> to vector<16x16xf32>
    %89 = arith.subf %83, %88 : vector<16x16xf32>
    %90 = arith.mulf %89, %89 : vector<16x16xf32>
    %cst_105 = arith.constant dense<0.000000e+00> : vector<16xf32>
    %91 = vector.multi_reduction <add>, %90, %cst_105 [1] : vector<16x16xf32> to vector<16xf32>
    %92 = vector.shape_cast %91 : vector<16xf32> to vector<16x1xf32>
    %cst_106 = arith.constant 1.600000e+01 : f32
    %93 = vector.broadcast %cst_106 : f32 to vector<16x1xf32>
    %94 = arith.divf %92, %93 : vector<16x1xf32>
    %95 = vector.broadcast %87 : vector<16x1xf32> to vector<16x16xf32>
    %96 = arith.subf %83, %95 : vector<16x16xf32>
    %cst_107 = arith.constant 9.99999997E-7 : f32
    %97 = vector.broadcast %cst_107 : f32 to vector<16x1xf32>
    %98 = arith.addf %94, %97 : vector<16x1xf32>
    %99 = math.rsqrt %98 : vector<16x1xf32>
    %100 = vector.broadcast %99 : vector<16x1xf32> to vector<16x16xf32>
    %101 = arith.mulf %96, %100 : vector<16x16xf32>
    %c0_108 = arith.constant 0 : index
    %c0_109 = arith.constant 0 : index
    %102 = vector.load %arg3[%c0_108, %c0_109] : memref<1x16xf32, #tpu.memory_space<vmem>>, vector<1x16xf32>
    %103 = vector.broadcast %102 : vector<1x16xf32> to vector<16x16xf32>
    %104 = arith.mulf %101, %103 : vector<16x16xf32>
    %c0_110 = arith.constant 0 : index
    %c0_111 = arith.constant 0 : index
    %105 = vector.load %arg4[%c0_110, %c0_111] : memref<1x16xf32, #tpu.memory_space<vmem>>, vector<1x16xf32>
    %106 = vector.broadcast %105 : vector<1x16xf32> to vector<16x16xf32>
    %107 = arith.addf %104, %106 : vector<16x16xf32>
    %108 = vector.shape_cast %107 : vector<16x16xf32> to vector<4x4x16xf32>
    %c0_112 = arith.constant 0 : index
    %c0_113 = arith.constant 0 : index
    %c0_114 = arith.constant 0 : index
    %c0_115 = arith.constant 0 : index
    %109 = vector.load %arg5[%c0_112, %c0_113, %c0_114, %c0_115] : memref<1x4x4x16xf32, #tpu.memory_space<vmem>>, vector<1x4x4x16xf32>
    %110 = vector.shape_cast %109 : vector<1x4x4x16xf32> to vector<4x4x16xf32>
    %111 = vector.shape_cast %108 : vector<4x4x16xf32> to vector<1x4x4x16xf32>
    tpu.vector_store %arg5[%c0_112, %c0_113, %c0_114, %c0_115], %111 {strides = array<i32>} : memref<1x4x4x16xf32, #tpu.memory_space<vmem>>, vector<1x4x4x16xf32>,
    return
  }
  func.func @transform_0(%arg0: i32) -> (i32, i32, i32, i32) {
    %c0_i32 = arith.constant 0 : i32
    %c0_i32_0 = arith.constant 0 : i32
    %c0_i32_1 = arith.constant 0 : i32
    %c0_i32_2 = arith.constant 0 : i32
    return %arg0, %c0_i32, %c0_i32_0, %c0_i32_1 : i32, i32, i32, i32
  }
  func.func @transform_1(%arg0: i32) -> (i32, i32, i32) {
    %c0_i32 = arith.constant 0 : i32
    %c0_i32_0 = arith.constant 0 : i32
    %c0_i32_1 = arith.constant 0 : i32
    %c0_i32_2 = arith.constant 0 : i32
    return %c0_i32, %c0_i32_0, %c0_i32_1 : i32, i32, i32
  }
  func.func @transform_2(%arg0: i32) -> (i32, i32) {
    %c0_i32 = arith.constant 0 : i32
    %c0_i32_0 = arith.constant 0 : i32
    %c0_i32_1 = arith.constant 0 : i32
    return %c0_i32, %c0_i32_0 : i32, i32
  }
  func.func @transform_3(%arg0: i32) -> (i32, i32) {
    %c0_i32 = arith.constant 0 : i32
    %c0_i32_0 = arith.constant 0 : i32
    %c0_i32_1 = arith.constant 0 : i32
    return %c0_i32, %c0_i32_0 : i32, i32
  }
  func.func @transform_4(%arg0: i32) -> (i32, i32, i32, i32) {
    %c0_i32 = arith.constant 0 : i32
    %c0_i32_0 = arith.constant 0 : i32
    %c0_i32_1 = arith.constant 0 : i32
    %c0_i32_2 = arith.constant 0 : i32
    return %arg0, %c0_i32, %c0_i32_0, %c0_i32_1 : i32, i32, i32, i32
  }
}

module attributes {stable_mosaic.version = 11 : i64} {
  func.func @_fused_matmul_kernel(%arg0: i32, %arg1: i32, %arg2: i32, %arg3: memref<32x32xf32, #tpu.memory_space<vmem>>, %arg4: memref<32x128xbf16, #tpu.memory_space<vmem>>, %arg5: memref<1x32xf32, #tpu.memory_space<vmem>>, %arg6: memref<1x32xf32, #tpu.memory_space<vmem>>, %arg7: memref<1x128xf32, #tpu.memory_space<vmem>>, %arg8: memref<32x128xbf16, #tpu.memory_space<vmem>>, %arg9: memref<32x128xf32, #tpu.memory_space<vmem>>) attributes {dimension_semantics = [#tpu.dimension_semantics<parallel>, #tpu.dimension_semantics<parallel>, #tpu.dimension_semantics<arbitrary>], iteration_bounds = array<i64: 1, 1, 1>, scalar_prefetch = 0 : i64, scratch_operands = 1 : i64, tpu.core_type = #tpu.core_type<tc>, window_params = [{transform_indices = @transform_0, window_bounds = array<i64: 32, 32>}, {transform_indices = @transform_1, window_bounds = array<i64: 32, 128>}, {transform_indices = @transform_2, window_bounds = array<i64: 1, 32>}, {transform_indices = @transform_3, window_bounds = array<i64: 1, 32>}, {transform_indices = @transform_4, window_bounds = array<i64: 1, 128>}, {transform_indices = @transform_5, window_bounds = array<i64: 32, 128>}]} {
    %c0_i32 = arith.constant 0 : i32
    %0 = arith.cmpi eq, %arg2, %c0_i32 : i32
    %1 = arith.extui %0 : i1 to i32
    %c0_i32_0 = arith.constant 0 : i32
    %2 = arith.cmpi ne, %1, %c0_i32_0 : i32
    scf.if %2 {
      %cst_19 = arith.constant 0.000000e+00 : f32
      %37 = vector.broadcast %cst_19 : f32 to vector<32x128xf32>
      %c0_20 = arith.constant 0 : index
      %c0_21 = arith.constant 0 : index
      %38 = vector.load %arg9[%c0_20, %c0_21] : memref<32x128xf32, #tpu.memory_space<vmem>>, vector<32x128xf32>
      tpu.vector_store %arg9[%c0_20, %c0_21], %37 {strides = array<i32>} : memref<32x128xf32, #tpu.memory_space<vmem>>, vector<32x128xf32>,
    } else {
    }
    %c0 = arith.constant 0 : index
    %c0_1 = arith.constant 0 : index
    %3 = vector.load %arg3[%c0, %c0_1] : memref<32x32xf32, #tpu.memory_space<vmem>>, vector<32x32xf32>
    %cst = arith.constant dense<0.000000e+00> : vector<32xf32>
    %4 = vector.multi_reduction <add>, %3, %cst [1] : vector<32x32xf32> to vector<32xf32>
    %5 = vector.shape_cast %4 : vector<32xf32> to vector<32x1xf32>
    %cst_2 = arith.constant 3.200000e+01 : f32
    %6 = vector.broadcast %cst_2 : f32 to vector<32x1xf32>
    %7 = arith.divf %5, %6 : vector<32x1xf32>
    %8 = vector.broadcast %7 : vector<32x1xf32> to vector<32x32xf32>
    %9 = arith.subf %3, %8 : vector<32x32xf32>
    %10 = arith.mulf %9, %9 : vector<32x32xf32>
    %cst_3 = arith.constant dense<0.000000e+00> : vector<32xf32>
    %11 = vector.multi_reduction <add>, %10, %cst_3 [1] : vector<32x32xf32> to vector<32xf32>
    %12 = vector.shape_cast %11 : vector<32xf32> to vector<32x1xf32>
    %cst_4 = arith.constant 3.200000e+01 : f32
    %13 = vector.broadcast %cst_4 : f32 to vector<32x1xf32>
    %14 = arith.divf %12, %13 : vector<32x1xf32>
    %15 = vector.broadcast %7 : vector<32x1xf32> to vector<32x32xf32>
    %16 = arith.subf %3, %15 : vector<32x32xf32>
    %cst_5 = arith.constant 9.99999974E-6 : f32
    %17 = vector.broadcast %cst_5 : f32 to vector<32x1xf32>
    %18 = arith.addf %14, %17 : vector<32x1xf32>
    %19 = math.rsqrt %18 : vector<32x1xf32>
    %20 = vector.broadcast %19 : vector<32x1xf32> to vector<32x32xf32>
    %21 = arith.mulf %16, %20 : vector<32x32xf32>
    %c0_6 = arith.constant 0 : index
    %c0_7 = arith.constant 0 : index
    %22 = vector.load %arg5[%c0_6, %c0_7] : memref<1x32xf32, #tpu.memory_space<vmem>>, vector<1x32xf32>
    %23 = vector.broadcast %22 : vector<1x32xf32> to vector<32x32xf32>
    %24 = arith.mulf %21, %23 : vector<32x32xf32>
    %c0_8 = arith.constant 0 : index
    %c0_9 = arith.constant 0 : index
    %25 = vector.load %arg6[%c0_8, %c0_9] : memref<1x32xf32, #tpu.memory_space<vmem>>, vector<1x32xf32>
    %26 = vector.broadcast %25 : vector<1x32xf32> to vector<32x32xf32>
    %27 = arith.addf %24, %26 : vector<32x32xf32>
    %28 = arith.truncf %27 : vector<32x32xf32> to vector<32x32xbf16>
    %c0_10 = arith.constant 0 : index
    %c0_11 = arith.constant 0 : index
    %29 = vector.load %arg9[%c0_10, %c0_11] : memref<32x128xf32, #tpu.memory_space<vmem>>, vector<32x128xf32>
    %c0_12 = arith.constant 0 : index
    %c0_13 = arith.constant 0 : index
    %30 = vector.load %arg4[%c0_12, %c0_13] : memref<32x128xbf16, #tpu.memory_space<vmem>>, vector<32x128xbf16>
    %cst_14 = arith.constant dense<0.000000e+00> : vector<32x128xf32>
    %31 = tpu.matmul %28, %30, %cst_14 {dimension_numbers = #tpu.dot_dimension_numbers<[1], [0], [0], [1], [0, 0, 1, 1], [], []>} : vector<32x32xbf16>, vector<32x128xbf16>, vector<32x128xf32> -> vector<32x128xf32>
    %32 = arith.addf %29, %31 : vector<32x128xf32>
    %c0_15 = arith.constant 0 : index
    %c0_16 = arith.constant 0 : index
    %33 = vector.load %arg9[%c0_15, %c0_16] : memref<32x128xf32, #tpu.memory_space<vmem>>, vector<32x128xf32>
    tpu.vector_store %arg9[%c0_15, %c0_16], %32 {strides = array<i32>} : memref<32x128xf32, #tpu.memory_space<vmem>>, vector<32x128xf32>,
    %c0_i32_17 = arith.constant 0 : i32
    %34 = arith.cmpi eq, %arg2, %c0_i32_17 : i32
    %35 = arith.extui %34 : i1 to i32
    %c0_i32_18 = arith.constant 0 : i32
    %36 = arith.cmpi ne, %35, %c0_i32_18 : i32
    scf.if %36 {
      %c0_19 = arith.constant 0 : index
      %c0_20 = arith.constant 0 : index
      %37 = vector.load %arg9[%c0_19, %c0_20] : memref<32x128xf32, #tpu.memory_space<vmem>>, vector<32x128xf32>
      %c0_21 = arith.constant 0 : index
      %c0_22 = arith.constant 0 : index
      %38 = vector.load %arg7[%c0_21, %c0_22] : memref<1x128xf32, #tpu.memory_space<vmem>>, vector<1x128xf32>
      %39 = vector.broadcast %38 : vector<1x128xf32> to vector<32x128xf32>
      %40 = arith.addf %37, %39 : vector<32x128xf32>
      %cst_23 = arith.constant 5.000000e-01 : f32
      %41 = vector.broadcast %cst_23 : f32 to vector<32x128xf32>
      %42 = arith.mulf %41, %40 : vector<32x128xf32>
      %cst_24 = arith.constant 4.471500e-02 : f32
      %43 = vector.broadcast %cst_24 : f32 to vector<32x128xf32>
      %44 = arith.mulf %43, %40 : vector<32x128xf32>
      %45 = arith.mulf %44, %40 : vector<32x128xf32>
      %46 = arith.mulf %45, %40 : vector<32x128xf32>
      %47 = arith.addf %40, %46 : vector<32x128xf32>
      %cst_25 = arith.constant 0.797884583 : f32
      %48 = vector.broadcast %cst_25 : f32 to vector<32x128xf32>
      %49 = arith.mulf %48, %47 : vector<32x128xf32>
      %50 = math.tanh %49 : vector<32x128xf32>
      %cst_26 = arith.constant 1.000000e+00 : f32
      %51 = vector.broadcast %cst_26 : f32 to vector<32x128xf32>
      %52 = arith.addf %51, %50 : vector<32x128xf32>
      %53 = arith.mulf %42, %52 : vector<32x128xf32>
      %54 = arith.truncf %53 : vector<32x128xf32> to vector<32x128xbf16>
      %c0_27 = arith.constant 0 : index
      %c0_28 = arith.constant 0 : index
      %55 = vector.load %arg8[%c0_27, %c0_28] : memref<32x128xbf16, #tpu.memory_space<vmem>>, vector<32x128xbf16>
      tpu.vector_store %arg8[%c0_27, %c0_28], %54 {strides = array<i32>} : memref<32x128xbf16, #tpu.memory_space<vmem>>, vector<32x128xbf16>,
    } else {
    }
    return
  }
  func.func @transform_0(%arg0: i32, %arg1: i32, %arg2: i32) -> (i32, i32) {
    %c0_i32 = arith.constant 0 : i32
    return %arg0, %arg2 : i32, i32
  }
  func.func @transform_1(%arg0: i32, %arg1: i32, %arg2: i32) -> (i32, i32) {
    %c0_i32 = arith.constant 0 : i32
    return %arg2, %arg1 : i32, i32
  }
  func.func @transform_2(%arg0: i32, %arg1: i32, %arg2: i32) -> (i32, i32) {
    %c0_i32 = arith.constant 0 : i32
    %c0_i32_0 = arith.constant 0 : i32
    return %c0_i32, %arg2 : i32, i32
  }
  func.func @transform_3(%arg0: i32, %arg1: i32, %arg2: i32) -> (i32, i32) {
    %c0_i32 = arith.constant 0 : i32
    %c0_i32_0 = arith.constant 0 : i32
    return %c0_i32, %arg2 : i32, i32
  }
  func.func @transform_4(%arg0: i32, %arg1: i32, %arg2: i32) -> (i32, i32) {
    %c0_i32 = arith.constant 0 : i32
    %c0_i32_0 = arith.constant 0 : i32
    return %c0_i32, %arg1 : i32, i32
  }
  func.func @transform_5(%arg0: i32, %arg1: i32, %arg2: i32) -> (i32, i32) {
    %c0_i32 = arith.constant 0 : i32
    return %arg0, %arg1 : i32, i32
  }
}

</mosaic_0001>

<bundles_post_ra>
// kernel: _lambda_.17
= control target key start
LH: loop header
LB: loop body
LE: loop exit
PB: predicated region body
PF: predicated region fallthrough
CT: control target
= control target key end

     0   :  { %vm19_vm0 = vcmask 261120   ;;  %v187_v1 = vmov 0.0   ;;  %vm66_vm1 = vcmask 523264   ;;  %s259_s1 = inlined_call_operand.vmem [shape: bf16[64,32], index: 1, kind: input, shape index: {}]   ;;  %s260_s0 = inlined_call_operand.vmem [shape: f32[32,64], index: 0, kind: input, shape index: {}]   ;;  %s261_s2 = inlined_call_operand.vmem [shape: f32[1,32], index: 2, kind: input, shape index: {}]   ;;  %s262_s3 = inlined_call_operand.vmem [shape: f32[32,32], index: 3, kind: output, shape index: {}]  }
   0x1   :  { %v183_v0 = vld [vmem:[%s259_s1 + $0x18] sm:$0xff]   ;;  %22 = vst.msk [vmem:[#allocation2 + $0x10] sm:$0xff] %vm19_vm0, %v187_v1  ;;  %20 = vst.msk [vmem:[#allocation2] sm:$0xff] %vm19_vm0, %v187_v1  ;;  %v184_v2 = vld [vmem:[%s259_s1 + $0x10] sm:$0xff]  }
   0x2   :  { %21 = vst.msk [vmem:[#allocation2 + $0x8] sm:$0xff] %vm19_vm0, %v187_v1  ;;  %23 = vst.msk [vmem:[#allocation2 + $0x18] sm:$0xff] %vm19_vm0, %v187_v1  ;;  %170 = vmatprep.subr.bf16.mxu0 %v183_v0  ;;  %v185_v3 = vld [vmem:[%s259_s1 + $0x8] sm:$0xff]   ;;  %v24_v4 = vld [vmem:[%s260_s0] sm:$0xff] }
   0x3   :  { %171 = vmatpush3.bf16.msra.mxu0 %v183_v0  ;;  %v25_v5 = vld [vmem:[%s260_s0 + $0x8] sm:$0xff]  ;;  %v186_v7 = vld [vmem:[%s259_s1] sm:$0xff]   ;;  %v26_v8 = vld [vmem:[%s260_s0 + $0x10] sm:$0xff] }
   0x4   :  { %172 = vmatprep.subr.bf16.mxu0 %v184_v2  ;;  %v28_v6 = vpack.c.bf16 %v25_v5, %v24_v4  ;;  %v27_v9 = vld [vmem:[%s260_s0 + $0x18] sm:$0xff]  ;;  %v163_v23 = vld [vmem:[%s261_s2] ss:$0 sm:$0xff] }
   0x5   :  { %v29_v10 = vpack.c.bf16 %v27_v9, %v26_v8 }
   0x6   :  { %178 = vmatprep.mubr.msk.bf16.mxu0 %vm66_vm1, %v28_v6 }
   0x7   :  { %173 = vmatpush3.bf16.msra.mxu0 %v184_v2 }
   0x8   :  { %174 = vmatprep.subr.bf16.mxu0 %v185_v3  ;;  %v32_v11 = vld [vmem:[#allocation2 + $0x10] sm:$0xff]  ;;  %v30_v13 = vld [vmem:[#allocation2] sm:$0xff] }
   0x9   :  { %v33_v16 = vld [vmem:[#allocation2 + $0x18] sm:$0xff]  ;;  %v31_v19 = vld [vmem:[#allocation2 + $0x8] sm:$0xff] }
   0xb   :  { %175 = vmatpush3.bf16.msra.mxu0 %v185_v3 }
   0xc   :  { %176 = vmatprep.subr.bf16.mxu0 %v186_v7 }
   0xf   :  { %177 = vmatpush3.bf16.msra.mxu0 %v186_v7 }
  0x12   :  { %179 = vmatmul.mubr.msk.bf16.vlgmr.msra.gmra.mxu0 %vm66_vm1, %v29_v10 }
  0xd2   :  { %v180_v12 = vpop.f32.mrf.mxu0 }
  0xd3   :  { %v124_v14 = vadd.f32 %v180_v12, %v32_v11 }
  0xd4   :  { %v107_v15 = vpop.f32.mrf.mxu0 }
  0xd5   :  { %129 = vst.msk [vmem:[#allocation2 + $0x10] sm:$0xff] %vm19_vm0, %v124_v14  ;;  %v122_v17 = vadd.f32 %v107_v15, %v30_v13 }
  0xd6   :  { %v181_v18 = vpop.f32.mrf.mxu0 }
  0xd7   :  { %127 = vst.msk [vmem:[#allocation2] sm:$0xff] %vm19_vm0, %v122_v17  ;;  %v125_v20 = vadd.f32 %v181_v18, %v33_v16 }
  0xd8   :  { %v110_v21 = vpop.f32.mrf.mxu0 }
  0xd9   :  { %130 = vst.msk [vmem:[#allocation2 + $0x18] sm:$0xff] %vm19_vm0, %v125_v20  ;;  %v123_v22 = vadd.f32 %v110_v21, %v31_v19 }
  0xdb   :  { %128 = vst.msk [vmem:[#allocation2 + $0x8] sm:$0xff] %vm19_vm0, %v123_v22 }
  0xdc   :  { %v136_v24 = vld [vmem:[#allocation2 + $0x10] sm:$0xff] }
  0xdd   :  { %v147_v25 = vadd.f32 %v163_v23, %v136_v24 }
  0xde   :  { %v134_v26 = vld [vmem:[#allocation2] sm:$0xff] }
  0xdf   :  { %151 = vst.msk [vmem:[%s262_s3 + $0x10] sm:$0xff] %vm19_vm0, %v147_v25  ;;  %v145_v27 = vadd.f32 %v163_v23, %v134_v26 }
  0xe0   :  { %v137_v28 = vld [vmem:[#allocation2 + $0x18] sm:$0xff] }
  0xe1   :  { %149 = vst.msk [vmem:[%s262_s3] sm:$0xff] %vm19_vm0, %v145_v27  ;;  %v148_v29 = vadd.f32 %v163_v23, %v137_v28 }
  0xe2   :  { %v135_v30 = vld [vmem:[#allocation2 + $0x8] sm:$0xff] }
  0xe3   :  { %152 = vst.msk [vmem:[%s262_s3 + $0x18] sm:$0xff] %vm19_vm0, %v148_v29  ;;  %v146_v31 = vadd.f32 %v163_v23, %v135_v30 }
  0xe5   :  { %150 = vst.msk [vmem:[%s262_s3 + $0x8] sm:$0xff] %vm19_vm0, %v146_v31 }

// kernel: _lambda_.20
= control target key start
LH: loop header
LB: loop body
LE: loop exit
PB: predicated region body
PF: predicated region fallthrough
CT: control target
= control target key end

     0   :  { %vm25_vm0 = vcmask 261120   ;;  %v276_v30 = vmov 0.0   ;;  %vm229_vm1 = vcmask 257024   ;;  %s364_s0 = inlined_call_operand.vmem [shape: f32[32,32], index: 0, kind: input, shape index: {}]   ;;  %s365_s1 = inlined_call_operand.vmem [shape: bf16[32,32], index: 1, kind: input, shape index: {}]   ;;  %s366_s2 = inlined_call_operand.vmem [shape: f32[1,32], index: 2, kind: input, shape index: {}]   ;;  %s367_s3 = inlined_call_operand.vmem [shape: f32[1,32], index: 3, kind: input, shape index: {}]   ;;  %s368_s4 = inlined_call_operand.vmem [shape: f32[1,32], index: 4, kind: input, shape index: {}]   ;;  %s369_s5 = inlined_call_operand.vmem [shape: bf16[32,32], index: 5, kind: output, shape index: {}]  }
   0x1   :  { %v30_v0 = vld [vmem:[%s364_s0] sm:$0xff]  ;;  %v32_v1 = vld [vmem:[%s364_s0 + $0x10] sm:$0xff]  ;;  %v31_v2 = vld [vmem:[%s364_s0 + $0x8] sm:$0xff]  ;;  %28 = vst.msk [vmem:[#allocation2 + $0x10] sm:$0xff] %vm25_vm0, %v276_v30 }
   0x2   :  { %v35_v3 = vsel %vm25_vm0, %v30_v0, 0.0  ;;  %v41_v4 = vsel %vm25_vm0, %v32_v1, 0.0  ;;  %v33_v5 = vld [vmem:[%s364_s0 + $0x18] sm:$0xff]  ;;  %v38_v6 = vsel %vm25_vm0, %v31_v2, 0.0  ;;  %v266_v28 = vld [vmem:[%s365_s1 + $0x8] sm:$0xff]   ;;  %v267_v29 = vld [vmem:[%s365_s1] sm:$0xff]  }
   0x3   :  { %36 = vadd.xlane.f32.xlu0 %v35_v3  ;;  %42 = vadd.xlane.f32.xlu1 %v41_v4  ;;  %v44_v7 = vsel %vm25_vm0, %v33_v5, 0.0  ;;  %26 = vst.msk [vmem:[#allocation2] sm:$0xff] %vm25_vm0, %v276_v30  ;;  %27 = vst.msk [vmem:[#allocation2 + $0x8] sm:$0xff] %vm25_vm0, %v276_v30  ;;  %v238_v45 = vld [vmem:[%s366_s2] ss:$0 sm:$0xff] }
   0x4   :  { %257 = vmatprep.subr.bf16.mxu0 %v266_v28  ;;  %29 = vst.msk [vmem:[#allocation2 + $0x18] sm:$0xff] %vm25_vm0, %v276_v30  ;;  %v239_v50 = vld [vmem:[%s367_s3] ss:$0 sm:$0xff] }
   0x5   :  { %258 = vmatpush3.bf16.msra.mxu0 %v266_v28 }
   0x6   :  { %259 = vmatprep.subr.bf16.mxu0 %v267_v29 }
   0x7   :  { %39 = vadd.xlane.f32.xlu0 %v38_v6  ;;  %45 = vadd.xlane.f32.xlu1 %v44_v7 }
   0x8   :  { %v114_v63 = vld [vmem:[#allocation2 + $0x10] sm:$0xff] }
   0x9   :  { %260 = vmatpush3.bf16.msra.mxu0 %v267_v29 }
   0xa   :  { %v113_v7 = vld [vmem:[#allocation2 + $0x8] sm:$0xff] }
   0xb   :  { %v115_v4 = vld [vmem:[#allocation2 + $0x18] sm:$0xff] }
  0x8c   :  { %v37_v8 = vpop.xlane.xlu0 %36  ;;  %v43_v9 = vpop.xlane.xlu1 %42 }
  0x8d   :  { %v48_v10 = vmul.f32 0.03125, %v37_v8  ;;  %v50_v11 = vmul.f32 0.03125, %v43_v9 }
  0x8f   :  { %v52_v12 = vsub.f32 %v30_v0, %v48_v10  ;;  %v54_v13 = vsub.f32 %v32_v1, %v50_v11  ;;  %v112_v1 = vld [vmem:[#allocation2] sm:$0xff] }
  0x90   :  { %v40_v14 = vpop.xlane.xlu0 %39  ;;  %v46_v15 = vpop.xlane.xlu1 %45  ;;  %v244_v11 = vld [vmem:[%s368_s4] ss:$0 sm:$0xff] }
  0x91   :  { %v49_v16 = vmul.f32 0.03125, %v40_v14  ;;  %v51_v17 = vmul.f32 0.03125, %v46_v15  ;;  %v56_v18 = vmul.f32 %v52_v12, %v52_v12  ;;  %v58_v19 = vmul.f32 %v54_v13, %v54_v13 }
  0x93   :  { %v53_v20 = vsub.f32 %v31_v2, %v49_v16  ;;  %v55_v21 = vsub.f32 %v33_v5, %v51_v17  ;;  %v60_v22 = vsel %vm25_vm0, %v56_v18, 0.0  ;;  %v66_v23 = vsel %vm25_vm0, %v58_v19, 0.0 }
  0x94   :  { %61 = vadd.xlane.f32.xlu0 %v60_v22 }
  0x95   :  { %v57_v24 = vmul.f32 %v53_v20, %v53_v20  ;;  %v59_v25 = vmul.f32 %v55_v21, %v55_v21 }
  0x97   :  { %v63_v26 = vsel %vm25_vm0, %v57_v24, 0.0  ;;  %v69_v27 = vsel %vm25_vm0, %v59_v25, 0.0 }
  0x98   :  { %67 = vadd.xlane.f32.xlu0 %v66_v23  ;;  %64 = vadd.xlane.f32.xlu1 %v63_v26 }
  0x9c   :  { %70 = vadd.xlane.f32.xlu1 %v69_v27 }
 0x11d   :  { %v62_v31 = vpop.xlane.xlu0 %61 }
 0x11e   :  { %v72_v32 = vmul.f32 0.03125, %v62_v31 }
 0x120   :  { %v76_v33 = vadd.f32 1e-05, %v72_v32 }
 0x121   :  { %v65_v34 = vpop.xlane.xlu1 %64  ;;  %v68_v35 = vpop.xlane.xlu0 %67 }
 0x122   :  { %268 = vrsqrt.f32 %v76_v33  ;;  %v73_v36 = vmul.f32 0.03125, %v65_v34  ;;  %v74_v37 = vmul.f32 0.03125, %v68_v35 }
 0x124   :  { %v77_v38 = vadd.f32 1e-05, %v73_v36  ;;  %v78_v39 = vadd.f32 1e-05, %v74_v37 }
 0x125   :  { %v71_v40 = vpop.xlane.xlu1 %70 }
 0x126   :  { %270 = vrsqrt.f32 %v77_v38  ;;  %v75_v41 = vmul.f32 0.03125, %v71_v40 }
 0x127   :  { %272 = vrsqrt.f32 %v78_v39 }
 0x128   :  { %v79_v42 = vadd.f32 1e-05, %v75_v41 }
 0x12a   :  { %274 = vrsqrt.f32 %v79_v42 }
 0x12f   :  { %v269_v43 = vpop.eup %268 }
 0x130   :  { %v84_v44 = vmul.f32 %v269_v43, %v52_v12 }
 0x132   :  { %v95_v49 = vmul.f32 %v238_v45, %v84_v44 }
 0x133   :  { %v271_v46 = vpop.eup %270 }
 0x134   :  { %v273_v47 = vpop.eup %272  ;;  %v85_v48 = vmul.f32 %v271_v46, %v53_v20  ;;  %v106_v54 = vadd.f32 %v239_v50, %v95_v49 }
 0x135   :  { %v86_v51 = vmul.f32 %v273_v47, %v54_v13 }
 0x136   :  { %v96_v52 = vmul.f32 %v238_v45, %v85_v48 }
 0x137   :  { %v275_v53 = vpop.eup %274  ;;  %v97_v57 = vmul.f32 %v238_v45, %v86_v51 }
 0x138   :  { %v107_v55 = vadd.f32 %v239_v50, %v96_v52  ;;  %v87_v56 = vmul.f32 %v275_v53, %v55_v21 }
 0x139   :  { %v108_v60 = vadd.f32 %v239_v50, %v97_v57 }
 0x13a   :  { %v110_v58 = vpack.c.bf16 %v107_v55, %v106_v54  ;;  %v98_v59 = vmul.f32 %v238_v45, %v87_v56 }
 0x13c   :  { %261 = vmatprep.mubr.msk.bf16.mxu0 %vm25_vm0, %v110_v58  ;;  %v109_v61 = vadd.f32 %v239_v50, %v98_v59 }
 0x13e   :  { %v111_v62 = vpack.c.bf16 %v109_v61, %v108_v60 }
 0x140   :  { %262 = vmatmul.mubr.msk.bf16.vlgmr.msra.gmra.mxu0 %vm25_vm0, %v111_v62 }
 0x200   :  { %v263_v0 = vpop.f32.mrf.mxu0 }
 0x201   :  { %v189_v2 = vadd.f32 %v263_v0, %v114_v63 }
 0x202   :  { %v172_v3 = vpop.f32.mrf.mxu0 }
 0x203   :  { %193 = vst.msk [vmem:[#allocation2 + $0x10] sm:$0xff] %vm25_vm0, %v189_v2  ;;  %v187_v5 = vadd.f32 %v172_v3, %v112_v1 }
 0x204   :  { %v264_v6 = vpop.f32.mrf.mxu0 }
 0x205   :  { %191 = vst.msk [vmem:[#allocation2] sm:$0xff] %vm25_vm0, %v187_v5  ;;  %v190_v8 = vadd.f32 %v264_v6, %v115_v4 }
 0x206   :  { %v175_v9 = vpop.f32.mrf.mxu0 }
 0x207   :  { %194 = vst.msk [vmem:[#allocation2 + $0x18] sm:$0xff] %vm25_vm0, %v190_v8  ;;  %v188_v10 = vadd.f32 %v175_v9, %v113_v7 }
 0x209   :  { %192 = vst.msk [vmem:[#allocation2 + $0x8] sm:$0xff] %vm25_vm0, %v188_v10 }
 0x20a   :  { %v200_v12 = vld [vmem:[#allocation2 + $0x10] sm:$0xff] }
 0x20b   :  { %v211_v13 = vadd.f32 %v244_v11, %v200_v12 }
 0x20c   :  { %v198_v14 = vld [vmem:[#allocation2] sm:$0xff] }
 0x20d   :  { %v251_v15 = vpack.c.bf16 %v211_v13, %v211_v13  ;;  %v209_v16 = vadd.f32 %v244_v11, %v198_v14 }
 0x20e   :  { %v201_v17 = vld [vmem:[#allocation2 + $0x18] sm:$0xff] }
 0x20f   :  { %232 = vst.msk [vmem:[%s369_s5 + $0x8] sm:$0xf] %vm229_vm1, %v251_v15  ;;  %v249_v18 = vpack.c.bf16 %v209_v16, %v209_v16  ;;  %v212_v19 = vadd.f32 %v244_v11, %v201_v17 }
 0x210   :  { %v199_v20 = vld [vmem:[#allocation2 + $0x8] sm:$0xff] }
 0x211   :  { %230 = vst.msk [vmem:[%s369_s5] sm:$0xf] %vm229_vm1, %v249_v18  ;;  %v252_v21 = vpack.c.bf16 %v212_v19, %v212_v19  ;;  %v210_v22 = vadd.f32 %v244_v11, %v199_v20 }
 0x213   :  { %233 = vst.msk [vmem:[%s369_s5 + $0xc] sm:$0xf] %vm229_vm1, %v252_v21  ;;  %v250_v23 = vpack.c.bf16 %v210_v22, %v210_v22 }
 0x215   :  { %231 = vst.msk [vmem:[%s369_s5 + $0x4] sm:$0xf] %vm229_vm1, %v250_v23 }

// kernel: _lambda_.22
= control target key start
LH: loop header
LB: loop body
LE: loop exit
PB: predicated region body
PF: predicated region fallthrough
CT: control target
= control target key end

     0   :  { %vm22_vm0 = vcmask 261120   ;;  %v183_v1 = vmov 0.0   ;;  %s262_s1 = inlined_call_operand.vmem [shape: bf16[32,32], index: 1, kind: input, shape index: {}]   ;;  %s263_s0 = inlined_call_operand.vmem [shape: bf16[32,32], index: 0, kind: input, shape index: {}]   ;;  %s264_s2 = inlined_call_operand.vmem [shape: f32[1,32], index: 2, kind: input, shape index: {}]   ;;  %s265_s3 = inlined_call_operand.vmem [shape: f32[32,32], index: 3, kind: input, shape index: {}]   ;;  %s266_s4 = inlined_call_operand.vmem [shape: f32[32,32], index: 4, kind: output, shape index: {}]  }
   0x1   :  { %v179_v0 = vld [vmem:[%s262_s1 + $0x8] sm:$0xff]   ;;  %25 = vst.msk [vmem:[#allocation2 + $0x10] sm:$0xff] %vm22_vm0, %v183_v1  ;;  %23 = vst.msk [vmem:[#allocation2] sm:$0xff] %vm22_vm0, %v183_v1  ;;  %v180_v2 = vld [vmem:[%s262_s1] sm:$0xff]  }
   0x2   :  { %24 = vst.msk [vmem:[#allocation2 + $0x8] sm:$0xff] %vm22_vm0, %v183_v1  ;;  %26 = vst.msk [vmem:[#allocation2 + $0x18] sm:$0xff] %vm22_vm0, %v183_v1  ;;  %170 = vmatprep.subr.bf16.mxu0 %v179_v0  ;;  %v181_v3 = vld [vmem:[%s263_s0] sm:$0xff]   ;;  %v182_v4 = vld [vmem:[%s263_s0 + $0x8] sm:$0xff]  }
   0x3   :  { %171 = vmatpush3.bf16.msra.mxu0 %v179_v0  ;;  %174 = vmatprep.mubr.msk.bf16.mxu0 %vm22_vm0, %v181_v3  ;;  %v165_v17 = vld [vmem:[%s264_s2] ss:$0 sm:$0xff]  ;;  %v145_v19 = vld [vmem:[%s265_s3 + $0x10] sm:$0xff]  ;;  %v146_v26 = vld [vmem:[%s265_s3 + $0x18] sm:$0xff] }
   0x4   :  { %172 = vmatprep.subr.bf16.mxu0 %v180_v2  ;;  %v143_v22 = vld [vmem:[%s265_s3] sm:$0xff]  ;;  %v144_v30 = vld [vmem:[%s265_s3 + $0x8] sm:$0xff] }
   0x7   :  { %173 = vmatpush3.bf16.msra.mxu0 %v180_v2 }
   0x8   :  { %v33_v5 = vld [vmem:[#allocation2 + $0x10] sm:$0xff]  ;;  %v31_v7 = vld [vmem:[#allocation2] sm:$0xff] }
   0x9   :  { %v34_v10 = vld [vmem:[#allocation2 + $0x18] sm:$0xff]  ;;  %v32_v13 = vld [vmem:[#allocation2 + $0x8] sm:$0xff] }
   0xa   :  { %175 = vmatmul.mubr.msk.bf16.vlgmr.msra.gmra.mxu0 %vm22_vm0, %v182_v4 }
  0xca   :  { %v176_v6 = vpop.f32.mrf.mxu0 }
  0xcb   :  { %v119_v8 = vadd.f32 %v176_v6, %v33_v5 }
  0xcc   :  { %v102_v9 = vpop.f32.mrf.mxu0 }
  0xcd   :  { %123 = vst.msk [vmem:[#allocation2 + $0x10] sm:$0xff] %vm22_vm0, %v119_v8  ;;  %v117_v11 = vadd.f32 %v102_v9, %v31_v7 }
  0xce   :  { %v177_v12 = vpop.f32.mrf.mxu0 }
  0xcf   :  { %121 = vst.msk [vmem:[#allocation2] sm:$0xff] %vm22_vm0, %v117_v11  ;;  %v120_v14 = vadd.f32 %v177_v12, %v34_v10 }
  0xd0   :  { %v105_v15 = vpop.f32.mrf.mxu0 }
  0xd1   :  { %124 = vst.msk [vmem:[#allocation2 + $0x18] sm:$0xff] %vm22_vm0, %v120_v14  ;;  %v118_v16 = vadd.f32 %v105_v15, %v32_v13 }
  0xd3   :  { %122 = vst.msk [vmem:[#allocation2 + $0x8] sm:$0xff] %vm22_vm0, %v118_v16 }
  0xd4   :  { %v130_v18 = vld [vmem:[#allocation2 + $0x10] sm:$0xff] }
  0xd5   :  { %v141_v20 = vadd.f32 %v165_v17, %v130_v18 }
  0xd6   :  { %v128_v21 = vld [vmem:[#allocation2] sm:$0xff] }
  0xd7   :  { %v149_v23 = vadd.f32 %v145_v19, %v141_v20  ;;  %v139_v24 = vadd.f32 %v165_v17, %v128_v21 }
  0xd8   :  { %v131_v25 = vld [vmem:[#allocation2 + $0x18] sm:$0xff] }
  0xd9   :  { %153 = vst.msk [vmem:[%s266_s4 + $0x10] sm:$0xff] %vm22_vm0, %v149_v23  ;;  %v147_v27 = vadd.f32 %v143_v22, %v139_v24  ;;  %v142_v28 = vadd.f32 %v165_v17, %v131_v25 }
  0xda   :  { %v129_v29 = vld [vmem:[#allocation2 + $0x8] sm:$0xff] }
  0xdb   :  { %151 = vst.msk [vmem:[%s266_s4] sm:$0xff] %vm22_vm0, %v147_v27  ;;  %v150_v31 = vadd.f32 %v146_v26, %v142_v28  ;;  %v140_v32 = vadd.f32 %v165_v17, %v129_v29 }
  0xdd   :  { %154 = vst.msk [vmem:[%s266_s4 + $0x18] sm:$0xff] %vm22_vm0, %v150_v31  ;;  %v148_v33 = vadd.f32 %v144_v30, %v140_v32 }
  0xdf   :  { %152 = vst.msk [vmem:[%s266_s4 + $0x8] sm:$0xff] %vm22_vm0, %v148_v33 }

// kernel: _lambda_.21
= control target key start
LH: loop header
LB: loop body
LE: loop exit
PB: predicated region body
PF: predicated region fallthrough
CT: control target
= control target key end

     0   :  { %s1566_s12 = smov 0   ;;  %s1568_s13 = smov 0   ;;  %s1872_s0 = inlined_call_operand.vmem [shape: bf16[2,16,32], index: 0, kind: input, shape index: {}]   ;;  %s1873_s1 = inlined_call_operand.vmem [shape: bf16[2,16,32], index: 1, kind: input, shape index: {}]   ;;  %s1874_s2 = inlined_call_operand.vmem [shape: bf16[2,16,32], index: 2, kind: input, shape index: {}]   ;;  %s1875_s3 = inlined_call_operand.vmem [shape: bf16[2,16,32], index: 3, kind: output, shape index: {}]  }
   0x1   :  { %s1570_s14 = smov 0  }
   0x2 LB: > { %s32_s15 = sadd.s32 1, %s1530_s13  ;;  %p1313_p0 = scmp.ge.s32.totalorder %s1534_s14, 1  ;;  %s1534_s14 = sphi %s1570_s14, %s13_s14   ;;  %s1530_s13 = sphi %s1568_s13, %s1877_s13   ;;  %s1526_s12 = sphi %s1566_s12, %s1876_s12  }
   0x3   : > { %p34_p1 = scmp.ge.s32.totalorder %s32_s15, 2  ;;  %p199_p2 = scmp.lt.s32.totalorder %s1534_s14, 3 }
   0x5   : > { %s1879_s15 = smov (%p34_p1, %s32_s15), 0  ;;  %p200_p3 = pnand %p1313_p0, %p199_p2 }
   0x6   : > { %p250_p4 = scmp.lt.s32.totalorder (!%p200_p3), %s1526_s12, 1  ;;  %s1540_s23 = smov (!%p200_p3), 120  }
   0x7   : > { %203 = sbr.rel (%p200_p3) target bundleno = 1363 (0x553), region = 32  ;;  %s1541_s27 = smov (!%p200_p3), 112  }
   0x8   : > { %s1542_s28 = smov (!%p200_p3), 104   ;;  %s1543_s29 = smov (!%p200_p3), 8  }
   0x9   : > { %s1544_s30 = smov (!%p200_p3), 16   ;;  %s1545_s4 = smov (!%p200_p3), 24  }
   0xc   : > { %v1536_v0 = vmov 0.0   ;;  %vm1537_vm0 = vmmov 0   ;;  %s1881_s12 = smov (!%p250_p4, %s1526_s12), 1  ;;  %vm330_vm1 = vcmask 64512   ;;  %vm294_vm2 = vcmask 7168  }
   0xd   : > { %1368 = vmatprep.subr.bf16.mxu0 %v1536_v0  ;;  %1370 = vmatprep.mubr.msk.bf16.mxu0 %vm1537_vm0, %v1536_v0  ;;  %s1590_s16 = sshll.u32 %s1881_s12, 3  ;;  %v1538_v4 = vmov -inf   ;;  %303 = vst.msk [vmem:[#allocation3] sm:$0xff] %vm294_vm2, %v1536_v0  ;;  %304 = vst.msk [vmem:[#allocation3 + $0x8] sm:$0xff] %vm294_vm2, %v1536_v0  ;;  %vm382_vm3 = vcmask 130048   ;;  %v1539_v13 = vmov 0  }
   0xe   : > { %1374 = vmatprep.subr.bf16.mxu1 %v1536_v0  ;;  %1376 = vmatprep.mubr.msk.bf16.mxu1 %vm1537_vm0, %v1536_v0  ;;  %s1596_s19 = scalar_lea.vmem %s1873_s1, %s1590_s16  ;;  %s1603_s22 = scalar_lea.vmem %s1872_s0, %s1590_s16  ;;  %295 = vst.msk [vmem:[#allocation2] sm:$0xff] %vm294_vm2, %v1538_v4  ;;  %296 = vst.msk [vmem:[#allocation2 + $0x8] sm:$0xff] %vm294_vm2, %v1538_v4  ;;  %vm311_vm4 = vcmask 261120   ;;  %vm693_vm5 = vcmask 130112   ;;  %vm892_vm6 = vcmask 195712   ;;  %vm1091_vm7 = vcmask 261312  }
   0xf   : > { %v1452_v1 = vld [vmem:[%s1596_s19] sm:$0xff]   ;;  %297 = vst.msk [vmem:[#allocation2 + $0x10] sm:$0xff] %vm294_vm2, %v1538_v4  ;;  %298 = vst.msk [vmem:[#allocation2 + $0x18] sm:$0xff] %vm294_vm2, %v1538_v4  ;;  %1450 = vset.pattern.permute.xlu1 %v1539_v13  ;;  %1451 = vset.pattern.permute.xlu0 %v1539_v13  ;;  %s1664_s26 = scalar_lea.vmem %s1874_s2, %s1590_s16  ;;  %vm1169_vm8 = vcmask 195584   ;;  %vm1180_vm9 = vcmask 257024   ;;  %s287_s7 = scalar_lea.vmem %s1875_s3, %s1590_s16 }
  0x10   : > { %v335_v2 = vsel %vm330_vm1, %v1452_v1, 0  ;;  %v1453_v3 = vld [vmem:[%s1603_s22] sm:$0xff]   ;;  %299 = vst.msk [vmem:[#allocation2 + $0x20] sm:$0xff] %vm294_vm2, %v1538_v4  ;;  %300 = vst.msk [vmem:[#allocation2 + $0x28] sm:$0xff] %vm294_vm2, %v1538_v4 }
  0x11   : > { %1369 = vmatpush3.bf16.xpose.msra.mxu0 %v335_v2  ;;  %301 = vst.msk [vmem:[#allocation2 + $0x30] sm:$0xff] %vm294_vm2, %v1538_v4  ;;  %302 = vst.msk [vmem:[#allocation2 + $0x38] sm:$0xff] %vm294_vm2, %v1538_v4  ;;  %v1454_v14 = vld [vmem:[%s1596_s19] sm:$0xff]  }
  0x12   : > { %1386 = vmatprep.subr.bf16.mxu0 %v1536_v0  ;;  %305 = vst.msk [vmem:[#allocation3 + $0x10] sm:$0xff] %vm294_vm2, %v1536_v0  ;;  %306 = vst.msk [vmem:[#allocation3 + $0x18] sm:$0xff] %vm294_vm2, %v1536_v0  ;;  %v1455_v23 = vld [vmem:[%s1603_s22] sm:$0xff]  }
  0x13   : > { %307 = vst.msk [vmem:[#allocation3 + $0x20] sm:$0xff] %vm294_vm2, %v1536_v0  ;;  %308 = vst.msk [vmem:[#allocation3 + $0x28] sm:$0xff] %vm294_vm2, %v1536_v0  ;;  %v1460_v24 = vld [vmem:[%s1664_s26] sm:$0xff]  }
  0x14   : > { %309 = vst.msk [vmem:[#allocation3 + $0x30] sm:$0xff] %vm294_vm2, %v1536_v0  ;;  %310 = vst.msk [vmem:[#allocation3 + $0x38] sm:$0xff] %vm294_vm2, %v1536_v0  ;;  %1375 = vmatpush3.bf16.msra.mxu1 %v1460_v24  ;;  %v1456_v25 = vld [vmem:[%s1596_s19] sm:$0xff]  }
  0x15   : > { %v1639_v15 = vld [vmem:[#allocation2] sm:$0xff]  ;;  %v1644_v18 = vld [vmem:[#allocation2 + $0x8] sm:$0xff]  ;;  %1380 = vmatprep.subr.bf16.mxu1 %v1536_v0  ;;  %312 = vst.msk [vmem:[#allocation4] sm:$0xff] %vm311_vm4, %v1536_v0  ;;  %313 = vst.msk [vmem:[#allocation4 + $0x8] sm:$0xff] %vm311_vm4, %v1536_v0 }
  0x16   : > { %v1457_v26 = vld [vmem:[%s1603_s22] sm:$0xff]  }
  0x17   : > { %v1458_v27 = vld [vmem:[%s1596_s19] sm:$0xff]  }
  0x18   : > { %1371 = vmatmul.mubr.msk.bf16.vlgmr.msra.gmra.mxu0 %vm330_vm1, %v1453_v3  ;;  %v1459_v28 = vld [vmem:[%s1603_s22] sm:$0xff]  }
  0x19   : > { %1388 = vmatprep.mubr.msk.bf16.mxu0 %vm1537_vm0, %v1536_v0 }
  0xd8   : > { %v371_v5 = vpop.f32.mrf.mxu0 }
  0xd9   : > { %v378_v6 = vmul.f32 0.35355338, %v371_v5 }
  0xda   : > { %v1372_v7 = vpop.f32.mrf.mxu0 }
  0xdb   : > { %v383_v8 = vsel %vm382_vm3, %v378_v6, -inf }
  0xdc   : > { %384 = vmax.xlane.f32.xlu0 %v383_v8  ;;  %v374_v9 = vpop.f32.mrf.mxu0 }
  0xdd   : > { %v379_v10 = vmul.f32 0.35355338, %v374_v9 }
  0xde   : > { %v1373_v11 = vpop.f32.mrf.mxu0 }
  0xdf   : > { %v386_v12 = vsel %vm382_vm3, %v379_v10, -inf }
  0xe0   : > { %387 = vmax.xlane.f32.xlu0 %v386_v12  ;;  %v569_v12 = vld [vmem:[#allocation2 + $0x10] sm:$0xff] }
  0xf6   : > { %517 = vrot.lane.b32.xlu0 %v1454_v14, %s1540_s23 }
 0x165   : > { %v385_v16 = vpop.xlane.xlu0 %384 }
 0x166   : > { %v1642_v17 = vmax.f32 %v1639_v15, %v385_v16  ;;  %v570_v16 = vld [vmem:[#allocation2 + $0x18] sm:$0xff] }
 0x168   : > { %v391_v19 = vsub.f32 %v1639_v15, %v1642_v17  ;;  %497 = vst.msk [vmem:[#allocation2] sm:$0xff] %vm294_vm2, %v1642_v17  ;;  %399 = vperm.xlu1 %1450, %v1642_v17  }
 0x169   : > { %v388_v20 = vpop.xlane.xlu0 %387 }
 0x16a   : > { %v1652_v21 = vmax.f32 %v1644_v18, %v388_v20  ;;  %v1461_v20 = vld [vmem:[%s1664_s26] sm:$0xff]  }
 0x16c   : > { %v392_v22 = vsub.f32 %v1644_v18, %v1652_v21  ;;  %498 = vst.msk [vmem:[#allocation2 + $0x8] sm:$0xff] %vm294_vm2, %v1652_v21  ;;  %404 = vperm.xlu1 %1450, %v1652_v21  }
 0x16d   : > { %v518_v35 = vpop.permute.xlu0 %517 }
 0x16e   : > { %v523_v39 = vsel %vm330_vm1, %v518_v35, 0  ;;  %v1462_v35 = vld [vmem:[%s1664_s26] sm:$0xff]   ;;  %v395_v15 = vmul.f32 1.442695, %v392_v22 }
 0x170   : > { %510 = vrot.lane.b32.xlu1 %v1455_v23, %s1540_s23 }
 0x174   : > { %716 = vrot.lane.b32.xlu1 %v1456_v25, %s1541_s27  ;;  %v1728_v25 = vld [vmem:[#allocation2 + $0x20] sm:$0xff] }
 0x178   : > { %709 = vrot.lane.b32.xlu1 %v1457_v26, %s1541_s27 }
 0x17c   : > { %915 = vrot.lane.b32.xlu1 %v1458_v27, %s1542_s28 }
 0x180   : > { %908 = vrot.lane.b32.xlu1 %v1459_v28, %s1542_s28 }
 0x1e3   : > { %v400_v29 = vpop.permute.xlu1 %399 }
 0x1e4   : > { %v407_v30 = vsub.f32 %v378_v6, %v400_v29  ;;  %v1735_v29 = vld [vmem:[#allocation2 + $0x28] sm:$0xff] }
 0x1e6   : > { %v409_v31 = vmul.f32 1.442695, %v407_v30 }
 0x1e7   : > { %v405_v32 = vpop.permute.xlu1 %404 }
 0x1e8   : > { %v408_v33 = vsub.f32 %v379_v10, %v405_v32  ;;  %1464 = vpow2.f32 %v409_v31 }
 0x1ea   : > { %v411_v34 = vmul.f32 1.442695, %v408_v33  ;;  %v1745_v33 = vld [vmem:[#allocation2 + $0x30] sm:$0xff] }
 0x1eb   : > { %v511_v36 = vpop.permute.xlu1 %510 }
 0x1ec   : > { %1466 = vpow2.f32 %v411_v34 }
 0x1ef   : > { %v717_v41 = vpop.permute.xlu1 %716 }
 0x1f0   : > { %v722_v43 = vsel %vm330_vm1, %v717_v41, 0 }
 0x1f3   : > { %v710_v42 = vpop.permute.xlu1 %709 }
 0x1f5   : > { %v1677_v37 = vpop.eup %1464 }
 0x1f6   : > { %v417_v17 = vsel %vm382_vm3, %v1677_v37, 0.0 }
 0x1f7   : > { %v916_v44 = vpop.permute.xlu1 %915 }
 0x1f8   : > { %v921_v45 = vsel %vm330_vm1, %v916_v44, 0 }
 0x1f9   : > { %v1679_v38 = vpop.eup %1466 }
 0x1fa   : > { %v428_v40 = vpack.c.bf16 %v1679_v38, %v1677_v37 }
 0x1fb   : > { %v909_v46 = vpop.permute.xlu1 %908 }
 0x1fc   : > { %1377 = vmatmul.mubr.msk.bf16.vlgmr.msra.gmra.mxu1 %vm382_vm3, %v428_v40  ;;  %v1756_v40 = vld [vmem:[#allocation2 + $0x38] sm:$0xff] }
 0x1fd   : > { %1381 = vmatpush3.bf16.xpose.msra.mxu1 %v523_v39  ;;  %1382 = vmatprep.mubr.msk.bf16.mxu1 %vm1537_vm0, %v1536_v0 }
 0x1fe   : > { %1392 = vmatprep.subr.bf16.mxu1 %v1536_v0 }
 0x204   : > { %1383 = vmatmul.mubr.msk.bf16.vlgmr.msra.gmra.mxu1 %vm330_vm1, %v511_v36 }
 0x205   : > { %1393 = vmatpush3.bf16.xpose.msra.mxu1 %v722_v43  ;;  %1394 = vmatprep.mubr.msk.bf16.mxu1 %vm1537_vm0, %v1536_v0 }
 0x206   : > { %1404 = vmatprep.subr.bf16.mxu1 %v1536_v0 }
 0x20c   : > { %1395 = vmatmul.mubr.msk.bf16.vlgmr.msra.gmra.mxu1 %vm330_vm1, %v710_v42 }
 0x20d   : > { %1405 = vmatpush3.bf16.xpose.msra.mxu1 %v921_v45  ;;  %1406 = vmatprep.mubr.msk.bf16.mxu1 %vm1537_vm0, %v1536_v0  ;;  %v1463_v45 = vld [vmem:[%s1664_s26] sm:$0xff]  }
 0x214   : > { %1407 = vmatmul.mubr.msk.bf16.vlgmr.msra.gmra.mxu1 %vm330_vm1, %v909_v46  ;;  %v420_v46 = vsel %vm382_vm3, %v1679_v38, 0.0 }
 0x2bc   : > { %v1698_v47 = vpop.f32.mrf.mxu1 }
 0x2be   : > { %v1378_v48 = vpop.f32.mrf.mxu1 }
 0x2bf   : > { %v393_v48 = vmul.f32 1.442695, %v391_v19 }
 0x2c0   : > { %v1700_v49 = vpop.f32.mrf.mxu1 }
 0x2c1   : > { %1468 = vpow2.f32 %v393_v48 }
 0x2c2   : > { %v1379_v50 = vpop.f32.mrf.mxu1 }
 0x2c4   : > { %v559_v51 = vpop.f32.mrf.mxu1 }
 0x2c5   : > { %v1702_v52 = vmul.f32 0.35355338, %v559_v51 }
 0x2c6   : > { %v1384_v53 = vpop.f32.mrf.mxu1 }
 0x2c7   : > { %v571_v54 = vsel %vm382_vm3, %v1702_v52, -inf }
 0x2c8   : > { %572 = vmax.xlane.f32.xlu1 %v571_v54  ;;  %v562_v55 = vpop.f32.mrf.mxu1 }
 0x2c9   : > { %v1706_v56 = vmul.f32 0.35355338, %v562_v55 }
 0x2ca   : > { %v1385_v57 = vpop.f32.mrf.mxu1 }
 0x2cb   : > { %v574_v58 = vsel %vm382_vm3, %v1706_v56, -inf }
 0x2cc   : > { %575 = vmax.xlane.f32.xlu0 %v574_v58  ;;  %v758_v59 = vpop.f32.mrf.mxu1 }
 0x2cd   : > { %v1710_v60 = vmul.f32 0.35355338, %v758_v59 }
 0x2ce   : > { %v1396_v61 = vpop.f32.mrf.mxu1  ;;  %v1781_v53 = vpop.eup %1468 }
 0x2cf   : > { %v770_v62 = vsel %vm382_vm3, %v1710_v60, -inf }
 0x2d0   : > { %771 = vmax.xlane.f32.xlu0 %v770_v62  ;;  %v761_v63 = vpop.f32.mrf.mxu1 }
 0x2d1   : > { %v1714_v1 = vmul.f32 0.35355338, %v761_v63 }
 0x2d2   : > { %v1397_v2 = vpop.f32.mrf.mxu1 }
 0x2d3   : > { %v773_v3 = vsel %vm382_vm3, %v1714_v1, -inf }
 0x2d4   : > { %774 = vmax.xlane.f32.xlu1 %v773_v3  ;;  %v957_v4 = vpop.f32.mrf.mxu1 }
 0x2d5   : > { %v1718_v5 = vmul.f32 0.35355338, %v957_v4 }
 0x2d6   : > { %v1408_v6 = vpop.f32.mrf.mxu1 }
 0x2d7   : > { %v969_v7 = vsel %vm382_vm3, %v1718_v5, -inf }
 0x2d8   : > { %v960_v8 = vpop.f32.mrf.mxu1  ;;  %970 = vmax.xlane.f32.xlu0 %v969_v7 }
 0x2d9   : > { %v1722_v9 = vmul.f32 0.35355338, %v960_v8 }
 0x2da   : > { %v1409_v10 = vpop.f32.mrf.mxu1 }
 0x2db   : > { %v972_v11 = vsel %vm382_vm3, %v1722_v9, -inf }
 0x2dc   : > { %973 = vmax.xlane.f32.xlu1 %v972_v11 }
 0x351   : > { %v573_v13 = vpop.xlane.xlu1 %572 }
 0x352   : > { %v577_v14 = vmax.f32 %v569_v12, %v573_v13 }
 0x354   : > { %696 = vst.msk [vmem:[#allocation2 + $0x10] sm:$0xff] %vm294_vm2, %v577_v14  ;;  %587 = vperm.xlu0 %1451, %v577_v14   ;;  %v579_v50 = vsub.f32 %v569_v12, %v577_v14 }
 0x355   : > { %v576_v23 = vpop.xlane.xlu0 %575 }
 0x356   : > { %v578_v24 = vmax.f32 %v570_v16, %v576_v23  ;;  %v581_v51 = vmul.f32 1.442695, %v579_v50  ;;  %v479_v50 = vld [vmem:[#allocation4] sm:$0xff] }
 0x358   : > { %v580_v26 = vsub.f32 %v570_v16, %v578_v24  ;;  %697 = vst.msk [vmem:[#allocation2 + $0x18] sm:$0xff] %vm294_vm2, %v578_v24  ;;  %1020 = vrot.lane.b32.xlu0 %v1461_v20, %s1542_s28  ;;  %592 = vperm.xlu1 %1450, %v578_v24   ;;  %1470 = vpow2.f32 %v581_v51 }
 0x359   : > { %v772_v27 = vpop.xlane.xlu0 %771  ;;  %1472 = vpow2.f32 %v395_v15 }
 0x35a   : > { %v1733_v28 = vmax.f32 %v1728_v25, %v772_v27  ;;  %v583_v19 = vmul.f32 1.442695, %v580_v26 }
 0x35c   : > { %v778_v30 = vsub.f32 %v1728_v25, %v1733_v28  ;;  %895 = vst.msk [vmem:[#allocation2 + $0x20] sm:$0xff] %vm294_vm2, %v1733_v28  ;;  %786 = vperm.xlu1 %1450, %v1733_v28   ;;  %1474 = vpow2.f32 %v583_v19  ;;  %v603_v25 = vld [vmem:[#allocation3 + $0x18] sm:$0xff] }
 0x35d   : > { %v775_v31 = vpop.xlane.xlu1 %774 }
 0x35e   : > { %v1743_v32 = vmax.f32 %v1735_v29, %v775_v31 }
 0x360   : > { %v779_v34 = vsub.f32 %v1735_v29, %v1743_v32  ;;  %896 = vst.msk [vmem:[#allocation2 + $0x28] sm:$0xff] %vm294_vm2, %v1743_v32  ;;  %791 = vperm.xlu1 %1450, %v1743_v32  }
 0x361   : > { %v971_v36 = vpop.xlane.xlu0 %970 }
 0x362   : > { %v1754_v39 = vmax.f32 %v1745_v33, %v971_v36 }
 0x364   : > { %622 = vrot.lane.b32.xlu1 %v1462_v35, %s1540_s23  ;;  %v977_v41 = vsub.f32 %v1745_v33, %v1754_v39  ;;  %1094 = vst.msk [vmem:[#allocation2 + $0x30] sm:$0xff] %vm294_vm2, %v1754_v39  ;;  %v801_v33 = vld [vmem:[#allocation3 + $0x20] sm:$0xff] }
 0x365   : > { %v974_v42 = vpop.xlane.xlu1 %973  ;;  %v1784_v54 = vpop.eup %1470 }
 0x366   : > { %v1764_v43 = vmax.f32 %v1756_v40, %v974_v42  ;;  %v1792_v38 = vpop.eup %1472  ;;  %v414_v42 = vld [vmem:[#allocation3 + $0x8] sm:$0xff] }
 0x368   : > { %v978_v44 = vsub.f32 %v1756_v40, %v1764_v43  ;;  %1095 = vst.msk [vmem:[#allocation2 + $0x38] sm:$0xff] %vm294_vm2, %v1764_v43  ;;  %985 = vperm.xlu1 %1450, %v1754_v39  }
 0x369   : > { %v1795_v55 = vpop.eup %1474 }
 0x36a   : > { %v981_v29 = vmul.f32 1.442695, %v978_v44 }
 0x36c   : > { %990 = vperm.xlu1 %1450, %v1764_v43  }
 0x370   : > { %821 = vrot.lane.b32.xlu1 %v1463_v45, %s1541_s27  ;;  %v416_v45 = vmul.f32 %v1792_v38, %v414_v42 }
 0x377   : > { %421 = vadd.xlane.f32.xlu0 %v420_v46 }
 0x38d   : > { %483 = vperm.xlu0 %1451, %v1781_v53  }
 0x391   : > { %673 = vperm.xlu0 %1451, %v1784_v54  }
 0x394   : > { %418 = vadd.xlane.f32.xlu1 %v417_v17  ;;  %v413_v17 = vld [vmem:[#allocation3] sm:$0xff] }
 0x395   : > { %v415_v19 = vmul.f32 %v1781_v53, %v413_v17  ;;  %v782_v53 = vmul.f32 1.442695, %v779_v34 }
 0x3a5   : > { %488 = vperm.xlu1 %1450, %v1792_v38  }
 0x3a9   : > { %678 = vperm.xlu1 %1450, %v1795_v55  }
 0x3cf   : > { %v588_v57 = vpop.permute.xlu0 %587 }
 0x3d0   : > { %v595_v58 = vsub.f32 %v1702_v52, %v588_v57 }
 0x3d2   : > { %v597_v18 = vmul.f32 1.442695, %v595_v58 }
 0x3d3   : > { %v593_v21 = vpop.permute.xlu1 %592 }
 0x3d4   : > { %1476 = vpow2.f32 %v597_v18  ;;  %v596_v22 = vsub.f32 %v1706_v56, %v593_v21  ;;  %v480_v18 = vld [vmem:[#allocation4 + $0x8] sm:$0xff] }
 0x3d6   : > { %v599_v37 = vmul.f32 1.442695, %v596_v22 }
 0x3d7   : > { %v787_v59 = vpop.permute.xlu1 %786 }
 0x3d8   : > { %1478 = vpow2.f32 %v599_v37  ;;  %v794_v61 = vsub.f32 %v1710_v60, %v787_v59  ;;  %v602_v59 = vld [vmem:[#allocation3 + $0x10] sm:$0xff] }
 0x3da   : > { %v796_v62 = vmul.f32 1.442695, %v794_v61  ;;  %v979_v61 = vmul.f32 1.442695, %v977_v41 }
 0x3db   : > { %v792_v63 = vpop.permute.xlu1 %791 }
 0x3dc   : > { %1480 = vpow2.f32 %v796_v62  ;;  %v795_v2 = vsub.f32 %v1714_v1, %v792_v63 }
 0x3de   : > { %v798_v3 = vmul.f32 1.442695, %v795_v2 }
 0x3df   : > { %v623_v4 = vpop.permute.xlu1 %622 }
 0x3e0   : > { %1482 = vpow2.f32 %v798_v3  ;;  %1387 = vmatpush3.bf16.msra.mxu0 %v623_v4  ;;  %v802_v3 = vld [vmem:[#allocation3 + $0x28] sm:$0xff] }
 0x3e1   : > { %v1477_v52 = vpop.eup %1476  ;;  %1398 = vmatprep.subr.bf16.mxu0 %v1536_v0 }
 0x3e2   : > { %v606_v6 = vsel %vm382_vm3, %v1477_v52, 0.0 }
 0x3e3   : > { %607 = vadd.xlane.f32.xlu1 %v606_v6  ;;  %v986_v56 = vpop.permute.xlu1 %985 }
 0x3e4   : > { %v993_v7 = vsub.f32 %v1718_v5, %v986_v56 }
 0x3e5   : > { %v1479_v8 = vpop.eup %1478 }
 0x3e6   : > { %v995_v60 = vmul.f32 1.442695, %v993_v7  ;;  %v609_v10 = vsel %vm382_vm3, %v1479_v8, 0.0  ;;  %v616_v11 = vpack.c.bf16 %v1479_v8, %v1477_v52  ;;  %v1000_v52 = vld [vmem:[#allocation3 + $0x30] sm:$0xff]  ;;  %v1001_v8 = vld [vmem:[#allocation3 + $0x38] sm:$0xff] }
 0x3e7   : > { %610 = vadd.xlane.f32.xlu0 %v609_v10  ;;  %v991_v1 = vpop.permute.xlu1 %990 }
 0x3e8   : > { %1484 = vpow2.f32 %v995_v60  ;;  %v994_v12 = vsub.f32 %v1722_v9, %v991_v1  ;;  %1389 = vmatmul.mubr.msk.bf16.vlgmr.msra.gmra.mxu0 %vm382_vm3, %v616_v11  ;;  %v1021_v9 = vpop.permute.xlu0 %1020 }
 0x3e9   : > { %v1481_v13 = vpop.eup %1480  ;;  %1400 = vmatprep.mubr.msk.bf16.mxu0 %vm1537_vm0, %v1536_v0 }
 0x3ea   : > { %v997_v14 = vmul.f32 1.442695, %v994_v12  ;;  %v805_v16 = vsel %vm382_vm3, %v1481_v13, 0.0 }
 0x3eb   : > { %806 = vadd.xlane.f32.xlu1 %v805_v16  ;;  %v822_v5 = vpop.permute.xlu1 %821 }
 0x3ec   : > { %1486 = vpow2.f32 %v997_v14  ;;  %1399 = vmatpush3.bf16.msra.mxu0 %v822_v5 }
 0x3ed   : > { %v1483_v20 = vpop.eup %1482  ;;  %1410 = vmatprep.subr.bf16.mxu0 %v1536_v0 }
 0x3ee   : > { %v808_v23 = vsel %vm382_vm3, %v1483_v20, 0.0  ;;  %v815_v24 = vpack.c.bf16 %v1483_v20, %v1481_v13 }
 0x3ef   : > { %809 = vadd.xlane.f32.xlu0 %v808_v23 }
 0x3f0   : > { %1401 = vmatmul.mubr.msk.bf16.vlgmr.msra.gmra.mxu0 %vm382_vm3, %v815_v24 }
 0x3f1   : > { %1411 = vmatpush3.bf16.msra.mxu0 %v1021_v9  ;;  %1412 = vmatprep.mubr.msk.bf16.mxu0 %vm1537_vm0, %v1536_v0 }
 0x3f5   : > { %v1485_v26 = vpop.eup %1484 }
 0x3f6   : > { %v1004_v27 = vsel %vm382_vm3, %v1485_v26, 0.0 }
 0x3f7   : > { %1005 = vadd.xlane.f32.xlu0 %v1004_v27 }
 0x3f9   : > { %v1487_v31 = vpop.eup %1486 }
 0x3fa   : > { %v1007_v35 = vsel %vm382_vm3, %v1487_v31, 0.0  ;;  %v1014_v36 = vpack.c.bf16 %v1487_v31, %v1485_v26 }
 0x3fb   : > { %1008 = vadd.xlane.f32.xlu1 %v1007_v35 }
 0x3fc   : > { %1413 = vmatmul.mubr.msk.bf16.vlgmr.msra.gmra.mxu0 %vm382_vm3, %v1014_v36 }
 0x400   : > { %v422_v46 = vpop.xlane.xlu0 %421 }
 0x401   : > { %v424_v48 = vadd.f32 %v422_v46, %v416_v45 }
 0x403   : > { %427 = vst.msk [vmem:[#allocation3 + $0x8] sm:$0xff] %vm294_vm2, %v424_v48 }
 0x408   : > { %v484_v0 = vpop.permute.xlu0 %483 }
 0x409   : > { %v491_v51 = vmul.f32 %v484_v0, %v479_v50 }
 0x40a   : > { %v1100_v16 = vld [vmem:[#allocation3 + $0x8] sm:$0xff] }
 0x40b   : > { %v493_v15 = vadd.f32 %v491_v51, %v1698_v47  ;;  %v780_v47 = vmul.f32 1.442695, %v778_v30  ;;  %v605_v30 = vmul.f32 %v1795_v55, %v603_v25 }
 0x40c   : > { %v1839_v62 = vpop.permute.xlu0 %673 }
 0x40d   : > { %495 = vst.msk [vmem:[#allocation4] sm:$0xff] %vm330_vm1, %v493_v15  ;;  %1488 = vpow2.f32 %v780_v47 }
 0x40e   : > { %1490 = vpow2.f32 %v782_v53 }
 0x40f   : > { %1492 = vpow2.f32 %v979_v61 }
 0x410   : > { %1494 = vpow2.f32 %v981_v29 }
 0x41a   : > { %v1489_v32 = vpop.eup %1488 }
 0x41b   : > { %v803_v41 = vmul.f32 %v1489_v32, %v801_v33 }
 0x41d   : > { %v419_v57 = vpop.xlane.xlu1 %418 }
 0x41e   : > { %v423_v58 = vadd.f32 %v419_v57, %v415_v19 }
 0x420   : > { %426 = vst.msk [vmem:[#allocation3] sm:$0xff] %vm294_vm2, %v423_v58 }
 0x421   : > { %v489_v38 = vpop.permute.xlu1 %488 }
 0x422   : > { %v492_v21 = vmul.f32 %v489_v38, %v480_v18 }
 0x424   : > { %v494_v22 = vadd.f32 %v492_v21, %v1700_v49  ;;  %v604_v49 = vmul.f32 %v1784_v54, %v602_v59  ;;  %v1491_v54 = vpop.eup %1490  ;;  %v669_v21 = vld [vmem:[#allocation4] sm:$0xff] }
 0x425   : > { %v1833_v37 = vpop.permute.xlu1 %678  ;;  %v804_v40 = vmul.f32 %v1491_v54, %v802_v3  ;;  %v1493_v55 = vpop.eup %1492 }
 0x426   : > { %496 = vst.msk [vmem:[#allocation4 + $0x8] sm:$0xff] %vm330_vm1, %v494_v22  ;;  %v1002_v6 = vmul.f32 %v1493_v55, %v1000_v52  ;;  %v1495_v56 = vpop.eup %1494  ;;  %v681_v22 = vmul.f32 %v1839_v62, %v669_v21 }
 0x427   : > { %v1003_v10 = vmul.f32 %v1495_v56, %v1001_v8  ;;  %v1099_v13 = vld [vmem:[#allocation3] sm:$0xff] }
 0x428   : > { %1496 = vrcp.f32 %v1099_v13 }
 0x429   : > { %1498 = vrcp.f32 %v1100_v16 }
 0x42d   : > { %v670_v47 = vld [vmem:[#allocation4 + $0x8] sm:$0xff] }
 0x42e   : > { %v682_v61 = vmul.f32 %v1833_v37, %v670_v47 }
 0x435   : > { %v1497_v42 = vpop.eup %1496 }
 0x436   : > { %v1499_v46 = vpop.eup %1498 }
 0x46c   : > { %v608_v63 = vpop.xlane.xlu1 %607 }
 0x46d   : > { %v612_v28 = vadd.f32 %v608_v63, %v604_v49 }
 0x46f   : > { %614 = vst.msk [vmem:[#allocation3 + $0x10] sm:$0xff] %vm294_vm2, %v612_v28 }
 0x470   : > { %v611_v34 = vpop.xlane.xlu0 %610 }
 0x471   : > { %v613_v39 = vadd.f32 %v611_v34, %v605_v30 }
 0x473   : > { %615 = vst.msk [vmem:[#allocation3 + $0x18] sm:$0xff] %vm294_vm2, %v613_v39 }
 0x474   : > { %v807_v2 = vpop.xlane.xlu1 %806 }
 0x475   : > { %v811_v4 = vadd.f32 %v807_v2, %v803_v41 }
 0x476   : > { %v1117_v20 = vld [vmem:[#allocation3 + $0x10] sm:$0xff] }
 0x477   : > { %813 = vst.msk [vmem:[#allocation3 + $0x20] sm:$0xff] %vm294_vm2, %v811_v4  ;;  %1500 = vrcp.f32 %v1117_v20 }
 0x478   : > { %v810_v43 = vpop.xlane.xlu0 %809 }
 0x479   : > { %v812_v44 = vadd.f32 %v810_v43, %v804_v40 }
 0x47a   : > { %v1118_v9 = vld [vmem:[#allocation3 + $0x18] sm:$0xff] }
 0x47b   : > { %814 = vst.msk [vmem:[#allocation3 + $0x28] sm:$0xff] %vm294_vm2, %v812_v44  ;;  %1502 = vrcp.f32 %v1118_v9 }
 0x47e   : > { %v1133_v31 = vld [vmem:[#allocation3 + $0x20] sm:$0xff] }
 0x47f   : > { %1504 = vrcp.f32 %v1133_v31 }
 0x480   : > { %v1006_v7 = vpop.xlane.xlu0 %1005 }
 0x481   : > { %v1010_v60 = vadd.f32 %v1006_v7, %v1002_v6 }
 0x482   : > { %v1134_v36 = vld [vmem:[#allocation3 + $0x28] sm:$0xff] }
 0x483   : > { %1012 = vst.msk [vmem:[#allocation3 + $0x30] sm:$0xff] %vm294_vm2, %v1010_v60  ;;  %1506 = vrcp.f32 %v1134_v36 }
 0x484   : > { %v1009_v11 = vpop.xlane.xlu1 %1008  ;;  %v1501_v48 = vpop.eup %1500 }
 0x485   : > { %v1011_v1 = vadd.f32 %v1009_v11, %v1003_v10 }
 0x487   : > { %1013 = vst.msk [vmem:[#allocation3 + $0x38] sm:$0xff] %vm294_vm2, %v1011_v1 }
 0x488   : > { %v1503_v15 = vpop.eup %1502 }
 0x48a   : > { %v1149_v45 = vld [vmem:[#allocation3 + $0x30] sm:$0xff] }
 0x48b   : > { %1508 = vrcp.f32 %v1149_v45 }
 0x48c   : > { %v1505_v57 = vpop.eup %1504 }
 0x48e   : > { %v1150_v0 = vld [vmem:[#allocation3 + $0x38] sm:$0xff] }
 0x48f   : > { %1510 = vrcp.f32 %v1150_v0 }
 0x490   : > { %v1507_v58 = vpop.eup %1506 }
 0x498   : > { %v1509_v18 = vpop.eup %1508 }
 0x49c   : > { %v1511_v38 = vpop.eup %1510 }
 0x4a8   : > { %v662_v12 = vpop.f32.mrf.mxu0 }
 0x4a9   : > { %685 = vrot.lane.b32.xlu1 %v662_v12, %s1543_s29 }
 0x4aa   : > { %v1390_v14 = vpop.f32.mrf.mxu0 }
 0x4ac   : > { %v665_v5 = vpop.f32.mrf.mxu0 }
 0x4ad   : > { %877 = vperm.xlu1 %1450, %v1491_v54   ;;  %687 = vrot.lane.b32.xlu0 %v665_v5, %s1543_s29 }
 0x4ae   : > { %v1391_v23 = vpop.f32.mrf.mxu0 }
 0x4b0   : > { %v861_v24 = vpop.f32.mrf.mxu0 }
 0x4b1   : > { %1071 = vperm.xlu1 %1450, %v1493_v55   ;;  %872 = vperm.xlu0 %1451, %v1489_v32  }
 0x4b2   : > { %v1402_v26 = vpop.f32.mrf.mxu0 }
 0x4b4   : > { %v864_v27 = vpop.f32.mrf.mxu0 }
 0x4b5   : > { %1076 = vperm.xlu0 %1451, %v1495_v56   ;;  %884 = vrot.lane.b32.xlu1 %v861_v24, %s1544_s30 }
 0x4b6   : > { %v1403_v35 = vpop.f32.mrf.mxu0 }
 0x4b9   : > { %1107 = vperm.xlu1 %1450, %v1497_v42   ;;  %886 = vrot.lane.b32.xlu0 %v864_v27, %s1544_s30 }
 0x4bc   : > { %v1060_v50 = vpop.f32.mrf.mxu0 }
 0x4bd   : > { %1123 = vperm.xlu1 %1450, %v1501_v48   ;;  %1112 = vperm.xlu0 %1451, %v1499_v46  }
 0x4be   : > { %v1414_v51 = vpop.f32.mrf.mxu0 }
 0x4c0   : > { %v1063_v17 = vpop.f32.mrf.mxu0 }
 0x4c1   : > { %1128 = vperm.xlu0 %1451, %v1503_v15   ;;  %1083 = vrot.lane.b32.xlu1 %v1060_v50, %s1545_s4 }
 0x4c2   : > { %v1415_v19 = vpop.f32.mrf.mxu0 }
 0x4c5   : > { %1139 = vperm.xlu1 %1450, %v1505_v57   ;;  %1085 = vrot.lane.b32.xlu0 %v1063_v17, %s1545_s4 }
 0x4c9   : > { %1155 = vperm.xlu1 %1450, %v1509_v18   ;;  %1144 = vperm.xlu0 %1451, %v1507_v58  }
 0x4cd   : > { %1160 = vperm.xlu0 %1451, %v1511_v38  }
 0x51b   : > { %v686_v53 = vpop.permute.xlu1 %685 }
 0x51c   : > { %v691_v59 = vadd.f32 %v686_v53, %v681_v22 }
 0x51e   : > { %694 = vst.msk [vmem:[#allocation4] sm:$0xff] %vm693_vm5, %v691_v59 }
 0x51f   : > { %v688_v49 = vpop.permute.xlu0 %687 }
 0x520   : > { %v692_v63 = vadd.f32 %v688_v49, %v682_v61 }
 0x522   : > { %695 = vst.msk [vmem:[#allocation4 + $0x8] sm:$0xff] %vm693_vm5, %v692_v63 }
 0x525   : > { %v868_v30 = vld [vmem:[#allocation4] sm:$0xff] }
 0x528   : > { %v878_v25 = vpop.permute.xlu1 %877 }
 0x529   : > { %v869_v34 = vld [vmem:[#allocation4 + $0x8] sm:$0xff] }
 0x52a   : > { %v881_v41 = vmul.f32 %v878_v25, %v869_v34 }
 0x52c   : > { %v1072_v28 = vpop.permute.xlu1 %1071  ;;  %v873_v29 = vpop.permute.xlu0 %872 }
 0x52d   : > { %v880_v32 = vmul.f32 %v873_v29, %v868_v30 }
 0x530   : > { %v1077_v33 = vpop.permute.xlu0 %1076  ;;  %v885_v39 = vpop.permute.xlu1 %884 }
 0x531   : > { %v890_v62 = vadd.f32 %v885_v39, %v880_v32 }
 0x533   : > { %893 = vst.msk [vmem:[#allocation4] sm:$0xff] %vm892_vm6, %v890_v62 }
 0x534   : > { %v1108_v54 = vpop.permute.xlu1 %1107  ;;  %v887_v2 = vpop.permute.xlu0 %886 }
 0x535   : > { %v891_v3 = vadd.f32 %v887_v2, %v881_v41 }
 0x537   : > { %894 = vst.msk [vmem:[#allocation4 + $0x8] sm:$0xff] %vm892_vm6, %v891_v3 }
 0x538   : > { %v1124_v37 = vpop.permute.xlu1 %1123  ;;  %v1113_v4 = vpop.permute.xlu0 %1112 }
 0x53a   : > { %v1067_v40 = vld [vmem:[#allocation4] sm:$0xff] }
 0x53b   : > { %v1079_v43 = vmul.f32 %v1072_v28, %v1067_v40 }
 0x53c   : > { %v1129_v44 = vpop.permute.xlu0 %1128  ;;  %v1084_v55 = vpop.permute.xlu1 %1083 }
 0x53d   : > { %v1089_v52 = vadd.f32 %v1084_v55, %v1079_v43 }
 0x53e   : > { %v1068_v6 = vld [vmem:[#allocation4 + $0x8] sm:$0xff] }
 0x53f   : > { %1092 = vst.msk [vmem:[#allocation4] sm:$0xff] %vm1091_vm7, %v1089_v52  ;;  %v1080_v56 = vmul.f32 %v1077_v33, %v1068_v6 }
 0x540   : > { %v1086_v7 = vpop.permute.xlu0 %1085  ;;  %v1140_v60 = vpop.permute.xlu1 %1139 }
 0x541   : > { %v1090_v8 = vadd.f32 %v1086_v7, %v1080_v56 }
 0x543   : > { %1093 = vst.msk [vmem:[#allocation4 + $0x8] sm:$0xff] %vm1091_vm7, %v1090_v8 }
 0x544   : > { %v1145_v11 = vpop.permute.xlu0 %1144  ;;  %v1156_v14 = vpop.permute.xlu1 %1155 }
 0x546   : > { %v1103_v10 = vld [vmem:[#allocation4] sm:$0xff] }
 0x547   : > { %v1115_v1 = vmul.f32 %v1108_v54, %v1103_v10  ;;  %v1131_v12 = vmul.f32 %v1124_v37, %v1103_v10  ;;  %v1147_v13 = vmul.f32 %v1140_v60, %v1103_v10  ;;  %v1163_v5 = vmul.f32 %v1156_v14, %v1103_v10 }
 0x548   : > { %v1161_v35 = vpop.permute.xlu0 %1160 }
 0x549   : > { %v1165_v16 = vsel %vm330_vm1, %v1115_v1, %v1131_v12 }
 0x54a   : > { %v1167_v20 = vsel %vm382_vm3, %v1165_v16, %v1147_v13  ;;  %v1104_v23 = vld [vmem:[#allocation4 + $0x8] sm:$0xff] }
 0x54b   : > { %v1170_v24 = vsel %vm1169_vm8, %v1167_v20, %v1163_v5  ;;  %v1116_v9 = vmul.f32 %v1113_v4, %v1104_v23  ;;  %v1132_v26 = vmul.f32 %v1129_v44, %v1104_v23  ;;  %v1148_v27 = vmul.f32 %v1145_v11, %v1104_v23 }
 0x54c   : > { %v1350_v31 = vpack.c.bf16 %v1170_v24, %v1170_v24  ;;  %v1164_v42 = vmul.f32 %v1161_v35, %v1104_v23 }
 0x54d   : > { %v1166_v36 = vsel %vm330_vm1, %v1116_v9, %v1132_v26 }
 0x54e   : > { %1181 = vst.msk [vmem:[%s287_s7] sm:$0xf] %vm1180_vm9, %v1350_v31  ;;  %v1168_v45 = vsel %vm382_vm3, %v1166_v36, %v1148_v27 }
 0x54f   : > { %v1171_v46 = vsel %vm1169_vm8, %v1168_v45, %v1164_v42 }
 0x550   : > { %v1351_v48 = vpack.c.bf16 %v1171_v46, %v1171_v46 }
 0x552   : > { %1182 = vst.msk [vmem:[%s287_s7 + $0x4] sm:$0xf] %vm1180_vm9, %v1351_v48 }
 0x553 PF: > { %s13_s14 = sadd.s32 1, %s1534_s14   ;;  %s1876_s12 = smov %s1530_s13 }
 0x554   : > { %p10_p5 = scmp.ge.s32.totalorder %s13_s14, 4   ;;  %s1877_s13 = smov %s1879_s15 }
 0x556   :  { %12 = sbr.rel (!%p10_p5) target bundleno = 2 (0x2), region = 82 }

// kernel: _lambda_.24
= control target key start
LH: loop header
LB: loop body
LE: loop exit
PB: predicated region body
PF: predicated region fallthrough
CT: control target
= control target key end

     0   :  { %vm22_vm0 = vcmask 261120   ;;  %v255_v1 = vmov 0.0   ;;  %s350_s1 = inlined_call_operand.vmem [shape: bf16[128,32], index: 1, kind: input, shape index: {}]   ;;  %s351_s0 = inlined_call_operand.vmem [shape: bf16[32,128], index: 0, kind: input, shape index: {}]   ;;  %s352_s2 = inlined_call_operand.vmem [shape: f32[1,32], index: 2, kind: input, shape index: {}]   ;;  %s353_s3 = inlined_call_operand.vmem [shape: f32[32,32], index: 3, kind: input, shape index: {}]   ;;  %s354_s4 = inlined_call_operand.vmem [shape: f32[32,32], index: 4, kind: output, shape index: {}]  }
   0x1   :  { %v245_v0 = vld [vmem:[%s350_s1 + $0x38] sm:$0xff]   ;;  %25 = vst.msk [vmem:[#allocation2 + $0x10] sm:$0xff] %vm22_vm0, %v255_v1  ;;  %23 = vst.msk [vmem:[#allocation2] sm:$0xff] %vm22_vm0, %v255_v1  ;;  %v246_v2 = vld [vmem:[%s350_s1 + $0x30] sm:$0xff]  }
   0x2   :  { %24 = vst.msk [vmem:[#allocation2 + $0x8] sm:$0xff] %vm22_vm0, %v255_v1  ;;  %26 = vst.msk [vmem:[#allocation2 + $0x18] sm:$0xff] %vm22_vm0, %v255_v1  ;;  %224 = vmatprep.subr.bf16.mxu0 %v245_v0  ;;  %v247_v3 = vld [vmem:[%s350_s1 + $0x28] sm:$0xff]   ;;  %v248_v4 = vld [vmem:[%s350_s1 + $0x20] sm:$0xff]  }
   0x3   :  { %225 = vmatpush3.bf16.msra.mxu0 %v245_v0  ;;  %v253_v5 = vld [vmem:[%s351_s0] sm:$0xff]   ;;  %v249_v6 = vld [vmem:[%s350_s1 + $0x18] sm:$0xff]   ;;  %v250_v7 = vld [vmem:[%s350_s1 + $0x10] sm:$0xff]  }
   0x4   :  { %226 = vmatprep.subr.bf16.mxu0 %v246_v2  ;;  %240 = vmatprep.mubr.bf16.mxu0 %v253_v5  ;;  %v251_v8 = vld [vmem:[%s350_s1 + $0x8] sm:$0xff]   ;;  %v252_v9 = vld [vmem:[%s350_s1] sm:$0xff]   ;;  %v189_v25 = vld [vmem:[%s353_s3 + $0x10] sm:$0xff] }
   0x5   :  { %v254_v10 = vld [vmem:[%s351_s0 + $0x8] sm:$0xff]   ;;  %v213_v23 = vld [vmem:[%s352_s2] ss:$0 sm:$0xff]  ;;  %v190_v32 = vld [vmem:[%s353_s3 + $0x18] sm:$0xff] }
   0x6   :  { %v187_v28 = vld [vmem:[%s353_s3] sm:$0xff]  ;;  %v188_v36 = vld [vmem:[%s353_s3 + $0x8] sm:$0xff] }
   0x7   :  { %227 = vmatpush3.bf16.msra.mxu0 %v246_v2 }
   0x8   :  { %228 = vmatprep.subr.bf16.mxu0 %v247_v3  ;;  %v33_v11 = vld [vmem:[#allocation2 + $0x10] sm:$0xff]  ;;  %v31_v13 = vld [vmem:[#allocation2] sm:$0xff] }
   0x9   :  { %v34_v16 = vld [vmem:[#allocation2 + $0x18] sm:$0xff]  ;;  %v32_v19 = vld [vmem:[#allocation2 + $0x8] sm:$0xff] }
   0xb   :  { %229 = vmatpush3.bf16.msra.mxu0 %v247_v3 }
   0xc   :  { %230 = vmatprep.subr.bf16.mxu0 %v248_v4 }
   0xf   :  { %231 = vmatpush3.bf16.msra.mxu0 %v248_v4 }
  0x10   :  { %232 = vmatprep.subr.bf16.mxu0 %v249_v6 }
  0x13   :  { %233 = vmatpush3.bf16.msra.mxu0 %v249_v6 }
  0x14   :  { %234 = vmatprep.subr.bf16.mxu0 %v250_v7 }
  0x17   :  { %235 = vmatpush3.bf16.msra.mxu0 %v250_v7 }
  0x18   :  { %236 = vmatprep.subr.bf16.mxu0 %v251_v8 }
  0x1b   :  { %237 = vmatpush3.bf16.msra.mxu0 %v251_v8 }
  0x1c   :  { %238 = vmatprep.subr.bf16.mxu0 %v252_v9 }
  0x1f   :  { %239 = vmatpush3.bf16.msra.mxu0 %v252_v9 }
  0x22   :  { %241 = vmatmul.mubr.bf16.vlgmr.msra.gmra.mxu0 %v254_v10 }
  0xe2   :  { %v242_v12 = vpop.f32.mrf.mxu0 }
  0xe3   :  { %v162_v14 = vadd.f32 %v242_v12, %v33_v11 }
  0xe4   :  { %v145_v15 = vpop.f32.mrf.mxu0 }
  0xe5   :  { %167 = vst.msk [vmem:[#allocation2 + $0x10] sm:$0xff] %vm22_vm0, %v162_v14  ;;  %v160_v17 = vadd.f32 %v145_v15, %v31_v13 }
  0xe6   :  { %v243_v18 = vpop.f32.mrf.mxu0 }
  0xe7   :  { %165 = vst.msk [vmem:[#allocation2] sm:$0xff] %vm22_vm0, %v160_v17  ;;  %v163_v20 = vadd.f32 %v243_v18, %v34_v16 }
  0xe8   :  { %v148_v21 = vpop.f32.mrf.mxu0 }
  0xe9   :  { %168 = vst.msk [vmem:[#allocation2 + $0x18] sm:$0xff] %vm22_vm0, %v163_v20  ;;  %v161_v22 = vadd.f32 %v148_v21, %v32_v19 }
  0xeb   :  { %166 = vst.msk [vmem:[#allocation2 + $0x8] sm:$0xff] %vm22_vm0, %v161_v22 }
  0xec   :  { %v174_v24 = vld [vmem:[#allocation2 + $0x10] sm:$0xff] }
  0xed   :  { %v185_v26 = vadd.f32 %v213_v23, %v174_v24 }
  0xee   :  { %v172_v27 = vld [vmem:[#allocation2] sm:$0xff] }
  0xef   :  { %v193_v29 = vadd.f32 %v189_v25, %v185_v26  ;;  %v183_v30 = vadd.f32 %v213_v23, %v172_v27 }
  0xf0   :  { %v175_v31 = vld [vmem:[#allocation2 + $0x18] sm:$0xff] }
  0xf1   :  { %197 = vst.msk [vmem:[%s354_s4 + $0x10] sm:$0xff] %vm22_vm0, %v193_v29  ;;  %v191_v33 = vadd.f32 %v187_v28, %v183_v30  ;;  %v186_v34 = vadd.f32 %v213_v23, %v175_v31 }
  0xf2   :  { %v173_v35 = vld [vmem:[#allocation2 + $0x8] sm:$0xff] }
  0xf3   :  { %195 = vst.msk [vmem:[%s354_s4] sm:$0xff] %vm22_vm0, %v191_v33  ;;  %v194_v37 = vadd.f32 %v190_v32, %v186_v34  ;;  %v184_v38 = vadd.f32 %v213_v23, %v173_v35 }
  0xf5   :  { %198 = vst.msk [vmem:[%s354_s4 + $0x18] sm:$0xff] %vm22_vm0, %v194_v37  ;;  %v192_v39 = vadd.f32 %v188_v36, %v184_v38 }
  0xf7   :  { %196 = vst.msk [vmem:[%s354_s4 + $0x8] sm:$0xff] %vm22_vm0, %v192_v39 }

// kernel: _lambda_.32
= control target key start
LH: loop header
LB: loop body
LE: loop exit
PB: predicated region body
PF: predicated region fallthrough
CT: control target
= control target key end

     0   :  { %vm22_vm0 = vcmask 130048   ;;  %v262_v1 = vmov 0.0   ;;  %vm53_vm1 = vcmask 261120   ;;  %vm216_vm2 = vcmask 125952   ;;  %s344_s1 = inlined_call_operand.vmem [shape: bf16[32,16], index: 1, kind: input, shape index: {}]   ;;  %s345_s0 = inlined_call_operand.vmem [shape: f32[32,32], index: 0, kind: input, shape index: {}]   ;;  %s346_s2 = inlined_call_operand.vmem [shape: f32[1,16], index: 2, kind: input, shape index: {}]   ;;  %s347_s3 = inlined_call_operand.vmem [shape: f32[1,16], index: 3, kind: input, shape index: {}]   ;;  %s348_s4 = inlined_call_operand.vmem [shape: bf16[32,16], index: 4, kind: output, shape index: {}]  }
   0x1   :  { %v252_v0 = vld [vmem:[%s344_s1 + $0x8] sm:$0xff]   ;;  %25 = vst.msk [vmem:[#allocation2 + $0x10] sm:$0xff] %vm22_vm0, %v262_v1  ;;  %23 = vst.msk [vmem:[#allocation2] sm:$0xff] %vm22_vm0, %v262_v1  ;;  %v253_v2 = vld [vmem:[%s344_s1] sm:$0xff]  }
   0x2   :  { %24 = vst.msk [vmem:[#allocation2 + $0x8] sm:$0xff] %vm22_vm0, %v262_v1  ;;  %26 = vst.msk [vmem:[#allocation2 + $0x18] sm:$0xff] %vm22_vm0, %v262_v1  ;;  %243 = vmatprep.subr.bf16.mxu0 %v252_v0  ;;  %v27_v3 = vld [vmem:[%s345_s0] sm:$0xff]  ;;  %v28_v4 = vld [vmem:[%s345_s0 + $0x8] sm:$0xff] }
   0x3   :  { %244 = vmatpush3.bf16.msra.mxu0 %v252_v0  ;;  %v31_v5 = vpack.c.bf16 %v28_v4, %v27_v3  ;;  %v29_v6 = vld [vmem:[%s345_s0 + $0x10] sm:$0xff]  ;;  %v30_v7 = vld [vmem:[%s345_s0 + $0x18] sm:$0xff]  ;;  %v229_v62 = vld [vmem:[%s346_s2] ss:$0 sm:$0xff] }
   0x4   :  { %245 = vmatprep.subr.bf16.mxu0 %v253_v2  ;;  %v32_v8 = vpack.c.bf16 %v30_v7, %v29_v6  ;;  %v230_v0 = vld [vmem:[%s347_s3] ss:$0 sm:$0xff] }
   0x5   :  { %247 = vmatprep.mubr.msk.bf16.mxu0 %vm53_vm1, %v31_v5 }
   0x7   :  { %246 = vmatpush3.bf16.msra.mxu0 %v253_v2 }
   0x8   :  { %v35_v9 = vld [vmem:[#allocation2 + $0x10] sm:$0xff]  ;;  %v33_v11 = vld [vmem:[#allocation2] sm:$0xff] }
   0x9   :  { %v36_v14 = vld [vmem:[#allocation2 + $0x18] sm:$0xff]  ;;  %v34_v17 = vld [vmem:[#allocation2 + $0x8] sm:$0xff] }
   0xa   :  { %248 = vmatmul.mubr.msk.bf16.vlgmr.msra.gmra.mxu0 %vm53_vm1, %v32_v8 }
  0xca   :  { %v249_v10 = vpop.f32.mrf.mxu0 }
  0xcb   :  { %v111_v12 = vadd.f32 %v249_v10, %v35_v9 }
  0xcc   :  { %v94_v13 = vpop.f32.mrf.mxu0 }
  0xcd   :  { %116 = vst.msk [vmem:[#allocation2 + $0x10] sm:$0xff] %vm22_vm0, %v111_v12  ;;  %v109_v15 = vadd.f32 %v94_v13, %v33_v11 }
  0xce   :  { %v250_v16 = vpop.f32.mrf.mxu0 }
  0xcf   :  { %114 = vst.msk [vmem:[#allocation2] sm:$0xff] %vm22_vm0, %v109_v15  ;;  %v112_v18 = vadd.f32 %v250_v16, %v36_v14 }
  0xd0   :  { %v97_v19 = vpop.f32.mrf.mxu0 }
  0xd1   :  { %117 = vst.msk [vmem:[#allocation2 + $0x18] sm:$0xff] %vm22_vm0, %v112_v18  ;;  %v110_v20 = vadd.f32 %v97_v19, %v34_v17 }
  0xd3   :  { %115 = vst.msk [vmem:[#allocation2 + $0x8] sm:$0xff] %vm22_vm0, %v110_v20 }
  0xd4   :  { %v123_v21 = vld [vmem:[#allocation2 + $0x10] sm:$0xff] }
  0xd5   :  { %v131_v22 = vsel %vm22_vm0, %v123_v21, 0.0 }
  0xd6   :  { %132 = vadd.xlane.f32.xlu1 %v131_v22  ;;  %v121_v23 = vld [vmem:[#allocation2] sm:$0xff] }
  0xd7   :  { %v125_v24 = vsel %vm22_vm0, %v121_v23, 0.0 }
  0xd8   :  { %126 = vadd.xlane.f32.xlu0 %v125_v24  ;;  %v124_v25 = vld [vmem:[#allocation2 + $0x18] sm:$0xff] }
  0xd9   :  { %v134_v26 = vsel %vm22_vm0, %v124_v25, 0.0 }
  0xda   :  { %135 = vadd.xlane.f32.xlu1 %v134_v26  ;;  %v122_v27 = vld [vmem:[#allocation2 + $0x8] sm:$0xff] }
  0xdb   :  { %v128_v28 = vsel %vm22_vm0, %v122_v27, 0.0 }
  0xdc   :  { %129 = vadd.xlane.f32.xlu0 %v128_v28 }
 0x15f   :  { %v133_v29 = vpop.xlane.xlu1 %132 }
 0x160   :  { %v140_v30 = vmul.f32 0.0625, %v133_v29 }
 0x161   :  { %v127_v31 = vpop.xlane.xlu0 %126 }
 0x162   :  { %v138_v32 = vmul.f32 0.0625, %v127_v31  ;;  %v144_v34 = vsub.f32 %v123_v21, %v140_v30 }
 0x163   :  { %v136_v33 = vpop.xlane.xlu1 %135 }
 0x164   :  { %v142_v35 = vsub.f32 %v121_v23, %v138_v32  ;;  %v141_v36 = vmul.f32 0.0625, %v136_v33  ;;  %v148_v43 = vmul.f32 %v144_v34, %v144_v34 }
 0x165   :  { %v130_v37 = vpop.xlane.xlu0 %129 }
 0x166   :  { %v139_v38 = vmul.f32 0.0625, %v130_v37  ;;  %v146_v39 = vmul.f32 %v142_v35, %v142_v35  ;;  %v145_v40 = vsub.f32 %v124_v25, %v141_v36  ;;  %v156_v45 = vsel %vm22_vm0, %v148_v43, 0.0 }
 0x168   :  { %v143_v41 = vsub.f32 %v122_v27, %v139_v38  ;;  %v150_v42 = vsel %vm22_vm0, %v146_v39, 0.0  ;;  %v149_v47 = vmul.f32 %v145_v40, %v145_v40 }
 0x169   :  { %151 = vadd.xlane.f32.xlu0 %v150_v42 }
 0x16a   :  { %v147_v44 = vmul.f32 %v143_v41, %v143_v41  ;;  %v159_v48 = vsel %vm22_vm0, %v149_v47, 0.0 }
 0x16c   :  { %v153_v46 = vsel %vm22_vm0, %v147_v44, 0.0 }
 0x16d   :  { %157 = vadd.xlane.f32.xlu0 %v156_v45  ;;  %154 = vadd.xlane.f32.xlu1 %v153_v46 }
 0x171   :  { %160 = vadd.xlane.f32.xlu1 %v159_v48 }
 0x1f2   :  { %v152_v49 = vpop.xlane.xlu0 %151 }
 0x1f3   :  { %v162_v50 = vmul.f32 0.0625, %v152_v49 }
 0x1f5   :  { %v166_v51 = vadd.f32 1e-06, %v162_v50 }
 0x1f6   :  { %v155_v52 = vpop.xlane.xlu1 %154  ;;  %v158_v53 = vpop.xlane.xlu0 %157 }
 0x1f7   :  { %254 = vrsqrt.f32 %v166_v51  ;;  %v163_v54 = vmul.f32 0.0625, %v155_v52  ;;  %v164_v55 = vmul.f32 0.0625, %v158_v53 }
 0x1f9   :  { %v167_v56 = vadd.f32 1e-06, %v163_v54  ;;  %v168_v57 = vadd.f32 1e-06, %v164_v55 }
 0x1fa   :  { %v161_v58 = vpop.xlane.xlu1 %160 }
 0x1fb   :  { %256 = vrsqrt.f32 %v167_v56  ;;  %v165_v59 = vmul.f32 0.0625, %v161_v58 }
 0x1fc   :  { %258 = vrsqrt.f32 %v168_v57 }
 0x1fd   :  { %v169_v60 = vadd.f32 1e-06, %v165_v59 }
 0x1ff   :  { %260 = vrsqrt.f32 %v169_v60 }
 0x204   :  { %v255_v61 = vpop.eup %254 }
 0x205   :  { %v174_v63 = vmul.f32 %v255_v61, %v142_v35 }
 0x207   :  { %v185_v1 = vmul.f32 %v229_v62, %v174_v63 }
 0x208   :  { %v257_v2 = vpop.eup %256 }
 0x209   :  { %v259_v3 = vpop.eup %258  ;;  %v196_v4 = vadd.f32 %v230_v0, %v185_v1  ;;  %v175_v5 = vmul.f32 %v257_v2, %v143_v41 }
 0x20a   :  { %v176_v6 = vmul.f32 %v259_v3, %v144_v34 }
 0x20b   :  { %v235_v7 = vpack.c.bf16 %v196_v4, %v196_v4  ;;  %v186_v8 = vmul.f32 %v229_v62, %v175_v5 }
 0x20c   :  { %v261_v9 = vpop.eup %260  ;;  %v187_v10 = vmul.f32 %v229_v62, %v176_v6 }
 0x20d   :  { %217 = vst.msk [vmem:[%s348_s4] sm:$0xf] %vm216_vm2, %v235_v7  ;;  %v197_v11 = vadd.f32 %v230_v0, %v186_v8  ;;  %v177_v12 = vmul.f32 %v261_v9, %v145_v40 }
 0x20e   :  { %v198_v13 = vadd.f32 %v230_v0, %v187_v10 }
 0x20f   :  { %v236_v14 = vpack.c.bf16 %v197_v11, %v197_v11  ;;  %v188_v15 = vmul.f32 %v229_v62, %v177_v12 }
 0x210   :  { %v237_v16 = vpack.c.bf16 %v198_v13, %v198_v13 }
 0x211   :  { %218 = vst.msk [vmem:[%s348_s4 + $0x4] sm:$0xf] %vm216_vm2, %v236_v14  ;;  %v199_v17 = vadd.f32 %v230_v0, %v188_v15 }
 0x212   :  { %219 = vst.msk [vmem:[%s348_s4 + $0x8] sm:$0xf] %vm216_vm2, %v237_v16 }
 0x213   :  { %v238_v18 = vpack.c.bf16 %v199_v17, %v199_v17 }
 0x215   :  { %220 = vst.msk [vmem:[%s348_s4 + $0xc] sm:$0xf] %vm216_vm2, %v238_v18 }

// kernel: _lambda_.23
= control target key start
LH: loop header
LB: loop body
LE: loop exit
PB: predicated region body
PF: predicated region fallthrough
CT: control target
= control target key end

     0   :  { %vm33_vm0 = vcmask 261120   ;;  %s401_s0 = inlined_call_operand.vmem [shape: f32[32,32], index: 0, kind: input, shape index: {}]   ;;  %s402_s1 = inlined_call_operand.vmem [shape: bf16[32,128], index: 1, kind: input, shape index: {}]   ;;  %s403_s2 = inlined_call_operand.vmem [shape: f32[1,32], index: 2, kind: input, shape index: {}]   ;;  %s404_s3 = inlined_call_operand.vmem [shape: f32[1,32], index: 3, kind: input, shape index: {}]   ;;  %s405_s4 = inlined_call_operand.vmem [shape: f32[1,128], index: 4, kind: input, shape index: {}]   ;;  %s406_s5 = inlined_call_operand.vmem [shape: bf16[32,128], index: 5, kind: output, shape index: {}]  }
   0x1   :  { %v29_v0 = vld [vmem:[%s401_s0] sm:$0xff]  ;;  %v31_v1 = vld [vmem:[%s401_s0 + $0x10] sm:$0xff]  ;;  %v30_v2 = vld [vmem:[%s401_s0 + $0x8] sm:$0xff] }
   0x2   :  { %v34_v3 = vsel %vm33_vm0, %v29_v0, 0.0  ;;  %v40_v4 = vsel %vm33_vm0, %v31_v1, 0.0  ;;  %v32_v5 = vld [vmem:[%s401_s0 + $0x18] sm:$0xff]  ;;  %v37_v6 = vsel %vm33_vm0, %v30_v2, 0.0  ;;  %v310_v28 = vld [vmem:[%s402_s1 + $0x8] sm:$0xff]   ;;  %v311_v29 = vld [vmem:[%s402_s1] sm:$0xff]  }
   0x3   :  { %35 = vadd.xlane.f32.xlu0 %v34_v3  ;;  %41 = vadd.xlane.f32.xlu1 %v40_v4  ;;  %v43_v7 = vsel %vm33_vm0, %v32_v5, 0.0  ;;  %v272_v44 = vld [vmem:[%s403_s2] ss:$0 sm:$0xff] }
   0x4   :  { %302 = vmatprep.subr.bf16.mxu0 %v310_v28  ;;  %v273_v49 = vld [vmem:[%s404_s3] ss:$0 sm:$0xff] }
   0x5   :  { %303 = vmatpush3.bf16.msra.mxu0 %v310_v28  ;;  %v278_v62 = vld [vmem:[%s405_s4] ss:$0 sm:$0xff] }
   0x6   :  { %304 = vmatprep.subr.bf16.mxu0 %v311_v29 }
   0x7   :  { %38 = vadd.xlane.f32.xlu0 %v37_v6  ;;  %44 = vadd.xlane.f32.xlu1 %v43_v7 }
   0x9   :  { %305 = vmatpush3.bf16.msra.mxu0 %v311_v29 }
  0x8c   :  { %v36_v8 = vpop.xlane.xlu0 %35  ;;  %v42_v9 = vpop.xlane.xlu1 %41 }
  0x8d   :  { %v47_v10 = vmul.f32 0.03125, %v36_v8  ;;  %v49_v11 = vmul.f32 0.03125, %v42_v9 }
  0x8f   :  { %v51_v12 = vsub.f32 %v29_v0, %v47_v10  ;;  %v53_v13 = vsub.f32 %v31_v1, %v49_v11 }
  0x90   :  { %v39_v14 = vpop.xlane.xlu0 %38  ;;  %v45_v15 = vpop.xlane.xlu1 %44 }
  0x91   :  { %v48_v16 = vmul.f32 0.03125, %v39_v14  ;;  %v50_v17 = vmul.f32 0.03125, %v45_v15  ;;  %v55_v18 = vmul.f32 %v51_v12, %v51_v12  ;;  %v57_v19 = vmul.f32 %v53_v13, %v53_v13 }
  0x93   :  { %v52_v20 = vsub.f32 %v30_v2, %v48_v16  ;;  %v54_v21 = vsub.f32 %v32_v5, %v50_v17  ;;  %v59_v22 = vsel %vm33_vm0, %v55_v18, 0.0  ;;  %v65_v23 = vsel %vm33_vm0, %v57_v19, 0.0 }
  0x94   :  { %60 = vadd.xlane.f32.xlu0 %v59_v22 }
  0x95   :  { %v56_v24 = vmul.f32 %v52_v20, %v52_v20  ;;  %v58_v25 = vmul.f32 %v54_v21, %v54_v21 }
  0x97   :  { %v62_v26 = vsel %vm33_vm0, %v56_v24, 0.0  ;;  %v68_v27 = vsel %vm33_vm0, %v58_v25, 0.0 }
  0x98   :  { %66 = vadd.xlane.f32.xlu0 %v65_v23  ;;  %63 = vadd.xlane.f32.xlu1 %v62_v26 }
  0x9c   :  { %69 = vadd.xlane.f32.xlu1 %v68_v27 }
 0x11d   :  { %v61_v30 = vpop.xlane.xlu0 %60 }
 0x11e   :  { %v71_v31 = vmul.f32 0.03125, %v61_v30 }
 0x120   :  { %v75_v32 = vadd.f32 1e-05, %v71_v31 }
 0x121   :  { %v64_v33 = vpop.xlane.xlu1 %63  ;;  %v67_v34 = vpop.xlane.xlu0 %66 }
 0x122   :  { %312 = vrsqrt.f32 %v75_v32  ;;  %v72_v35 = vmul.f32 0.03125, %v64_v33  ;;  %v73_v36 = vmul.f32 0.03125, %v67_v34 }
 0x124   :  { %v76_v37 = vadd.f32 1e-05, %v72_v35  ;;  %v77_v38 = vadd.f32 1e-05, %v73_v36 }
 0x125   :  { %v70_v39 = vpop.xlane.xlu1 %69 }
 0x126   :  { %314 = vrsqrt.f32 %v76_v37  ;;  %v74_v40 = vmul.f32 0.03125, %v70_v39 }
 0x127   :  { %316 = vrsqrt.f32 %v77_v38 }
 0x128   :  { %v78_v41 = vadd.f32 1e-05, %v74_v40 }
 0x12a   :  { %318 = vrsqrt.f32 %v78_v41 }
 0x12f   :  { %v313_v42 = vpop.eup %312 }
 0x130   :  { %v83_v43 = vmul.f32 %v313_v42, %v51_v12 }
 0x132   :  { %v94_v48 = vmul.f32 %v272_v44, %v83_v43 }
 0x133   :  { %v315_v45 = vpop.eup %314 }
 0x134   :  { %v317_v46 = vpop.eup %316  ;;  %v84_v47 = vmul.f32 %v315_v45, %v52_v20  ;;  %v105_v53 = vadd.f32 %v273_v49, %v94_v48 }
 0x135   :  { %v85_v50 = vmul.f32 %v317_v46, %v53_v13 }
 0x136   :  { %v95_v51 = vmul.f32 %v272_v44, %v84_v47 }
 0x137   :  { %v319_v52 = vpop.eup %318  ;;  %v96_v56 = vmul.f32 %v272_v44, %v85_v50 }
 0x138   :  { %v106_v54 = vadd.f32 %v273_v49, %v95_v51  ;;  %v86_v55 = vmul.f32 %v319_v52, %v54_v21 }
 0x139   :  { %v107_v59 = vadd.f32 %v273_v49, %v96_v56 }
 0x13a   :  { %v109_v57 = vpack.c.bf16 %v106_v54, %v105_v53  ;;  %v97_v58 = vmul.f32 %v272_v44, %v86_v55 }
 0x13c   :  { %306 = vmatprep.mubr.msk.bf16.mxu0 %vm33_vm0, %v109_v57  ;;  %v108_v60 = vadd.f32 %v273_v49, %v97_v58 }
 0x13e   :  { %v110_v61 = vpack.c.bf16 %v108_v60, %v107_v59 }
 0x140   :  { %307 = vmatmul.mubr.msk.bf16.vlgmr.msra.gmra.mxu0 %vm33_vm0, %v110_v61 }
 0x200   :  { %v308_v63 = vpop.f32.mrf.mxu0 }
 0x201   :  { %v210_v0 = vadd.f32 %v308_v63, %v278_v62 }
 0x202   :  { %v171_v1 = vpop.f32.mrf.mxu0 }
 0x203   :  { %v218_v2 = vmul.f32 0.044715, %v210_v0  ;;  %v208_v3 = vadd.f32 %v278_v62, %v171_v1  ;;  %v214_v31 = vmul.f32 0.5, %v210_v0 }
 0x204   :  { %v309_v4 = vpop.f32.mrf.mxu0 }
 0x205   :  { %v222_v5 = vmul.f32 %v218_v2, %v210_v0  ;;  %v216_v6 = vmul.f32 0.044715, %v208_v3  ;;  %v211_v7 = vadd.f32 %v309_v4, %v278_v62  ;;  %v212_v38 = vmul.f32 0.5, %v208_v3 }
 0x206   :  { %v174_v8 = vpop.f32.mrf.mxu0 }
 0x207   :  { %v226_v9 = vmul.f32 %v222_v5, %v210_v0  ;;  %v220_v10 = vmul.f32 %v216_v6, %v208_v3  ;;  %v219_v11 = vmul.f32 0.044715, %v211_v7  ;;  %v209_v12 = vadd.f32 %v278_v62, %v174_v8 }
 0x208   :  { %v215_v32 = vmul.f32 0.5, %v211_v7 }
 0x209   :  { %v230_v13 = vadd.f32 %v226_v9, %v210_v0  ;;  %v224_v14 = vmul.f32 %v220_v10, %v208_v3  ;;  %v223_v15 = vmul.f32 %v219_v11, %v211_v7  ;;  %v217_v16 = vmul.f32 0.044715, %v209_v12 }
 0x20a   :  { %v213_v39 = vmul.f32 0.5, %v209_v12 }
 0x20b   :  { %v234_v17 = vmul.f32 0.7978846, %v230_v13  ;;  %v228_v18 = vadd.f32 %v224_v14, %v208_v3  ;;  %v227_v19 = vmul.f32 %v223_v15, %v211_v7  ;;  %v221_v20 = vmul.f32 %v217_v16, %v209_v12 }
 0x20d   :  { %320 = vtanh.f32 %v234_v17  ;;  %v232_v21 = vmul.f32 0.7978846, %v228_v18  ;;  %v231_v22 = vadd.f32 %v227_v19, %v211_v7  ;;  %v225_v23 = vmul.f32 %v221_v20, %v209_v12 }
 0x20f   :  { %v235_v24 = vmul.f32 0.7978846, %v231_v22  ;;  %322 = vtanh.f32 %v232_v21  ;;  %v229_v25 = vadd.f32 %v225_v23, %v209_v12 }
 0x211   :  { %324 = vtanh.f32 %v235_v24  ;;  %v233_v26 = vmul.f32 0.7978846, %v229_v25 }
 0x213   :  { %326 = vtanh.f32 %v233_v26 }
 0x21a   :  { %v321_v27 = vpop.eup %320 }
 0x21b   :  { %v242_v29 = vadd.f32 1.0, %v321_v27 }
 0x21c   :  { %v323_v28 = vpop.eup %322 }
 0x21d   :  { %v240_v34 = vadd.f32 1.0, %v323_v28  ;;  %v246_v36 = vmul.f32 %v242_v29, %v214_v31 }
 0x21e   :  { %v325_v30 = vpop.eup %324 }
 0x21f   :  { %v243_v33 = vadd.f32 1.0, %v325_v30  ;;  %v244_v42 = vmul.f32 %v240_v34, %v212_v38 }
 0x220   :  { %v327_v35 = vpop.eup %326 }
 0x221   :  { %v247_v37 = vmul.f32 %v243_v33, %v215_v32  ;;  %v241_v40 = vadd.f32 1.0, %v327_v35 }
 0x223   :  { %v295_v41 = vpack.c.bf16 %v247_v37, %v246_v36  ;;  %v245_v43 = vmul.f32 %v241_v40, %v213_v39 }
 0x225   :  { %297 = vst [vmem:[%s406_s5 + $0x8] sm:$0xff] %v295_v41   ;;  %v290_v44 = vpack.c.bf16 %v245_v43, %v244_v42 }
 0x227   :  { %291 = vst [vmem:[%s406_s5] sm:$0xff] %v290_v44  }

// kernel: _lambda_.33
= control target key start
LH: loop header
LB: loop body
LE: loop exit
PB: predicated region body
PF: predicated region fallthrough
CT: control target
= control target key end

     0   :  { %9 = vsyncpa [#allocation4], 0  ;;  %s2161_s0 = inlined_call_operand.vmem [shape: bf16[2,6,6,16], index: 0, kind: input, shape index: {}]   ;;  %s2162_s1 = inlined_call_operand.vmem [shape: bf16[9,16,16], index: 1, kind: input, shape index: {}]   ;;  %s2163_s2 = inlined_call_operand.vmem [shape: f32[1,16], index: 2, kind: input, shape index: {}]   ;;  %s2164_s3 = inlined_call_operand.vmem [shape: f32[1,16], index: 3, kind: input, shape index: {}]   ;;  %s2165_s4 = inlined_call_operand.hbm [shape: f32[2,4,4,16], index: 4, kind: output, shape index: {}]  }
   0x1   :  { %11 = vsyncpa [#allocation4 + $0x1], 0  ;;  %s1856_s15 = smov 0   ;;  %s1858_s16 = smov 0  }
   0x2   :  { %s1860_s17 = smov 0   ;;  %s1862_s18 = smov 0  }
   0x3 LB: > { %s1877_s19 = sadd.s32 4294967295, %s1823_s18   ;;  %s1513_s20 = sadd.s32 4294967294, %s1823_s18   ;;  %s1823_s18 = sphi %s1862_s18, %s2181_s18   ;;  %s1819_s17 = sphi %s1860_s17, %s2180_s17   ;;  %s1815_s16 = sphi %s1858_s16, %s2179_s16   ;;  %s1811_s15 = sphi %s1856_s15, %s2178_s15  }
   0x4   : > { %s1881_s21 = sadd.s32 1, %s1823_s18   ;;  %s113_s22 = sadd.s32 1, %s1819_s17 }
   0x5   : > { %s110_s23 = ssub.s32 %s1823_s18, %s1881_s21  ;;  %p123_p0 = scmp.ne.s32.totalorder %s1819_s17, %s1815_s16 }
   0x6   : > { %p111_p1 = scmp.eq.s32.totalorder %s110_s23, 0  ;;  %p124_p2 = scmp.eq.s32.totalorder %s1877_s19, 1 }
   0x7   : > { %p129_p3 = scmp.ne.s32.totalorder %s1815_s16, %s1811_s15  ;;  %p130_p4 = scmp.eq.s32.totalorder %s1513_s20, 1 }
   0x8   : > { %s1892_s24 = scalar_select %p111_p1, %s1819_s17, %s113_s22  }
   0x9   : > { %p1894_p5 = por %p124_p2, %p123_p0  ;;  %p1898_p6 = por %p130_p4, %p129_p3 }
   0xa   : > { %p1516_p7 = scmp.ge.s32.totalorder %s1823_s18, 1  ;;  %p165_p8 = scmp.lt.s32.totalorder %s1823_s18, 3 }
   0xc   : > { %p166_p9 = pnand %p1516_p7, %p165_p8 }
   0xd   : > { %p191_p10 = scmp.lt.s32.totalorder (!%p166_p9), %s1877_s19, 1  ;;  %s188_s7 = sand.u32 (!%p166_p9), 1, %s1815_s16  }
   0xe   : > { %169 = sbr.rel (%p166_p9) target bundleno = 649 (0x289), region = 36  ;;  %s1517_s10 = sshll.u32 (!%p166_p9), %s188_s7, 4 }
   0xf   : > { %s190_s13 = scalar_lea.vmem (!%p166_p9), [#allocation3], %s1517_s10  ;;  %s1620_s14 = sshll.u32 (!%p166_p9), %s1877_s19, 8 }
  0x10   : > { %s1451_s20 = sshll.u32 (!%p166_p9), %s190_s13, 4  ;;  %s2117_s27 = scalar_lea.hbm (!%p166_p9), %s2165_s4, %s1620_s14  ;;  %s2119_s20 = int_to_ptr.vmem [resolvable:$true] %s1451_s20 }
  0x11   : > { %s2121_s28 = scalar_lea.sflag (!%p166_p9), [#allocation4], %s188_s7  ;;  %s1763_s29 = scalar_lea.vmem (!%p166_p9), %s2119_s20, 256 }
  0x12   : > { %p1764_p11 = scmp.ne.s32.totalorder (!%p166_p9), %s2119_s20, %s1763_s29 }
  0x13   : > { %v1738_v0 = vld [vmem:[%s2162_s1] sm:$0xff]   ;;  %v217_v1 = vlaneseq  ;;  %v1825_v2 = vmov 0.0   ;;  %vm197_vm0 = vcmask 130048   ;;  %v1741_v3 = vld [vmem:[%s2162_s1 + $0x8] sm:$0xff]   ;;  %vm1826_vm1 = vmmov 0   ;;  %s192_s5 = scalar_select %p191_p10, %s1877_s19, 1 }
  0x14   : > { %1639 = vmatprep.subr.bf16.mxu0 %v1825_v2  ;;  %1645 = vmatprep.subr.bf16.mxu1 %v1825_v2  ;;  %v1827_v4 = vmov 1983009808   ;;  %198 = vst.msk [vmem:[#allocation2] sm:$0xff] %vm197_vm0, %v1825_v2  ;;  %199 = vst.msk [vmem:[#allocation2 + $0x8] sm:$0xff] %vm197_vm0, %v1825_v2  ;;  %vm325_vm2 = vsmask.f32 1280  ;;  %p1765_p12 = pnand %p1764_p11, %p1894_p5 }
  0x15   : > { %1640 = vmatpush3.bf16.msra.mxu0 %v1738_v0  ;;  %1641 = vmatprep.mubr.msk.bf16.mxu0 %vm1826_vm1, %v1825_v2  ;;  %v215_v5 = vunpack.c.l.s4 %v1827_v4  ;;  %v218_v6 = vshrl.u32 %v217_v1, 7  ;;  %s1693_s6 = smul.u32 24, %s192_s5  ;;  %vm326_vm3 = vsmask.f32 3336  ;;  %vm504_vm4 = vcmask 1040384   ;;  %v1742_v15 = vld [vmem:[%s2162_s1 + $0x10] sm:$0xff]  }
  0x16   : > { %1646 = vmatpush3.bf16.msra.mxu1 %v1741_v3  ;;  %1647 = vmatprep.mubr.msk.bf16.mxu1 %vm1826_vm1, %v1825_v2  ;;  %vm328_vm5 = vsmask.f32 5392  ;;  %vm330_vm6 = vsmask.f32 7448  ;;  %vm505_vm7 = vcmask 1042434   ;;  %vm507_vm8 = vcmask 1044484   ;;  %vm327_vm10 = vmor %vm325_vm2, %vm326_vm3  ;;  %p1766_p13 = pneg %p1765_p12 }
  0x17   : > { %v216_v7 = vunpack.c.0.s8 %v215_v5  ;;  %1651 = vmatprep.subr.bf16.mxu0 %v1825_v2  ;;  %1657 = vmatprep.subr.bf16.mxu1 %v1825_v2  ;;  %s1927_s9 = scalar_lea.vmem %s2161_s0, %s1693_s6  ;;  %vm509_vm9 = vcmask 1046534   ;;  %vm1942_vm11 = vmor %vm327_vm10, %vm328_vm5  ;;  %v1743_v34 = vld [vmem:[%s2162_s1 + $0x18] sm:$0xff]   ;;  %s1828_s19 = smov [#allocation3]  }
  0x18   : > { %v1757_v9 = vld.sshfl [vmem:[%s1927_s9] sm:$0xf pattern:$0x76325410]  ;;  %vm1949_vm12 = vmor %vm504_vm4, %vm505_vm7  ;;  %s1767_s30 = sshll.u32 %s1828_s19, 4  ;;  %s1768_s30 = int_to_ptr.vmem [resolvable:$false] %s1767_s30 }
  0x19   : > { %v1929_v8 = vsub.s32 %v216_v7, %v218_v6  ;;  %v1758_v10 = vld.sshfl [vmem:[%s1927_s9 + $0x8] sm:$0xf pattern:$0x76325410]  ;;  %vm1958_vm13 = vmor %vm1942_vm11, %vm330_vm6  ;;  %s1769_s5 = scalar_lea.vmem %s1768_s30, 512  ;;  %p1770_p0 = scmp.lt.s32.totalorder %s2119_s20, %s1768_s30 }
  0x1a   : > { %v1521_v11 = vld.sshfl [vmem:[%s1927_s9] sm:$0x13 pattern:$0x76325410]  ;;  %v228_v20 = vcombine.low %v1757_v9, %v1758_v10  ;;  %vm1966_vm14 = vmor %vm1949_vm12, %vm507_vm8  ;;  %p1771_p1 = scmp.lt.s32.totalorder %s1769_s5, %s1763_s29 }
  0x1b   : > { %v1522_v12 = vld.sshfl [vmem:[%s1927_s9 + $0x4] sm:$0x13 pattern:$0x76325410]  ;;  %v300_v13 = vcombine.high %v1521_v11, %v1521_v11  ;;  %v333_v14 = vshrl.u32 %v1521_v11, 16  ;;  %v336_v18 = vshll.u32 %v1521_v11, 16  ;;  %vm1978_vm15 = vmor %vm1966_vm14, %vm509_vm9 }
  0x1c   : > { %v1523_v16 = vld.sshfl [vmem:[%s1927_s9 + $0x8] sm:$0x13 pattern:$0x76325410]  ;;  %v308_v17 = vcombine.high %v1522_v12, %v1522_v12  ;;  %v347_v19 = vshrl.u32 %v1522_v12, 16  ;;  %v350_v29 = vshll.u32 %v1522_v12, 16  ;;  %1642 = vmatmul.mubr.msk.bf16.vlgmr.msra.gmra.mxu0 %vm197_vm0, %v228_v20  ;;  %p1772_p2 = por %p1771_p1, %p1770_p0 }
  0x1d   : > { %v1524_v21 = vld.sshfl [vmem:[%s1927_s9 + $0xc] sm:$0x13 pattern:$0x76325410]  ;;  %v316_v22 = vcombine.high %v1523_v16, %v1523_v16  ;;  %v335_v23 = vrot.slane %v333_v14, 6  ;;  %v342_v24 = vshll.u32 %v300_v13, 16  ;;  %1652 = vmatpush3.bf16.msra.mxu0 %v1742_v15  ;;  %1653 = vmatprep.mubr.msk.bf16.mxu0 %vm1826_vm1, %v1825_v2 }
  0x1e   : > { %v324_v25 = vcombine.high %v1524_v21, %v1524_v21  ;;  %v338_v27 = vrot.slane %v336_v18, 7  ;;  %v349_v28 = vrot.slane %v347_v19, 6  ;;  %v356_v31 = vshll.u32 %v308_v17, 16  ;;  %1663 = vmatprep.subr.bf16.mxu0 %v1825_v2  ;;  %p1773_p3 = pnand %p1772_p2, %p1766_p13 }
  0x1f   : > { %v344_v30 = vrot.slane %v342_v24, 7  ;;  %v361_v32 = vshrl.u32 %v1523_v16, 16  ;;  %v364_v33 = vshll.u32 %v1523_v16, 16  ;;  %v352_v36 = vrot.slane %v350_v29, 7 }
  0x20   : > { %v339_v35 = vor.u32 %v338_v27, %v335_v23  ;;  %v370_v37 = vshll.u32 %v316_v22, 16  ;;  %v375_v38 = vshrl.u32 %v1524_v21, 16  ;;  %v358_v40 = vrot.slane %v356_v31, 7 }
  0x21   : > { %v363_v41 = vrot.slane %v361_v32, 6  ;;  %v366_v42 = vrot.slane %v364_v33, 7  ;;  %v378_v43 = vshll.u32 %v1524_v21, 16  ;;  %v353_v45 = vor.u32 %v352_v36, %v349_v28 }
  0x22   : > { %v340_v44 = vrot.slane %v339_v35, 2  ;;  %v372_v46 = vrot.slane %v370_v37, 7  ;;  %v377_v47 = vrot.slane %v375_v38, 6  ;;  %v384_v51 = vshll.u32 %v324_v25, 16 }
  0x23   : > { %v367_v49 = vor.u32 %v366_v42, %v363_v41  ;;  %v380_v50 = vrot.slane %v378_v43, 7  ;;  %v1529_v52 = vld.sshfl [vmem:[%s1927_s9] sm:$0x12 pattern:$0x76325410]  ;;  %v354_v54 = vrot.slane %v353_v45, 2 }
  0x24   : > { %v345_v53 = vsel %vm1958_vm13, %v340_v44, %v344_v30  ;;  %v1530_v55 = vld.sshfl [vmem:[%s1927_s9 + $0x4] sm:$0x12 pattern:$0x76325410]  ;;  %v479_v56 = vcombine.high %v1529_v52, %v1529_v52  ;;  %v1533_v57 = vrot.slane %v1529_v52, 9  ;;  %v386_v60 = vrot.slane %v384_v51, 7 }
  0x25   : > { %v368_v58 = vrot.slane %v367_v49, 2  ;;  %v381_v59 = vor.u32 %v380_v50, %v377_v47  ;;  %v1531_v61 = vld.sshfl [vmem:[%s1927_s9 + $0x8] sm:$0x12 pattern:$0x76325410]  ;;  %v487_v62 = vcombine.high %v1530_v55, %v1530_v55  ;;  %v1984_v0 = vsel %vm1958_vm13, %v354_v54, %v358_v40  ;;  %v1746_v42 = vld [vmem:[%s2162_s1 + $0x20] sm:$0xff]  }
  0x26   : > { %v1532_v1 = vld.sshfl [vmem:[%s1927_s9 + $0xc] sm:$0x12 pattern:$0x76325410]  ;;  %v495_v3 = vcombine.high %v1531_v61, %v1531_v61  ;;  %v513_v4 = vrot.slane %v479_v56, 7  ;;  %v1534_v5 = vrot.slane %v1530_v55, 9  ;;  %v391_v9 = vcombine.low %v345_v53, %v1984_v0 }
  0x27   : > { %v1989_v6 = vsel %vm1958_vm13, %v368_v58, %v372_v46  ;;  %v382_v7 = vrot.slane %v381_v59, 2  ;;  %v503_v10 = vcombine.high %v1532_v1, %v1532_v1  ;;  %v517_v12 = vrot.slane %v487_v62, 7  ;;  %v1997_v18 = vld.sshfl [vmem:[%s1927_s9 + $0x4] sm:$0xf pattern:$0x76325410] }
  0x28   : > { %v514_v11 = vsel %vm1978_vm15, %v1533_v57, %v513_v4  ;;  %v1535_v13 = vrot.slane %v1531_v61, 9  ;;  %v521_v14 = vrot.slane %v495_v3, 7  ;;  %v1536_v16 = vrot.slane %v1532_v1, 9  ;;  %v1747_v4 = vld [vmem:[%s2162_s1 + $0x28] sm:$0xff]  }
  0x29   : > { %v387_v15 = vsel %vm1958_vm13, %v382_v7, %v386_v60  ;;  %v525_v17 = vrot.slane %v503_v10, 7  ;;  %v1760_v19 = vld.sshfl [vmem:[%s1927_s9 + $0xc] sm:$0xf pattern:$0x76325410]  ;;  %v399_v22 = vrot.slane %v391_v9, %v1929_v8  ;;  %v518_v23 = vsel %vm1978_vm15, %v1534_v5, %v517_v12 }
  0x2a   : > { %v1556_v20 = vld.sshfl [vmem:[%s1927_s9 + $0x10] sm:$0x13 pattern:$0x76325410]  ;;  %v392_v21 = vcombine.low %v1989_v6, %v387_v15  ;;  %v522_v24 = vsel %vm1978_vm15, %v1535_v13, %v521_v14  ;;  %v530_v27 = vcombine.low %v514_v11, %v518_v23  ;;  %v787_v49 = vcombine.low %v1984_v0, %v1989_v6 }
  0x2b   : > { %v1568_v25 = vld.sshfl [vmem:[%s1927_s9 + $0x10] sm:$0x12 pattern:$0x76325410]  ;;  %v526_v26 = vsel %vm1978_vm15, %v1536_v16, %v525_v17  ;;  %v727_v28 = vcombine.high %v1556_v20, %v1556_v20  ;;  %v771_v29 = vshrl.u32 %v1556_v20, 16  ;;  %v774_v32 = vshll.u32 %v1556_v20, 16 }
  0x2c   : > { %v2011_v30 = vrot.slane %v392_v21, %v1929_v8  ;;  %v531_v31 = vcombine.low %v522_v24, %v526_v26  ;;  %v538_v33 = vrot.slane %v530_v27, %v1929_v8  ;;  %v899_v41 = vcombine.high %v1568_v25, %v1568_v25  ;;  %v1592_v48 = vld.sshfl [vmem:[%s1927_s9 + $0x14] sm:$0x13 pattern:$0x76325410] }
  0x2d   : > { %v773_v35 = vrot.slane %v771_v29, 6  ;;  %v780_v36 = vshll.u32 %v727_v28, 16  ;;  %v776_v40 = vrot.slane %v774_v32, 7  ;;  %v1572_v43 = vrot.slane %v1568_v25, 9  ;;  %v1748_v13 = vld [vmem:[%s2162_s1 + $0x30] sm:$0xff]   ;;  %v1752_v25 = vld [vmem:[%s2162_s1 + $0x40] sm:$0xff]  }
  0x2e   : > { %v407_v37 = vcombine.low %v399_v22, %v2011_v30  ;;  %v2019_v38 = vrot.slane %v531_v31, %v1929_v8  ;;  %v914_v47 = vrot.slane %v899_v41, 7  ;;  %v1116_v50 = vcombine.high %v1592_v48, %v1592_v48  ;;  %v1604_v55 = vld.sshfl [vmem:[%s1927_s9 + $0x14] sm:$0x12 pattern:$0x76325410]  ;;  %v1751_v22 = vld [vmem:[%s2162_s1 + $0x38] sm:$0xff]  }
  0x2f   : > { %v777_v45 = vor.u32 %v776_v40, %v773_v35  ;;  %v782_v46 = vrot.slane %v780_v36, 7  ;;  %v1160_v51 = vshrl.u32 %v1592_v48, 16  ;;  %v1163_v54 = vshll.u32 %v1592_v48, 16  ;;  %v204_v28 = vld [vmem:[#allocation2] sm:$0xff] }
  0x30   : > { %1648 = vmatmul.mubr.msk.bf16.vlgmr.msra.gmra.mxu1 %vm197_vm0, %v407_v37  ;;  %v546_v44 = vcombine.low %v538_v33, %v2019_v38  ;;  %v915_v53 = vsel %vm1978_vm15, %v1572_v43, %v914_v47  ;;  %v631_v56 = vcombine.low %v1997_v18, %v1760_v19  ;;  %v919_v57 = vcombine.low %v518_v23, %v522_v24  ;;  %v1761_v10 = vld.sshfl [vmem:[%s1927_s9 + $0x8] sm:$0xf pattern:$0x76325410] }
  0x31   : > { %1658 = vmatpush3.bf16.msra.mxu1 %v1743_v34  ;;  %1659 = vmatprep.mubr.msk.bf16.mxu1 %vm1826_vm1, %v1825_v2  ;;  %v778_v52 = vrot.slane %v777_v45, 2  ;;  %v1162_v58 = vrot.slane %v1160_v51, 6  ;;  %v1169_v59 = vshll.u32 %v1116_v50, 16  ;;  %v920_v61 = vcombine.low %v526_v26, %v915_v53  ;;  %v205_v33 = vld [vmem:[#allocation2 + $0x8] sm:$0xff] }
  0x32   : > { %1654 = vmatmul.mubr.msk.bf16.vlgmr.msra.gmra.mxu0 %vm197_vm0, %v546_v44  ;;  %1669 = vmatprep.subr.bf16.mxu1 %v1825_v2  ;;  %v1165_v62 = vrot.slane %v1163_v54, 7  ;;  %v1288_v0 = vcombine.high %v1604_v55, %v1604_v55  ;;  %v795_v3 = vrot.slane %v787_v49, %v1929_v8  ;;  %v927_v9 = vrot.slane %v919_v57, %v1929_v8  ;;  %v1762_v11 = vld.sshfl [vmem:[%s1927_s9 + $0x10] sm:$0xf pattern:$0x76325410] }
  0x33   : > { %1664 = vmatpush3.bf16.msra.mxu0 %v1746_v42  ;;  %1665 = vmatprep.mubr.msk.bf16.mxu0 %vm1826_vm1, %v1825_v2  ;;  %v783_v60 = vsel %vm1958_vm13, %v778_v52, %v782_v46  ;;  %v1171_v6 = vrot.slane %v1169_v59, 7  ;;  %v934_v12 = vrot.slane %v920_v61, %v1929_v8  ;;  %v1020_v23 = vcombine.low %v1761_v10, %v1762_v11 }
  0x34   : > { %1675 = vmatprep.subr.bf16.mxu0 %v1825_v2  ;;  %v788_v1 = vcombine.low %v387_v15, %v783_v60  ;;  %v1166_v5 = vor.u32 %v1165_v62, %v1162_v58  ;;  %v1608_v15 = vrot.slane %v1604_v55, 9  ;;  %v1303_v16 = vrot.slane %v1288_v0, 7 }
  0x35   : > { %v935_v19 = vcombine.low %v927_v9, %v934_v12 }
  0x36   : > { %v802_v7 = vrot.slane %v788_v1, %v1929_v8  ;;  %v1167_v14 = vrot.slane %v1166_v5, 2  ;;  %v1304_v21 = vsel %vm1978_vm15, %v1608_v15, %v1303_v16 }
  0x37   : > { %v1309_v39 = vcombine.low %v915_v53, %v1304_v21 }
  0x38   : > { %1660 = vmatmul.mubr.msk.bf16.vlgmr.msra.gmra.mxu1 %vm197_vm0, %v631_v56  ;;  %v803_v17 = vcombine.low %v795_v3, %v802_v7  ;;  %v1172_v18 = vsel %vm1958_vm13, %v1167_v14, %v1171_v6 }
  0x39   : > { %1670 = vmatpush3.bf16.msra.mxu1 %v1747_v4  ;;  %1671 = vmatprep.mubr.msk.bf16.mxu1 %vm1826_vm1, %v1825_v2  ;;  %v1177_v20 = vcombine.low %v783_v60, %v1172_v18  ;;  %v1323_v63 = vrot.slane %v1309_v39, %v1929_v8 }
  0x3a   : > { %1681 = vmatprep.subr.bf16.mxu1 %v1825_v2  ;;  %1666 = vmatmul.mubr.msk.bf16.vlgmr.msra.gmra.mxu0 %vm197_vm0, %v803_v17 }
  0x3b   : > { %1676 = vmatpush3.bf16.msra.mxu0 %v1748_v13  ;;  %1677 = vmatprep.mubr.msk.bf16.mxu0 %vm1826_vm1, %v1825_v2  ;;  %v1191_v24 = vrot.slane %v1177_v20, %v1929_v8  ;;  %v1324_v27 = vcombine.low %v2019_v38, %v1323_v63 }
  0x3c   : > { %1687 = vmatprep.subr.bf16.mxu0 %v1825_v2 }
  0x3d   : > { %v1192_v26 = vcombine.low %v2011_v30, %v1191_v24 }
  0x40   : > { %1672 = vmatmul.mubr.msk.bf16.vlgmr.msra.gmra.mxu1 %vm197_vm0, %v935_v19 }
  0x41   : > { %1682 = vmatpush3.bf16.msra.mxu1 %v1751_v22  ;;  %1683 = vmatprep.mubr.msk.bf16.mxu1 %vm1826_vm1, %v1825_v2 }
  0x42   : > { %1678 = vmatmul.mubr.msk.bf16.vlgmr.msra.gmra.mxu0 %vm197_vm0, %v1020_v23 }
  0x43   : > { %1688 = vmatpush3.bf16.msra.mxu0 %v1752_v25  ;;  %1689 = vmatprep.mubr.msk.bf16.mxu0 %vm1826_vm1, %v1825_v2 }
  0x48   : > { %1684 = vmatmul.mubr.msk.bf16.vlgmr.msra.gmra.mxu1 %vm197_vm0, %v1192_v26 }
  0x4a   : > { %1690 = vmatmul.mubr.msk.bf16.vlgmr.msra.gmra.mxu0 %vm197_vm0, %v1324_v27 }
  0xdc   : > { %v272_v29 = vpop.f32.mrf.mxu0 }
  0xdd   : > { %v279_v31 = vadd.f32 %v272_v29, %v204_v28 }
  0xde   : > { %v1643_v32 = vpop.f32.mrf.mxu0 }
  0xdf   : > { %281 = vst.msk [vmem:[#allocation2] sm:$0xff] %vm197_vm0, %v279_v31 }
  0xe0   : > { %v275_v8 = vpop.f32.mrf.mxu0 }
  0xe1   : > { %v280_v34 = vadd.f32 %v275_v8, %v205_v33 }
  0xe2   : > { %v1644_v30 = vpop.f32.mrf.mxu0 }
  0xe3   : > { %282 = vst.msk [vmem:[#allocation2 + $0x8] sm:$0xff] %vm197_vm0, %v280_v34 }
  0xe6   : > { %v287_v35 = vld [vmem:[#allocation2] sm:$0xff] }
  0xea   : > { %v288_v38 = vld [vmem:[#allocation2 + $0x8] sm:$0xff] }
  0xf0   : > { %v451_v2 = vpop.f32.mrf.mxu1 }
  0xf1   : > { %v458_v36 = vadd.f32 %v451_v2, %v287_v35 }
  0xf2   : > { %v1649_v37 = vpop.f32.mrf.mxu1  ;;  %v590_v40 = vpop.f32.mrf.mxu0 }
  0xf3   : > { %460 = vst.msk [vmem:[#allocation2] sm:$0xff] %vm197_vm0, %v458_v36 }
  0xf4   : > { %v454_v41 = vpop.f32.mrf.mxu1  ;;  %v1655_v42 = vpop.f32.mrf.mxu0 }
  0xf5   : > { %v459_v43 = vadd.f32 %v454_v41, %v288_v38 }
  0xf6   : > { %v1650_v44 = vpop.f32.mrf.mxu1  ;;  %v593_v45 = vpop.f32.mrf.mxu0 }
  0xf7   : > { %461 = vst.msk [vmem:[#allocation2 + $0x8] sm:$0xff] %vm197_vm0, %v459_v43 }
  0xf8   : > { %v1656_v46 = vpop.f32.mrf.mxu0  ;;  %v675_v47 = vpop.f32.mrf.mxu1 }
  0xfa   : > { %v466_v48 = vld [vmem:[#allocation2] sm:$0xff]  ;;  %v1661_v49 = vpop.f32.mrf.mxu1  ;;  %v847_v51 = vpop.f32.mrf.mxu0 }
  0xfb   : > { %v597_v50 = vadd.f32 %v590_v40, %v466_v48 }
  0xfc   : > { %v678_v52 = vpop.f32.mrf.mxu1  ;;  %v1667_v53 = vpop.f32.mrf.mxu0 }
  0xfd   : > { %599 = vst.msk [vmem:[#allocation2] sm:$0xff] %vm197_vm0, %v597_v50 }
  0xfe   : > { %v467_v54 = vld [vmem:[#allocation2 + $0x8] sm:$0xff]  ;;  %v1662_v55 = vpop.f32.mrf.mxu1  ;;  %v850_v57 = vpop.f32.mrf.mxu0 }
  0xff   : > { %v598_v56 = vadd.f32 %v593_v45, %v467_v54 }
 0x100   : > { %v979_v58 = vpop.f32.mrf.mxu1  ;;  %v1668_v59 = vpop.f32.mrf.mxu0 }
 0x101   : > { %600 = vst.msk [vmem:[#allocation2 + $0x8] sm:$0xff] %vm197_vm0, %v598_v56  ;;  %v1613_v56 = vld [vmem:[%s2163_s2] ss:$0 sm:$0xff] }
 0x102   : > { %v1673_v60 = vpop.f32.mrf.mxu1  ;;  %v1064_v61 = vpop.f32.mrf.mxu0 }
 0x104   : > { %v606_v62 = vld [vmem:[#allocation2] sm:$0xff]  ;;  %v982_v0 = vpop.f32.mrf.mxu1  ;;  %v1679_v3 = vpop.f32.mrf.mxu0 }
 0x105   : > { %v682_v1 = vadd.f32 %v675_v47, %v606_v62 }
 0x106   : > { %v1674_v4 = vpop.f32.mrf.mxu1  ;;  %v1067_v5 = vpop.f32.mrf.mxu0 }
 0x107   : > { %684 = vst.msk [vmem:[#allocation2] sm:$0xff] %vm197_vm0, %v682_v1 }
 0x108   : > { %v607_v6 = vld [vmem:[#allocation2 + $0x8] sm:$0xff]  ;;  %v1236_v7 = vpop.f32.mrf.mxu1  ;;  %v1680_v10 = vpop.f32.mrf.mxu0 }
 0x109   : > { %v683_v9 = vadd.f32 %v678_v52, %v607_v6 }
 0x10a   : > { %v1685_v11 = vpop.f32.mrf.mxu1  ;;  %v1368_v12 = vpop.f32.mrf.mxu0 }
 0x10b   : > { %685 = vst.msk [vmem:[#allocation2 + $0x8] sm:$0xff] %vm197_vm0, %v683_v9 }
 0x10c   : > { %v1239_v13 = vpop.f32.mrf.mxu1  ;;  %v1691_v14 = vpop.f32.mrf.mxu0 }
 0x10e   : > { %v690_v15 = vld [vmem:[#allocation2] sm:$0xff]  ;;  %v1686_v16 = vpop.f32.mrf.mxu1  ;;  %v1371_v18 = vpop.f32.mrf.mxu0 }
 0x10f   : > { %v854_v17 = vadd.f32 %v847_v51, %v690_v15 }
 0x110   : > { %v1692_v19 = vpop.f32.mrf.mxu0 }
 0x111   : > { %856 = vst.msk [vmem:[#allocation2] sm:$0xff] %vm197_vm0, %v854_v17 }
 0x112   : > { %v691_v20 = vld [vmem:[#allocation2 + $0x8] sm:$0xff] }
 0x113   : > { %v855_v21 = vadd.f32 %v850_v57, %v691_v20 }
 0x115   : > { %857 = vst.msk [vmem:[#allocation2 + $0x8] sm:$0xff] %vm197_vm0, %v855_v21 }
 0x118   : > { %v862_v22 = vld [vmem:[#allocation2] sm:$0xff] }
 0x119   : > { %v986_v23 = vadd.f32 %v979_v58, %v862_v22  ;;  %v1614_v58 = vld [vmem:[%s2164_s3] ss:$0 sm:$0xff] }
 0x11b   : > { %988 = vst.msk [vmem:[#allocation2] sm:$0xff] %vm197_vm0, %v986_v23 }
 0x11c   : > { %v863_v39 = vld [vmem:[#allocation2 + $0x8] sm:$0xff] }
 0x11d   : > { %v987_v24 = vadd.f32 %v982_v0, %v863_v39 }
 0x11f   : > { %989 = vst.msk [vmem:[#allocation2 + $0x8] sm:$0xff] %vm197_vm0, %v987_v24 }
 0x122   : > { %v995_v25 = vld [vmem:[#allocation2] sm:$0xff] }
 0x123   : > { %v1071_v63 = vadd.f32 %v1064_v61, %v995_v25 }
 0x125   : > { %1073 = vst.msk [vmem:[#allocation2] sm:$0xff] %vm197_vm0, %v1071_v63 }
 0x126   : > { %v996_v26 = vld [vmem:[#allocation2 + $0x8] sm:$0xff] }
 0x127   : > { %v1072_v27 = vadd.f32 %v1067_v5, %v996_v26 }
 0x129   : > { %1074 = vst.msk [vmem:[#allocation2 + $0x8] sm:$0xff] %vm197_vm0, %v1072_v27 }
 0x12c   : > { %v1079_v28 = vld [vmem:[#allocation2] sm:$0xff] }
 0x12d   : > { %v1243_v29 = vadd.f32 %v1236_v7, %v1079_v28 }
 0x12f   : > { %1245 = vst.msk [vmem:[#allocation2] sm:$0xff] %vm197_vm0, %v1243_v29 }
 0x130   : > { %v1080_v31 = vld [vmem:[#allocation2 + $0x8] sm:$0xff] }
 0x131   : > { %v1244_v32 = vadd.f32 %v1239_v13, %v1080_v31 }
 0x133   : > { %1246 = vst.msk [vmem:[#allocation2 + $0x8] sm:$0xff] %vm197_vm0, %v1244_v32 }
 0x136   : > { %v1251_v33 = vld [vmem:[#allocation2] sm:$0xff] }
 0x137   : > { %v1375_v8 = vadd.f32 %v1368_v12, %v1251_v33 }
 0x139   : > { %1377 = vst.msk [vmem:[#allocation2] sm:$0xff] %vm197_vm0, %v1375_v8 }
 0x13a   : > { %v1252_v34 = vld [vmem:[#allocation2 + $0x8] sm:$0xff] }
 0x13b   : > { %v1376_v30 = vadd.f32 %v1371_v18, %v1252_v34 }
 0x13d   : > { %1378 = vst.msk [vmem:[#allocation2 + $0x8] sm:$0xff] %vm197_vm0, %v1376_v30 }
 0x140   : > { %v1379_v35 = vld [vmem:[#allocation2] sm:$0xff] }
 0x141   : > { %v1381_v2 = vsel %vm197_vm0, %v1379_v35, 0.0 }
 0x142   : > { %1382 = vadd.xlane.f32.xlu0 %v1381_v2 }
 0x144   : > { %v1380_v36 = vld [vmem:[#allocation2 + $0x8] sm:$0xff] }
 0x145   : > { %v1384_v37 = vsel %vm197_vm0, %v1380_v36, 0.0 }
 0x146   : > { %1385 = vadd.xlane.f32.xlu0 %v1384_v37 }
 0x1cb   : > { %v1383_v38 = vpop.xlane.xlu0 %1382 }
 0x1cc   : > { %v1388_v40 = vmul.f32 0.0625, %v1383_v38 }
 0x1ce   : > { %v1390_v41 = vsub.f32 %v1379_v35, %v1388_v40 }
 0x1cf   : > { %v1386_v42 = vpop.xlane.xlu0 %1385 }
 0x1d0   : > { %v1389_v43 = vmul.f32 0.0625, %v1386_v42  ;;  %v1392_v44 = vmul.f32 %v1390_v41, %v1390_v41 }
 0x1d2   : > { %v1391_v45 = vsub.f32 %v1380_v36, %v1389_v43  ;;  %v1394_v46 = vsel %vm197_vm0, %v1392_v44, 0.0 }
 0x1d3   : > { %1395 = vadd.xlane.f32.xlu1 %v1394_v46 }
 0x1d4   : > { %v1393_v47 = vmul.f32 %v1391_v45, %v1391_v45 }
 0x1d6   : > { %v1397_v48 = vsel %vm197_vm0, %v1393_v47, 0.0  ;;  %vm1432_vm0 = vcmask 125952  }
 0x1d7   : > { %1398 = vadd.xlane.f32.xlu1 %v1397_v48 }
 0x25c   : > { %v1396_v49 = vpop.xlane.xlu1 %1395 }
 0x25d   : > { %v1400_v50 = vmul.f32 0.0625, %v1396_v49 }
 0x25f   : > { %v1402_v51 = vadd.f32 1e-06, %v1400_v50 }
 0x260   : > { %v1399_v52 = vpop.xlane.xlu1 %1398 }
 0x261   : > { %1753 = vrsqrt.f32 %v1402_v51  ;;  %v1401_v53 = vmul.f32 0.0625, %v1399_v52 }
 0x263   : > { %v1403_v54 = vadd.f32 1e-06, %v1401_v53 }
 0x265   : > { %1755 = vrsqrt.f32 %v1403_v54 }
 0x26e   : > { %v1754_v55 = vpop.eup %1753 }
 0x26f   : > { %v1406_v57 = vmul.f32 %v1754_v55, %v1390_v41 }
 0x271   : > { %v1415_v59 = vmul.f32 %v1613_v56, %v1406_v57 }
 0x272   : > { %v1756_v60 = vpop.eup %1755 }
 0x273   : > { %v1424_v61 = vadd.f32 %v1614_v58, %v1415_v59  ;;  %v1407_v62 = vmul.f32 %v1756_v60, %v1391_v45 }
 0x275   : > { %v1428_v0 = vcombine.high %v1424_v61, %v1424_v61  ;;  %v1416_v1 = vmul.f32 %v1613_v56, %v1407_v62  ;;  %1433 = vst.msk [vmem:[%s190_s13] sm:$0xf] %vm1432_vm0, %v1424_v61 }
 0x277   : > { %v1425_v3 = vadd.f32 %v1614_v58, %v1416_v1  ;;  %1434 = vst.msk [vmem:[%s190_s13 + $0x4] sm:$0xf] %vm1432_vm0, %v1428_v0 }
 0x279   : > { %v1429_v4 = vcombine.high %v1425_v3, %v1425_v3  ;;  %1435 = vst.msk [vmem:[%s190_s13 + $0x8] sm:$0xf] %vm1432_vm0, %v1425_v3 }
 0x27b   : > { %1436 = vst.msk [vmem:[%s190_s13 + $0xc] sm:$0xf] %vm1432_vm0, %v1429_v4 }
 0x27c   : > { %1776 = shalt.err (!%p1773_p3)
}
 0x27d   : > { %s1777_s6 = scalar_lea.hbm %s2117_s27, 256  ;;  %s1781_s9 = scalar_lea.hbm %s2165_s4, 512 }
 0x27e   : > { %p1778_p4 = scmp.ne.s32.totalorder %s2117_s27, %s1777_s6  ;;  %p1782_p9 = scmp.lt.s32.totalorder %s2117_s27, %s2165_s4 }
 0x27f   : > { %p1783_p10 = scmp.lt.s32.totalorder %s1781_s9, %s1777_s6 }
 0x280   : > { %p1779_p7 = pnand %p1778_p4, %p1894_p5 }
 0x281   : > { %p1784_p11 = por %p1783_p10, %p1782_p9 }
 0x282   : > { %p1780_p8 = pneg %p1779_p7 }
 0x284   : > { %p1785_p12 = pnand %p1784_p11, %p1780_p8 }
 0x286   : > { %1788 = shalt.err (!%p1785_p12)
}
 0x287   : > { %s1829_s12 = smov 64   ;;  %s1830_s13 = smov 4  }
 0x288   : > { %1694 = dma.vmem_to_hbm [thread:$0]  (%p1894_p5), %s2119_s20, 256, %s2117_s27, %s2121_s28, %s1829_s12, %s1829_s12, %s1830_s13  }
 0x289 PF: > { %p1700_p13 = scmp.ge.s32.totalorder %s1823_s18, 2  ;;  %s1466_s14 = sand.u32 1, %s1811_s15  }
 0x28a   : > { %s1467_s22 = scalar_lea.sflag [#allocation4], %s1466_s14 }
 0x28b   : > { %p1697_p0 = pnand %p1700_p13, %p1898_p6 }
 0x28d   : > { %p1698_p1 = pneg %p1697_p0 }
 0x28f   : > { %1806 = dma.done.wait (%p1698_p1), %s1467_s22, 256  }
 0x290   : > { %1808 = vsyncadd (%p1698_p1), %s1467_s22, 4294967040  ;;  %p14_p2 = scmp.ge.s32.totalorder %s1881_s21, 4   ;;  %s2178_s15 = smov %s1815_s16 }
 0x291   : > { %s2179_s16 = smov %s1819_s17  ;;  %s2180_s17 = smov %s1892_s24 }
 0x292   : > { %s2181_s18 = smov %s1881_s21  ;;  %16 = sbr.rel (!%p14_p2) target bundleno = 3 (0x3), region = 81 }
 0x297   :  { %1472 = vsyncpa [#allocation4], 1 }
 0x298   :  { %1474 = vsyncpa [#allocation4 + $0x1], 1 }

</bundles_post_ra>
